<compile_context>
chip_gen: v5e
topology: v5e:2x2
jax: 0.10.0
libtpu: 0.0.40
codegen_flags: <defaults>
</compile_context>

<pallas_src>
import math
import functools

import jax
import jax.numpy as jnp
from jax import lax
from jax.experimental import pallas as pl
from jax.experimental.pallas import tpu as pltpu


_VMEM_LIMIT = 32 * 1024 * 1024  # safe on v5e/v6e/v7x; usage here is ~2 MiB


# ----------------------------------------------------------------------------
# Fully fused attention layer kernel (one grid step per batch element).
# ----------------------------------------------------------------------------
def _layer_kernel(q_ref, k_ref, v_ref,
                  wq_ref, wk_ref, wv_ref,
                  bq_ref, bk_ref, bv_ref,
                  wo_ref, bo_ref,
                  *rest,
                  num_heads, head_dim, has_mask):
    if has_mask:
        mask_ref, o_ref = rest
        mask = mask_ref[0]                    # (Lq, Lk) f32, per-batch block
    else:
        (o_ref,) = rest
        mask = None

    bf16 = jnp.bfloat16
    f32 = jnp.float32

    # ---- in-projections (1/sqrt(Dh) already folded into wq / bq) ----------
    qp = jnp.dot(q_ref[0].astype(bf16), wq_ref[...],
                 preferred_element_type=f32) + bq_ref[...]        # (Lq, E)
    kp = jnp.dot(k_ref[0].astype(bf16), wk_ref[...],
                 preferred_element_type=f32) + bk_ref[...]        # (Lk, E)
    vp = jnp.dot(v_ref[0].astype(bf16), wv_ref[...],
                 preferred_element_type=f32) + bv_ref[...]        # (Lk, E)

    # ---- sfdp pattern #5 per head (f32 softmax, bf16 MXU inputs) ----------
    # Tiny per-head tiles -> static unroll is fine here.
    # TODO(synk): switch to lax.fori_loop + pl.ds if Lq / head_dim grow.
    ctxs = []
    for h in range(num_heads):
        lo = h * head_dim
        hi = lo + head_dim
        q_h = qp[:, lo:hi].astype(bf16)
        k_h = kp[:, lo:hi].astype(bf16)
        v_h = vp[:, lo:hi].astype(bf16)

        # scores = (Q * scale) @ K^T  -- contract last dims, no explicit K.T
        s = lax.dot_general(q_h, k_h, (((1,), (1,)), ((), ())),
                            preferred_element_type=f32)           # (Lq, Lk)
        if mask is not None:
            s = s + mask

        # numerically-stable softmax in f32
        m = jnp.max(s, axis=-1, keepdims=True)
        p = jnp.exp(s - m)
        denom = jnp.sum(p, axis=-1, keepdims=True)

        ctx = lax.dot_general(p.astype(bf16), v_h, (((1,), (0,)), ((), ())),
                              preferred_element_type=f32)         # (Lq, Dh)
        ctxs.append(ctx * pl.reciprocal(denom, approx=True))

    # Merge heads in-register -> one lane-dense (Lq, E) slab (no masked stores)
    ctx_all = jnp.concatenate(ctxs, axis=-1)                      # (Lq, E) f32

    # ---- output projection + single unmasked (Lq, E) store ----------------
    out = jnp.dot(ctx_all.astype(bf16), wo_ref[...],
                  preferred_element_type=f32) + bo_ref[...]
    o_ref[0] = out.astype(o_ref.dtype)


def attention_layer(params, q, k, v, attn_mask, num_heads, out_dtype):
    B, Lq, E = q.shape
    Lk = k.shape[1]
    Dh = E // num_heads

    operands = [q, k, v,
                params["wq"], params["wk"], params["wv"],
                params["bq"], params["bk"], params["bv"],
                params["wo"], params["bo"]]
    in_specs = [
        pl.BlockSpec((1, Lq, E), lambda b: (b, 0, 0)),
        pl.BlockSpec((1, Lk, E), lambda b: (b, 0, 0)),
        pl.BlockSpec((1, Lk, E), lambda b: (b, 0, 0)),
        pl.BlockSpec((E, E), lambda b: (0, 0)),
        pl.BlockSpec((E, E), lambda b: (0, 0)),
        pl.BlockSpec((E, E), lambda b: (0, 0)),
        pl.BlockSpec((1, E), lambda b: (0, 0)),
        pl.BlockSpec((1, E), lambda b: (0, 0)),
        pl.BlockSpec((1, E), lambda b: (0, 0)),
        pl.BlockSpec((E, E), lambda b: (0, 0)),
        pl.BlockSpec((1, E), lambda b: (0, 0)),
    ]

    has_mask = attn_mask is not None
    if has_mask:
        m = jnp.asarray(attn_mask, jnp.float32)
        if m.ndim == 4:
            # TODO(synk): per-head masks (B, H>1, Lq, Lk) are not supported.
            assert m.shape[1] == 1, "per-head attention masks unsupported"
            m = m.reshape(m.shape[0], m.shape[2], m.shape[3])
        if m.ndim == 2:
            m = jnp.broadcast_to(m, (B, Lq, Lk))
        assert m.shape == (B, Lq, Lk)
        operands.append(m)
        in_specs.append(pl.BlockSpec((1, Lq, Lk), lambda b: (b, 0, 0)))

    kernel = functools.partial(
        _layer_kernel, num_heads=num_heads, head_dim=Dh, has_mask=has_mask)

    return pl.pallas_call(
        kernel,
        out_shape=jax.ShapeDtypeStruct((B, Lq, E), out_dtype),
        grid=(B,),
        in_specs=in_specs,
        out_specs=pl.BlockSpec((1, Lq, E), lambda b: (b, 0, 0)),
        compiler_params=pltpu.CompilerParams(
            dimension_semantics=("parallel",),
            vmem_limit_bytes=_VMEM_LIMIT,
        ),
    )(*operands)


def model_forward(layer_params, query, key, value, attn_mask, num_heads,
                  out_dtype=jnp.float32):
    q, k, v = query, key, value
    n = len(layer_params)
    out = query
    for i, p in enumerate(layer_params):
        # bf16 activations between layers (halves inter-layer HBM traffic);
        # the final layer output stays in f32.
        layer_dtype = out_dtype if i == n - 1 else jnp.bfloat16
        out = attention_layer(p, q, k, v, attn_mask, num_heads, layer_dtype)
        q = k = v = out  # stacked self-attention: output feeds the next layer
    return out


# ----------------------------------------------------------------------------
# Parameter init + one-time prep (scale fold, QKV split, bf16 pre-cast)
# ----------------------------------------------------------------------------
def init_layer_params(key, embedding_dim, dtype=jnp.float32):
    ks = jax.random.split(key, 4)
    s = 0.02
    E = embedding_dim
    return {
        "wqkv": s * jax.random.normal(ks[0], (E, 3 * E), dtype),
        "bqkv": s * jax.random.normal(ks[1], (3 * E,), dtype),
        "wo": s * jax.random.normal(ks[2], (E, E), dtype),
        "bo": s * jax.random.normal(ks[3], (E,), dtype),
    }


def prepare_layer_params(raw, embedding_dim, num_heads):
    """One-time transform (outside jit): fold 1/sqrt(Dh) into the Q columns,
    split the packed QKV weight, reshape biases lane-dense, pre-cast weights
    to bf16 so no per-forward convert/copy is needed."""
    E = embedding_dim
    Dh = E // num_heads
    scale = 1.0 / math.sqrt(Dh)
    wqkv, bqkv = raw["wqkv"], raw["bqkv"]
    return {
        "wq": (wqkv[:, :E] * scale).astype(jnp.bfloat16),
        "wk": wqkv[:, E:2 * E].astype(jnp.bfloat16),
        "wv": wqkv[:, 2 * E:].astype(jnp.bfloat16),
        "bq": (bqkv[:E] * scale).reshape(1, E).astype(jnp.float32),
        "bk": bqkv[E:2 * E].reshape(1, E).astype(jnp.float32),
        "bv": bqkv[2 * E:].reshape(1, E).astype(jnp.float32),
        "wo": raw["wo"].astype(jnp.bfloat16),
        "bo": raw["bo"].reshape(1, E).astype(jnp.float32),
    }


# ----------------------------------------------------------------------------
# Demo
# ----------------------------------------------------------------------------
if __name__ == "__main__":
    batch = 2
    seq_len = 8
    embedding_dim = 256     # from the module spec
    num_heads = 8           # from the module spec
    atten_layer_num = 2
    attn_mask = None        # module default

    root = jax.random.PRNGKey(0)
    k_q, k_k, k_v, k_p = jax.random.split(root, 4)

    query = jax.random.normal(k_q, (batch, seq_len, embedding_dim), jnp.float32)
    key_t = jax.random.normal(k_k, (batch, seq_len, embedding_dim), jnp.float32)
    value = jax.random.normal(k_v, (batch, seq_len, embedding_dim), jnp.float32)

    layer_keys = jax.random.split(k_p, atten_layer_num)
    layer_params = [
        prepare_layer_params(init_layer_params(lk, embedding_dim),
                             embedding_dim, num_heads)
        for lk in layer_keys
    ]

    fwd = jax.jit(functools.partial(model_forward, num_heads=num_heads))
    out = fwd(layer_params, query, key_t, value, attn_mask)
    out = jax.block_until_ready(out)

    assert out.shape == (batch, seq_len, embedding_dim)
    assert out.dtype == jnp.float32
    assert bool(jnp.all(jnp.isfinite(out)))
    print("KERNEL_OK")
</pallas_src>

<mosaic_0001>
module attributes {stable_mosaic.version = 11 : i64} {
  func.func @_layer_kernel(%arg0: i32, %arg1: memref<1x8x256xf32, #tpu.memory_space<vmem>>, %arg2: memref<1x8x256xf32, #tpu.memory_space<vmem>>, %arg3: memref<1x8x256xf32, #tpu.memory_space<vmem>>, %arg4: memref<256x256xbf16, #tpu.memory_space<vmem>>, %arg5: memref<256x256xbf16, #tpu.memory_space<vmem>>, %arg6: memref<256x256xbf16, #tpu.memory_space<vmem>>, %arg7: memref<1x256xf32, #tpu.memory_space<vmem>>, %arg8: memref<1x256xf32, #tpu.memory_space<vmem>>, %arg9: memref<1x256xf32, #tpu.memory_space<vmem>>, %arg10: memref<256x256xbf16, #tpu.memory_space<vmem>>, %arg11: memref<1x256xf32, #tpu.memory_space<vmem>>, %arg12: memref<1x8x256xbf16, #tpu.memory_space<vmem>>) attributes {dimension_semantics = [#tpu.dimension_semantics<parallel>], iteration_bounds = array<i64: 2>, scalar_prefetch = 0 : i64, scratch_operands = 0 : i64, tpu.core_type = #tpu.core_type<tc>, window_params = [{transform_indices = @transform_0, window_bounds = array<i64: 1, 8, 256>}, {transform_indices = @transform_1, window_bounds = array<i64: 1, 8, 256>}, {transform_indices = @transform_2, window_bounds = array<i64: 1, 8, 256>}, {pipeline_mode = #tpu.pipeline_mode<synchronous>, transform_indices = @transform_3, window_bounds = array<i64: 256, 256>}, {pipeline_mode = #tpu.pipeline_mode<synchronous>, transform_indices = @transform_4, window_bounds = array<i64: 256, 256>}, {pipeline_mode = #tpu.pipeline_mode<synchronous>, transform_indices = @transform_5, window_bounds = array<i64: 256, 256>}, {pipeline_mode = #tpu.pipeline_mode<synchronous>, transform_indices = @transform_6, window_bounds = array<i64: 1, 256>}, {pipeline_mode = #tpu.pipeline_mode<synchronous>, transform_indices = @transform_7, window_bounds = array<i64: 1, 256>}, {pipeline_mode = #tpu.pipeline_mode<synchronous>, transform_indices = @transform_8, window_bounds = array<i64: 1, 256>}, {pipeline_mode = #tpu.pipeline_mode<synchronous>, transform_indices = @transform_9, window_bounds = array<i64: 256, 256>}, {pipeline_mode = #tpu.pipeline_mode<synchronous>, transform_indices = @transform_10, window_bounds = array<i64: 1, 256>}, {transform_indices = @transform_11, window_bounds = array<i64: 1, 8, 256>}]} {
    %c0 = arith.constant 0 : index
    %c0_0 = arith.constant 0 : index
    %c0_1 = arith.constant 0 : index
    %0 = vector.load %arg1[%c0, %c0_0, %c0_1] : memref<1x8x256xf32, #tpu.memory_space<vmem>>, vector<1x8x256xf32>
    %1 = vector.shape_cast %0 : vector<1x8x256xf32> to vector<8x256xf32>
    %2 = arith.truncf %1 : vector<8x256xf32> to vector<8x256xbf16>
    %c0_2 = arith.constant 0 : index
    %c0_3 = arith.constant 0 : index
    %3 = vector.load %arg4[%c0_2, %c0_3] : memref<256x256xbf16, #tpu.memory_space<vmem>>, vector<256x256xbf16>
    %cst = arith.constant dense<0.000000e+00> : vector<8x256xf32>
    %4 = tpu.matmul %2, %3, %cst {dimension_numbers = #tpu.dot_dimension_numbers<[1], [0], [0], [1], [0, 0, 1, 1], [], []>} : vector<8x256xbf16>, vector<256x256xbf16>, vector<8x256xf32> -> vector<8x256xf32>
    %c0_4 = arith.constant 0 : index
    %c0_5 = arith.constant 0 : index
    %5 = vector.load %arg7[%c0_4, %c0_5] : memref<1x256xf32, #tpu.memory_space<vmem>>, vector<1x256xf32>
    %6 = vector.broadcast %5 : vector<1x256xf32> to vector<8x256xf32>
    %7 = arith.addf %4, %6 : vector<8x256xf32>
    %c0_6 = arith.constant 0 : index
    %c0_7 = arith.constant 0 : index
    %c0_8 = arith.constant 0 : index
    %8 = vector.load %arg2[%c0_6, %c0_7, %c0_8] : memref<1x8x256xf32, #tpu.memory_space<vmem>>, vector<1x8x256xf32>
    %9 = vector.shape_cast %8 : vector<1x8x256xf32> to vector<8x256xf32>
    %10 = arith.truncf %9 : vector<8x256xf32> to vector<8x256xbf16>
    %c0_9 = arith.constant 0 : index
    %c0_10 = arith.constant 0 : index
    %11 = vector.load %arg5[%c0_9, %c0_10] : memref<256x256xbf16, #tpu.memory_space<vmem>>, vector<256x256xbf16>
    %cst_11 = arith.constant dense<0.000000e+00> : vector<8x256xf32>
    %12 = tpu.matmul %10, %11, %cst_11 {dimension_numbers = #tpu.dot_dimension_numbers<[1], [0], [0], [1], [0, 0, 1, 1], [], []>} : vector<8x256xbf16>, vector<256x256xbf16>, vector<8x256xf32> -> vector<8x256xf32>
    %c0_12 = arith.constant 0 : index
    %c0_13 = arith.constant 0 : index
    %13 = vector.load %arg8[%c0_12, %c0_13] : memref<1x256xf32, #tpu.memory_space<vmem>>, vector<1x256xf32>
    %14 = vector.broadcast %13 : vector<1x256xf32> to vector<8x256xf32>
    %15 = arith.addf %12, %14 : vector<8x256xf32>
    %c0_14 = arith.constant 0 : index
    %c0_15 = arith.constant 0 : index
    %c0_16 = arith.constant 0 : index
    %16 = vector.load %arg3[%c0_14, %c0_15, %c0_16] : memref<1x8x256xf32, #tpu.memory_space<vmem>>, vector<1x8x256xf32>
    %17 = vector.shape_cast %16 : vector<1x8x256xf32> to vector<8x256xf32>
    %18 = arith.truncf %17 : vector<8x256xf32> to vector<8x256xbf16>
    %c0_17 = arith.constant 0 : index
    %c0_18 = arith.constant 0 : index
    %19 = vector.load %arg6[%c0_17, %c0_18] : memref<256x256xbf16, #tpu.memory_space<vmem>>, vector<256x256xbf16>
    %cst_19 = arith.constant dense<0.000000e+00> : vector<8x256xf32>
    %20 = tpu.matmul %18, %19, %cst_19 {dimension_numbers = #tpu.dot_dimension_numbers<[1], [0], [0], [1], [0, 0, 1, 1], [], []>} : vector<8x256xbf16>, vector<256x256xbf16>, vector<8x256xf32> -> vector<8x256xf32>
    %c0_20 = arith.constant 0 : index
    %c0_21 = arith.constant 0 : index
    %21 = vector.load %arg9[%c0_20, %c0_21] : memref<1x256xf32, #tpu.memory_space<vmem>>, vector<1x256xf32>
    %22 = vector.broadcast %21 : vector<1x256xf32> to vector<8x256xf32>
    %23 = arith.addf %20, %22 : vector<8x256xf32>
    %24 = vector.extract_strided_slice %7 {offsets = [0, 0], sizes = [8, 32], strides = [1, 1]} : vector<8x256xf32> to vector<8x32xf32>
    %25 = arith.truncf %24 : vector<8x32xf32> to vector<8x32xbf16>
    %26 = vector.extract_strided_slice %15 {offsets = [0, 0], sizes = [8, 32], strides = [1, 1]} : vector<8x256xf32> to vector<8x32xf32>
    %27 = arith.truncf %26 : vector<8x32xf32> to vector<8x32xbf16>
    %28 = vector.extract_strided_slice %23 {offsets = [0, 0], sizes = [8, 32], strides = [1, 1]} : vector<8x256xf32> to vector<8x32xf32>
    %29 = arith.truncf %28 : vector<8x32xf32> to vector<8x32xbf16>
    %cst_22 = arith.constant dense<0.000000e+00> : vector<8x8xf32>
    %30 = tpu.matmul %25, %27, %cst_22 {dimension_numbers = #tpu.dot_dimension_numbers<[1], [1], [0], [0], [0, 0, 1, 0], [], []>} : vector<8x32xbf16>, vector<8x32xbf16>, vector<8x8xf32> -> vector<8x8xf32>
    %cst_23 = arith.constant dense<0xFF800000> : vector<8xf32>
    %31 = vector.multi_reduction <maximumf>, %30, %cst_23 [1] : vector<8x8xf32> to vector<8xf32>
    %32 = vector.shape_cast %31 : vector<8xf32> to vector<8x1xf32>
    %33 = vector.broadcast %32 : vector<8x1xf32> to vector<8x8xf32>
    %34 = arith.subf %30, %33 : vector<8x8xf32>
    %35 = math.exp %34 : vector<8x8xf32>
    %cst_24 = arith.constant dense<0.000000e+00> : vector<8xf32>
    %36 = vector.multi_reduction <add>, %35, %cst_24 [1] : vector<8x8xf32> to vector<8xf32>
    %37 = vector.shape_cast %36 : vector<8xf32> to vector<8x1xf32>
    %38 = arith.truncf %35 : vector<8x8xf32> to vector<8x8xbf16>
    %cst_25 = arith.constant dense<0.000000e+00> : vector<8x32xf32>
    %39 = tpu.matmul %38, %29, %cst_25 {dimension_numbers = #tpu.dot_dimension_numbers<[1], [0], [0], [1], [0, 0, 1, 1], [], []>} : vector<8x8xbf16>, vector<8x32xbf16>, vector<8x32xf32> -> vector<8x32xf32>
    %40 = tpu.reciprocal %37 {approx = true} : vector<8x1xf32> -> vector<8x1xf32>
    %41 = vector.broadcast %40 : vector<8x1xf32> to vector<8x32xf32>
    %42 = arith.mulf %39, %41 : vector<8x32xf32>
    %43 = vector.extract_strided_slice %7 {offsets = [0, 32], sizes = [8, 32], strides = [1, 1]} : vector<8x256xf32> to vector<8x32xf32>
    %44 = arith.truncf %43 : vector<8x32xf32> to vector<8x32xbf16>
    %45 = vector.extract_strided_slice %15 {offsets = [0, 32], sizes = [8, 32], strides = [1, 1]} : vector<8x256xf32> to vector<8x32xf32>
    %46 = arith.truncf %45 : vector<8x32xf32> to vector<8x32xbf16>
    %47 = vector.extract_strided_slice %23 {offsets = [0, 32], sizes = [8, 32], strides = [1, 1]} : vector<8x256xf32> to vector<8x32xf32>
    %48 = arith.truncf %47 : vector<8x32xf32> to vector<8x32xbf16>
    %cst_26 = arith.constant dense<0.000000e+00> : vector<8x8xf32>
    %49 = tpu.matmul %44, %46, %cst_26 {dimension_numbers = #tpu.dot_dimension_numbers<[1], [1], [0], [0], [0, 0, 1, 0], [], []>} : vector<8x32xbf16>, vector<8x32xbf16>, vector<8x8xf32> -> vector<8x8xf32>
    %cst_27 = arith.constant dense<0xFF800000> : vector<8xf32>
    %50 = vector.multi_reduction <maximumf>, %49, %cst_27 [1] : vector<8x8xf32> to vector<8xf32>
    %51 = vector.shape_cast %50 : vector<8xf32> to vector<8x1xf32>
    %52 = vector.broadcast %51 : vector<8x1xf32> to vector<8x8xf32>
    %53 = arith.subf %49, %52 : vector<8x8xf32>
    %54 = math.exp %53 : vector<8x8xf32>
    %cst_28 = arith.constant dense<0.000000e+00> : vector<8xf32>
    %55 = vector.multi_reduction <add>, %54, %cst_28 [1] : vector<8x8xf32> to vector<8xf32>
    %56 = vector.shape_cast %55 : vector<8xf32> to vector<8x1xf32>
    %57 = arith.truncf %54 : vector<8x8xf32> to vector<8x8xbf16>
    %cst_29 = arith.constant dense<0.000000e+00> : vector<8x32xf32>
    %58 = tpu.matmul %57, %48, %cst_29 {dimension_numbers = #tpu.dot_dimension_numbers<[1], [0], [0], [1], [0, 0, 1, 1], [], []>} : vector<8x8xbf16>, vector<8x32xbf16>, vector<8x32xf32> -> vector<8x32xf32>
    %59 = tpu.reciprocal %56 {approx = true} : vector<8x1xf32> -> vector<8x1xf32>
    %60 = vector.broadcast %59 : vector<8x1xf32> to vector<8x32xf32>
    %61 = arith.mulf %58, %60 : vector<8x32xf32>
    %62 = vector.extract_strided_slice %7 {offsets = [0, 64], sizes = [8, 32], strides = [1, 1]} : vector<8x256xf32> to vector<8x32xf32>
    %63 = arith.truncf %62 : vector<8x32xf32> to vector<8x32xbf16>
    %64 = vector.extract_strided_slice %15 {offsets = [0, 64], sizes = [8, 32], strides = [1, 1]} : vector<8x256xf32> to vector<8x32xf32>
    %65 = arith.truncf %64 : vector<8x32xf32> to vector<8x32xbf16>
    %66 = vector.extract_strided_slice %23 {offsets = [0, 64], sizes = [8, 32], strides = [1, 1]} : vector<8x256xf32> to vector<8x32xf32>
    %67 = arith.truncf %66 : vector<8x32xf32> to vector<8x32xbf16>
    %cst_30 = arith.constant dense<0.000000e+00> : vector<8x8xf32>
    %68 = tpu.matmul %63, %65, %cst_30 {dimension_numbers = #tpu.dot_dimension_numbers<[1], [1], [0], [0], [0, 0, 1, 0], [], []>} : vector<8x32xbf16>, vector<8x32xbf16>, vector<8x8xf32> -> vector<8x8xf32>
    %cst_31 = arith.constant dense<0xFF800000> : vector<8xf32>
    %69 = vector.multi_reduction <maximumf>, %68, %cst_31 [1] : vector<8x8xf32> to vector<8xf32>
    %70 = vector.shape_cast %69 : vector<8xf32> to vector<8x1xf32>
    %71 = vector.broadcast %70 : vector<8x1xf32> to vector<8x8xf32>
    %72 = arith.subf %68, %71 : vector<8x8xf32>
    %73 = math.exp %72 : vector<8x8xf32>
    %cst_32 = arith.constant dense<0.000000e+00> : vector<8xf32>
    %74 = vector.multi_reduction <add>, %73, %cst_32 [1] : vector<8x8xf32> to vector<8xf32>
    %75 = vector.shape_cast %74 : vector<8xf32> to vector<8x1xf32>
    %76 = arith.truncf %73 : vector<8x8xf32> to vector<8x8xbf16>
    %cst_33 = arith.constant dense<0.000000e+00> : vector<8x32xf32>
    %77 = tpu.matmul %76, %67, %cst_33 {dimension_numbers = #tpu.dot_dimension_numbers<[1], [0], [0], [1], [0, 0, 1, 1], [], []>} : vector<8x8xbf16>, vector<8x32xbf16>, vector<8x32xf32> -> vector<8x32xf32>
    %78 = tpu.reciprocal %75 {approx = true} : vector<8x1xf32> -> vector<8x1xf32>
    %79 = vector.broadcast %78 : vector<8x1xf32> to vector<8x32xf32>
    %80 = arith.mulf %77, %79 : vector<8x32xf32>
    %81 = vector.extract_strided_slice %7 {offsets = [0, 96], sizes = [8, 32], strides = [1, 1]} : vector<8x256xf32> to vector<8x32xf32>
    %82 = arith.truncf %81 : vector<8x32xf32> to vector<8x32xbf16>
    %83 = vector.extract_strided_slice %15 {offsets = [0, 96], sizes = [8, 32], strides = [1, 1]} : vector<8x256xf32> to vector<8x32xf32>
    %84 = arith.truncf %83 : vector<8x32xf32> to vector<8x32xbf16>
    %85 = vector.extract_strided_slice %23 {offsets = [0, 96], sizes = [8, 32], strides = [1, 1]} : vector<8x256xf32> to vector<8x32xf32>
    %86 = arith.truncf %85 : vector<8x32xf32> to vector<8x32xbf16>
    %cst_34 = arith.constant dense<0.000000e+00> : vector<8x8xf32>
    %87 = tpu.matmul %82, %84, %cst_34 {dimension_numbers = #tpu.dot_dimension_numbers<[1], [1], [0], [0], [0, 0, 1, 0], [], []>} : vector<8x32xbf16>, vector<8x32xbf16>, vector<8x8xf32> -> vector<8x8xf32>
    %cst_35 = arith.constant dense<0xFF800000> : vector<8xf32>
    %88 = vector.multi_reduction <maximumf>, %87, %cst_35 [1] : vector<8x8xf32> to vector<8xf32>
    %89 = vector.shape_cast %88 : vector<8xf32> to vector<8x1xf32>
    %90 = vector.broadcast %89 : vector<8x1xf32> to vector<8x8xf32>
    %91 = arith.subf %87, %90 : vector<8x8xf32>
    %92 = math.exp %91 : vector<8x8xf32>
    %cst_36 = arith.constant dense<0.000000e+00> : vector<8xf32>
    %93 = vector.multi_reduction <add>, %92, %cst_36 [1] : vector<8x8xf32> to vector<8xf32>
    %94 = vector.shape_cast %93 : vector<8xf32> to vector<8x1xf32>
    %95 = arith.truncf %92 : vector<8x8xf32> to vector<8x8xbf16>
    %cst_37 = arith.constant dense<0.000000e+00> : vector<8x32xf32>
    %96 = tpu.matmul %95, %86, %cst_37 {dimension_numbers = #tpu.dot_dimension_numbers<[1], [0], [0], [1], [0, 0, 1, 1], [], []>} : vector<8x8xbf16>, vector<8x32xbf16>, vector<8x32xf32> -> vector<8x32xf32>
    %97 = tpu.reciprocal %94 {approx = true} : vector<8x1xf32> -> vector<8x1xf32>
    %98 = vector.broadcast %97 : vector<8x1xf32> to vector<8x32xf32>
    %99 = arith.mulf %96, %98 : vector<8x32xf32>
    %100 = vector.extract_strided_slice %7 {offsets = [0, 128], sizes = [8, 32], strides = [1, 1]} : vector<8x256xf32> to vector<8x32xf32>
    %101 = arith.truncf %100 : vector<8x32xf32> to vector<8x32xbf16>
    %102 = vector.extract_strided_slice %15 {offsets = [0, 128], sizes = [8, 32], strides = [1, 1]} : vector<8x256xf32> to vector<8x32xf32>
    %103 = arith.truncf %102 : vector<8x32xf32> to vector<8x32xbf16>
    %104 = vector.extract_strided_slice %23 {offsets = [0, 128], sizes = [8, 32], strides = [1, 1]} : vector<8x256xf32> to vector<8x32xf32>
    %105 = arith.truncf %104 : vector<8x32xf32> to vector<8x32xbf16>
    %cst_38 = arith.constant dense<0.000000e+00> : vector<8x8xf32>
    %106 = tpu.matmul %101, %103, %cst_38 {dimension_numbers = #tpu.dot_dimension_numbers<[1], [1], [0], [0], [0, 0, 1, 0], [], []>} : vector<8x32xbf16>, vector<8x32xbf16>, vector<8x8xf32> -> vector<8x8xf32>
    %cst_39 = arith.constant dense<0xFF800000> : vector<8xf32>
    %107 = vector.multi_reduction <maximumf>, %106, %cst_39 [1] : vector<8x8xf32> to vector<8xf32>
    %108 = vector.shape_cast %107 : vector<8xf32> to vector<8x1xf32>
    %109 = vector.broadcast %108 : vector<8x1xf32> to vector<8x8xf32>
    %110 = arith.subf %106, %109 : vector<8x8xf32>
    %111 = math.exp %110 : vector<8x8xf32>
    %cst_40 = arith.constant dense<0.000000e+00> : vector<8xf32>
    %112 = vector.multi_reduction <add>, %111, %cst_40 [1] : vector<8x8xf32> to vector<8xf32>
    %113 = vector.shape_cast %112 : vector<8xf32> to vector<8x1xf32>
    %114 = arith.truncf %111 : vector<8x8xf32> to vector<8x8xbf16>
    %cst_41 = arith.constant dense<0.000000e+00> : vector<8x32xf32>
    %115 = tpu.matmul %114, %105, %cst_41 {dimension_numbers = #tpu.dot_dimension_numbers<[1], [0], [0], [1], [0, 0, 1, 1], [], []>} : vector<8x8xbf16>, vector<8x32xbf16>, vector<8x32xf32> -> vector<8x32xf32>
    %116 = tpu.reciprocal %113 {approx = true} : vector<8x1xf32> -> vector<8x1xf32>
    %117 = vector.broadcast %116 : vector<8x1xf32> to vector<8x32xf32>
    %118 = arith.mulf %115, %117 : vector<8x32xf32>
    %119 = vector.extract_strided_slice %7 {offsets = [0, 160], sizes = [8, 32], strides = [1, 1]} : vector<8x256xf32> to vector<8x32xf32>
    %120 = arith.truncf %119 : vector<8x32xf32> to vector<8x32xbf16>
    %121 = vector.extract_strided_slice %15 {offsets = [0, 160], sizes = [8, 32], strides = [1, 1]} : vector<8x256xf32> to vector<8x32xf32>
    %122 = arith.truncf %121 : vector<8x32xf32> to vector<8x32xbf16>
    %123 = vector.extract_strided_slice %23 {offsets = [0, 160], sizes = [8, 32], strides = [1, 1]} : vector<8x256xf32> to vector<8x32xf32>
    %124 = arith.truncf %123 : vector<8x32xf32> to vector<8x32xbf16>
    %cst_42 = arith.constant dense<0.000000e+00> : vector<8x8xf32>
    %125 = tpu.matmul %120, %122, %cst_42 {dimension_numbers = #tpu.dot_dimension_numbers<[1], [1], [0], [0], [0, 0, 1, 0], [], []>} : vector<8x32xbf16>, vector<8x32xbf16>, vector<8x8xf32> -> vector<8x8xf32>
    %cst_43 = arith.constant dense<0xFF800000> : vector<8xf32>
    %126 = vector.multi_reduction <maximumf>, %125, %cst_43 [1] : vector<8x8xf32> to vector<8xf32>
    %127 = vector.shape_cast %126 : vector<8xf32> to vector<8x1xf32>
    %128 = vector.broadcast %127 : vector<8x1xf32> to vector<8x8xf32>
    %129 = arith.subf %125, %128 : vector<8x8xf32>
    %130 = math.exp %129 : vector<8x8xf32>
    %cst_44 = arith.constant dense<0.000000e+00> : vector<8xf32>
    %131 = vector.multi_reduction <add>, %130, %cst_44 [1] : vector<8x8xf32> to vector<8xf32>
    %132 = vector.shape_cast %131 : vector<8xf32> to vector<8x1xf32>
    %133 = arith.truncf %130 : vector<8x8xf32> to vector<8x8xbf16>
    %cst_45 = arith.constant dense<0.000000e+00> : vector<8x32xf32>
    %134 = tpu.matmul %133, %124, %cst_45 {dimension_numbers = #tpu.dot_dimension_numbers<[1], [0], [0], [1], [0, 0, 1, 1], [], []>} : vector<8x8xbf16>, vector<8x32xbf16>, vector<8x32xf32> -> vector<8x32xf32>
    %135 = tpu.reciprocal %132 {approx = true} : vector<8x1xf32> -> vector<8x1xf32>
    %136 = vector.broadcast %135 : vector<8x1xf32> to vector<8x32xf32>
    %137 = arith.mulf %134, %136 : vector<8x32xf32>
    %138 = vector.extract_strided_slice %7 {offsets = [0, 192], sizes = [8, 32], strides = [1, 1]} : vector<8x256xf32> to vector<8x32xf32>
    %139 = arith.truncf %138 : vector<8x32xf32> to vector<8x32xbf16>
    %140 = vector.extract_strided_slice %15 {offsets = [0, 192], sizes = [8, 32], strides = [1, 1]} : vector<8x256xf32> to vector<8x32xf32>
    %141 = arith.truncf %140 : vector<8x32xf32> to vector<8x32xbf16>
    %142 = vector.extract_strided_slice %23 {offsets = [0, 192], sizes = [8, 32], strides = [1, 1]} : vector<8x256xf32> to vector<8x32xf32>
    %143 = arith.truncf %142 : vector<8x32xf32> to vector<8x32xbf16>
    %cst_46 = arith.constant dense<0.000000e+00> : vector<8x8xf32>
    %144 = tpu.matmul %139, %141, %cst_46 {dimension_numbers = #tpu.dot_dimension_numbers<[1], [1], [0], [0], [0, 0, 1, 0], [], []>} : vector<8x32xbf16>, vector<8x32xbf16>, vector<8x8xf32> -> vector<8x8xf32>
    %cst_47 = arith.constant dense<0xFF800000> : vector<8xf32>
    %145 = vector.multi_reduction <maximumf>, %144, %cst_47 [1] : vector<8x8xf32> to vector<8xf32>
    %146 = vector.shape_cast %145 : vector<8xf32> to vector<8x1xf32>
    %147 = vector.broadcast %146 : vector<8x1xf32> to vector<8x8xf32>
    %148 = arith.subf %144, %147 : vector<8x8xf32>
    %149 = math.exp %148 : vector<8x8xf32>
    %cst_48 = arith.constant dense<0.000000e+00> : vector<8xf32>
    %150 = vector.multi_reduction <add>, %149, %cst_48 [1] : vector<8x8xf32> to vector<8xf32>
    %151 = vector.shape_cast %150 : vector<8xf32> to vector<8x1xf32>
    %152 = arith.truncf %149 : vector<8x8xf32> to vector<8x8xbf16>
    %cst_49 = arith.constant dense<0.000000e+00> : vector<8x32xf32>
    %153 = tpu.matmul %152, %143, %cst_49 {dimension_numbers = #tpu.dot_dimension_numbers<[1], [0], [0], [1], [0, 0, 1, 1], [], []>} : vector<8x8xbf16>, vector<8x32xbf16>, vector<8x32xf32> -> vector<8x32xf32>
    %154 = tpu.reciprocal %151 {approx = true} : vector<8x1xf32> -> vector<8x1xf32>
    %155 = vector.broadcast %154 : vector<8x1xf32> to vector<8x32xf32>
    %156 = arith.mulf %153, %155 : vector<8x32xf32>
    %157 = vector.extract_strided_slice %7 {offsets = [0, 224], sizes = [8, 32], strides = [1, 1]} : vector<8x256xf32> to vector<8x32xf32>
    %158 = arith.truncf %157 : vector<8x32xf32> to vector<8x32xbf16>
    %159 = vector.extract_strided_slice %15 {offsets = [0, 224], sizes = [8, 32], strides = [1, 1]} : vector<8x256xf32> to vector<8x32xf32>
    %160 = arith.truncf %159 : vector<8x32xf32> to vector<8x32xbf16>
    %161 = vector.extract_strided_slice %23 {offsets = [0, 224], sizes = [8, 32], strides = [1, 1]} : vector<8x256xf32> to vector<8x32xf32>
    %162 = arith.truncf %161 : vector<8x32xf32> to vector<8x32xbf16>
    %cst_50 = arith.constant dense<0.000000e+00> : vector<8x8xf32>
    %163 = tpu.matmul %158, %160, %cst_50 {dimension_numbers = #tpu.dot_dimension_numbers<[1], [1], [0], [0], [0, 0, 1, 0], [], []>} : vector<8x32xbf16>, vector<8x32xbf16>, vector<8x8xf32> -> vector<8x8xf32>
    %cst_51 = arith.constant dense<0xFF800000> : vector<8xf32>
    %164 = vector.multi_reduction <maximumf>, %163, %cst_51 [1] : vector<8x8xf32> to vector<8xf32>
    %165 = vector.shape_cast %164 : vector<8xf32> to vector<8x1xf32>
    %166 = vector.broadcast %165 : vector<8x1xf32> to vector<8x8xf32>
    %167 = arith.subf %163, %166 : vector<8x8xf32>
    %168 = math.exp %167 : vector<8x8xf32>
    %cst_52 = arith.constant dense<0.000000e+00> : vector<8xf32>
    %169 = vector.multi_reduction <add>, %168, %cst_52 [1] : vector<8x8xf32> to vector<8xf32>
    %170 = vector.shape_cast %169 : vector<8xf32> to vector<8x1xf32>
    %171 = arith.truncf %168 : vector<8x8xf32> to vector<8x8xbf16>
    %cst_53 = arith.constant dense<0.000000e+00> : vector<8x32xf32>
    %172 = tpu.matmul %171, %162, %cst_53 {dimension_numbers = #tpu.dot_dimension_numbers<[1], [0], [0], [1], [0, 0, 1, 1], [], []>} : vector<8x8xbf16>, vector<8x32xbf16>, vector<8x32xf32> -> vector<8x32xf32>
    %173 = tpu.reciprocal %170 {approx = true} : vector<8x1xf32> -> vector<8x1xf32>
    %174 = vector.broadcast %173 : vector<8x1xf32> to vector<8x32xf32>
    %175 = arith.mulf %172, %174 : vector<8x32xf32>
    %176 = tpu.concatenate %42, %61, %80, %99, %118, %137, %156, %175 in 1 : vector<8x32xf32>, vector<8x32xf32>, vector<8x32xf32>, vector<8x32xf32>, vector<8x32xf32>, vector<8x32xf32>, vector<8x32xf32>, vector<8x32xf32> -> vector<8x256xf32>
    %177 = arith.truncf %176 : vector<8x256xf32> to vector<8x256xbf16>
    %c0_54 = arith.constant 0 : index
    %c0_55 = arith.constant 0 : index
    %178 = vector.load %arg10[%c0_54, %c0_55] : memref<256x256xbf16, #tpu.memory_space<vmem>>, vector<256x256xbf16>
    %cst_56 = arith.constant dense<0.000000e+00> : vector<8x256xf32>
    %179 = tpu.matmul %177, %178, %cst_56 {dimension_numbers = #tpu.dot_dimension_numbers<[1], [0], [0], [1], [0, 0, 1, 1], [], []>} : vector<8x256xbf16>, vector<256x256xbf16>, vector<8x256xf32> -> vector<8x256xf32>
    %c0_57 = arith.constant 0 : index
    %c0_58 = arith.constant 0 : index
    %180 = vector.load %arg11[%c0_57, %c0_58] : memref<1x256xf32, #tpu.memory_space<vmem>>, vector<1x256xf32>
    %181 = vector.broadcast %180 : vector<1x256xf32> to vector<8x256xf32>
    %182 = arith.addf %179, %181 : vector<8x256xf32>
    %183 = arith.truncf %182 : vector<8x256xf32> to vector<8x256xbf16>
    %c0_59 = arith.constant 0 : index
    %c0_60 = arith.constant 0 : index
    %c0_61 = arith.constant 0 : index
    %184 = vector.load %arg12[%c0_59, %c0_60, %c0_61] : memref<1x8x256xbf16, #tpu.memory_space<vmem>>, vector<1x8x256xbf16>
    %185 = vector.shape_cast %184 : vector<1x8x256xbf16> to vector<8x256xbf16>
    %186 = vector.shape_cast %183 : vector<8x256xbf16> to vector<1x8x256xbf16>
    tpu.vector_store %arg12[%c0_59, %c0_60, %c0_61], %186 {strides = array<i32>} : memref<1x8x256xbf16, #tpu.memory_space<vmem>>, vector<1x8x256xbf16>,
    return
  }
  func.func @transform_0(%arg0: i32) -> (i32, i32, i32) {
    %c0_i32 = arith.constant 0 : i32
    %c0_i32_0 = arith.constant 0 : i32
    %c0_i32_1 = arith.constant 0 : i32
    return %arg0, %c0_i32, %c0_i32_0 : i32, i32, i32
  }
  func.func @transform_1(%arg0: i32) -> (i32, i32, i32) {
    %c0_i32 = arith.constant 0 : i32
    %c0_i32_0 = arith.constant 0 : i32
    %c0_i32_1 = arith.constant 0 : i32
    return %arg0, %c0_i32, %c0_i32_0 : i32, i32, i32
  }
  func.func @transform_2(%arg0: i32) -> (i32, i32, i32) {
    %c0_i32 = arith.constant 0 : i32
    %c0_i32_0 = arith.constant 0 : i32
    %c0_i32_1 = arith.constant 0 : i32
    return %arg0, %c0_i32, %c0_i32_0 : i32, i32, i32
  }
  func.func @transform_3(%arg0: i32) -> (i32, i32) {
    %c0_i32 = arith.constant 0 : i32
    %c0_i32_0 = arith.constant 0 : i32
    %c0_i32_1 = arith.constant 0 : i32
    return %c0_i32, %c0_i32_0 : i32, i32
  }
  func.func @transform_4(%arg0: i32) -> (i32, i32) {
    %c0_i32 = arith.constant 0 : i32
    %c0_i32_0 = arith.constant 0 : i32
    %c0_i32_1 = arith.constant 0 : i32
    return %c0_i32, %c0_i32_0 : i32, i32
  }
  func.func @transform_5(%arg0: i32) -> (i32, i32) {
    %c0_i32 = arith.constant 0 : i32
    %c0_i32_0 = arith.constant 0 : i32
    %c0_i32_1 = arith.constant 0 : i32
    return %c0_i32, %c0_i32_0 : i32, i32
  }
  func.func @transform_6(%arg0: i32) -> (i32, i32) {
    %c0_i32 = arith.constant 0 : i32
    %c0_i32_0 = arith.constant 0 : i32
    %c0_i32_1 = arith.constant 0 : i32
    return %c0_i32, %c0_i32_0 : i32, i32
  }
  func.func @transform_7(%arg0: i32) -> (i32, i32) {
    %c0_i32 = arith.constant 0 : i32
    %c0_i32_0 = arith.constant 0 : i32
    %c0_i32_1 = arith.constant 0 : i32
    return %c0_i32, %c0_i32_0 : i32, i32
  }
  func.func @transform_8(%arg0: i32) -> (i32, i32) {
    %c0_i32 = arith.constant 0 : i32
    %c0_i32_0 = arith.constant 0 : i32
    %c0_i32_1 = arith.constant 0 : i32
    return %c0_i32, %c0_i32_0 : i32, i32
  }
  func.func @transform_9(%arg0: i32) -> (i32, i32) {
    %c0_i32 = arith.constant 0 : i32
    %c0_i32_0 = arith.constant 0 : i32
    %c0_i32_1 = arith.constant 0 : i32
    return %c0_i32, %c0_i32_0 : i32, i32
  }
  func.func @transform_10(%arg0: i32) -> (i32, i32) {
    %c0_i32 = arith.constant 0 : i32
    %c0_i32_0 = arith.constant 0 : i32
    %c0_i32_1 = arith.constant 0 : i32
    return %c0_i32, %c0_i32_0 : i32, i32
  }
  func.func @transform_11(%arg0: i32) -> (i32, i32, i32) {
    %c0_i32 = arith.constant 0 : i32
    %c0_i32_0 = arith.constant 0 : i32
    %c0_i32_1 = arith.constant 0 : i32
    return %arg0, %c0_i32, %c0_i32_0 : i32, i32, i32
  }
}

module attributes {stable_mosaic.version = 11 : i64} {
  func.func @_layer_kernel(%arg0: i32, %arg1: memref<1x8x256xbf16, #tpu.memory_space<vmem>>, %arg2: memref<1x8x256xbf16, #tpu.memory_space<vmem>>, %arg3: memref<1x8x256xbf16, #tpu.memory_space<vmem>>, %arg4: memref<256x256xbf16, #tpu.memory_space<vmem>>, %arg5: memref<256x256xbf16, #tpu.memory_space<vmem>>, %arg6: memref<256x256xbf16, #tpu.memory_space<vmem>>, %arg7: memref<1x256xf32, #tpu.memory_space<vmem>>, %arg8: memref<1x256xf32, #tpu.memory_space<vmem>>, %arg9: memref<1x256xf32, #tpu.memory_space<vmem>>, %arg10: memref<256x256xbf16, #tpu.memory_space<vmem>>, %arg11: memref<1x256xf32, #tpu.memory_space<vmem>>, %arg12: memref<1x8x256xf32, #tpu.memory_space<vmem>>) attributes {dimension_semantics = [#tpu.dimension_semantics<parallel>], iteration_bounds = array<i64: 2>, scalar_prefetch = 0 : i64, scratch_operands = 0 : i64, tpu.core_type = #tpu.core_type<tc>, window_params = [{transform_indices = @transform_0, window_bounds = array<i64: 1, 8, 256>}, {transform_indices = @transform_1, window_bounds = array<i64: 1, 8, 256>}, {transform_indices = @transform_2, window_bounds = array<i64: 1, 8, 256>}, {pipeline_mode = #tpu.pipeline_mode<synchronous>, transform_indices = @transform_3, window_bounds = array<i64: 256, 256>}, {pipeline_mode = #tpu.pipeline_mode<synchronous>, transform_indices = @transform_4, window_bounds = array<i64: 256, 256>}, {pipeline_mode = #tpu.pipeline_mode<synchronous>, transform_indices = @transform_5, window_bounds = array<i64: 256, 256>}, {pipeline_mode = #tpu.pipeline_mode<synchronous>, transform_indices = @transform_6, window_bounds = array<i64: 1, 256>}, {pipeline_mode = #tpu.pipeline_mode<synchronous>, transform_indices = @transform_7, window_bounds = array<i64: 1, 256>}, {pipeline_mode = #tpu.pipeline_mode<synchronous>, transform_indices = @transform_8, window_bounds = array<i64: 1, 256>}, {pipeline_mode = #tpu.pipeline_mode<synchronous>, transform_indices = @transform_9, window_bounds = array<i64: 256, 256>}, {pipeline_mode = #tpu.pipeline_mode<synchronous>, transform_indices = @transform_10, window_bounds = array<i64: 1, 256>}, {transform_indices = @transform_11, window_bounds = array<i64: 1, 8, 256>}]} {
    %c0 = arith.constant 0 : index
    %c0_0 = arith.constant 0 : index
    %c0_1 = arith.constant 0 : index
    %0 = vector.load %arg1[%c0, %c0_0, %c0_1] : memref<1x8x256xbf16, #tpu.memory_space<vmem>>, vector<1x8x256xbf16>
    %1 = vector.shape_cast %0 : vector<1x8x256xbf16> to vector<8x256xbf16>
    %c0_2 = arith.constant 0 : index
    %c0_3 = arith.constant 0 : index
    %2 = vector.load %arg4[%c0_2, %c0_3] : memref<256x256xbf16, #tpu.memory_space<vmem>>, vector<256x256xbf16>
    %cst = arith.constant dense<0.000000e+00> : vector<8x256xf32>
    %3 = tpu.matmul %1, %2, %cst {dimension_numbers = #tpu.dot_dimension_numbers<[1], [0], [0], [1], [0, 0, 1, 1], [], []>} : vector<8x256xbf16>, vector<256x256xbf16>, vector<8x256xf32> -> vector<8x256xf32>
    %c0_4 = arith.constant 0 : index
    %c0_5 = arith.constant 0 : index
    %4 = vector.load %arg7[%c0_4, %c0_5] : memref<1x256xf32, #tpu.memory_space<vmem>>, vector<1x256xf32>
    %5 = vector.broadcast %4 : vector<1x256xf32> to vector<8x256xf32>
    %6 = arith.addf %3, %5 : vector<8x256xf32>
    %c0_6 = arith.constant 0 : index
    %c0_7 = arith.constant 0 : index
    %c0_8 = arith.constant 0 : index
    %7 = vector.load %arg2[%c0_6, %c0_7, %c0_8] : memref<1x8x256xbf16, #tpu.memory_space<vmem>>, vector<1x8x256xbf16>
    %8 = vector.shape_cast %7 : vector<1x8x256xbf16> to vector<8x256xbf16>
    %c0_9 = arith.constant 0 : index
    %c0_10 = arith.constant 0 : index
    %9 = vector.load %arg5[%c0_9, %c0_10] : memref<256x256xbf16, #tpu.memory_space<vmem>>, vector<256x256xbf16>
    %cst_11 = arith.constant dense<0.000000e+00> : vector<8x256xf32>
    %10 = tpu.matmul %8, %9, %cst_11 {dimension_numbers = #tpu.dot_dimension_numbers<[1], [0], [0], [1], [0, 0, 1, 1], [], []>} : vector<8x256xbf16>, vector<256x256xbf16>, vector<8x256xf32> -> vector<8x256xf32>
    %c0_12 = arith.constant 0 : index
    %c0_13 = arith.constant 0 : index
    %11 = vector.load %arg8[%c0_12, %c0_13] : memref<1x256xf32, #tpu.memory_space<vmem>>, vector<1x256xf32>
    %12 = vector.broadcast %11 : vector<1x256xf32> to vector<8x256xf32>
    %13 = arith.addf %10, %12 : vector<8x256xf32>
    %c0_14 = arith.constant 0 : index
    %c0_15 = arith.constant 0 : index
    %c0_16 = arith.constant 0 : index
    %14 = vector.load %arg3[%c0_14, %c0_15, %c0_16] : memref<1x8x256xbf16, #tpu.memory_space<vmem>>, vector<1x8x256xbf16>
    %15 = vector.shape_cast %14 : vector<1x8x256xbf16> to vector<8x256xbf16>
    %c0_17 = arith.constant 0 : index
    %c0_18 = arith.constant 0 : index
    %16 = vector.load %arg6[%c0_17, %c0_18] : memref<256x256xbf16, #tpu.memory_space<vmem>>, vector<256x256xbf16>
    %cst_19 = arith.constant dense<0.000000e+00> : vector<8x256xf32>
    %17 = tpu.matmul %15, %16, %cst_19 {dimension_numbers = #tpu.dot_dimension_numbers<[1], [0], [0], [1], [0, 0, 1, 1], [], []>} : vector<8x256xbf16>, vector<256x256xbf16>, vector<8x256xf32> -> vector<8x256xf32>
    %c0_20 = arith.constant 0 : index
    %c0_21 = arith.constant 0 : index
    %18 = vector.load %arg9[%c0_20, %c0_21] : memref<1x256xf32, #tpu.memory_space<vmem>>, vector<1x256xf32>
    %19 = vector.broadcast %18 : vector<1x256xf32> to vector<8x256xf32>
    %20 = arith.addf %17, %19 : vector<8x256xf32>
    %21 = vector.extract_strided_slice %6 {offsets = [0, 0], sizes = [8, 32], strides = [1, 1]} : vector<8x256xf32> to vector<8x32xf32>
    %22 = arith.truncf %21 : vector<8x32xf32> to vector<8x32xbf16>
    %23 = vector.extract_strided_slice %13 {offsets = [0, 0], sizes = [8, 32], strides = [1, 1]} : vector<8x256xf32> to vector<8x32xf32>
    %24 = arith.truncf %23 : vector<8x32xf32> to vector<8x32xbf16>
    %25 = vector.extract_strided_slice %20 {offsets = [0, 0], sizes = [8, 32], strides = [1, 1]} : vector<8x256xf32> to vector<8x32xf32>
    %26 = arith.truncf %25 : vector<8x32xf32> to vector<8x32xbf16>
    %cst_22 = arith.constant dense<0.000000e+00> : vector<8x8xf32>
    %27 = tpu.matmul %22, %24, %cst_22 {dimension_numbers = #tpu.dot_dimension_numbers<[1], [1], [0], [0], [0, 0, 1, 0], [], []>} : vector<8x32xbf16>, vector<8x32xbf16>, vector<8x8xf32> -> vector<8x8xf32>
    %cst_23 = arith.constant dense<0xFF800000> : vector<8xf32>
    %28 = vector.multi_reduction <maximumf>, %27, %cst_23 [1] : vector<8x8xf32> to vector<8xf32>
    %29 = vector.shape_cast %28 : vector<8xf32> to vector<8x1xf32>
    %30 = vector.broadcast %29 : vector<8x1xf32> to vector<8x8xf32>
    %31 = arith.subf %27, %30 : vector<8x8xf32>
    %32 = math.exp %31 : vector<8x8xf32>
    %cst_24 = arith.constant dense<0.000000e+00> : vector<8xf32>
    %33 = vector.multi_reduction <add>, %32, %cst_24 [1] : vector<8x8xf32> to vector<8xf32>
    %34 = vector.shape_cast %33 : vector<8xf32> to vector<8x1xf32>
    %35 = arith.truncf %32 : vector<8x8xf32> to vector<8x8xbf16>
    %cst_25 = arith.constant dense<0.000000e+00> : vector<8x32xf32>
    %36 = tpu.matmul %35, %26, %cst_25 {dimension_numbers = #tpu.dot_dimension_numbers<[1], [0], [0], [1], [0, 0, 1, 1], [], []>} : vector<8x8xbf16>, vector<8x32xbf16>, vector<8x32xf32> -> vector<8x32xf32>
    %37 = tpu.reciprocal %34 {approx = true} : vector<8x1xf32> -> vector<8x1xf32>
    %38 = vector.broadcast %37 : vector<8x1xf32> to vector<8x32xf32>
    %39 = arith.mulf %36, %38 : vector<8x32xf32>
    %40 = vector.extract_strided_slice %6 {offsets = [0, 32], sizes = [8, 32], strides = [1, 1]} : vector<8x256xf32> to vector<8x32xf32>
    %41 = arith.truncf %40 : vector<8x32xf32> to vector<8x32xbf16>
    %42 = vector.extract_strided_slice %13 {offsets = [0, 32], sizes = [8, 32], strides = [1, 1]} : vector<8x256xf32> to vector<8x32xf32>
    %43 = arith.truncf %42 : vector<8x32xf32> to vector<8x32xbf16>
    %44 = vector.extract_strided_slice %20 {offsets = [0, 32], sizes = [8, 32], strides = [1, 1]} : vector<8x256xf32> to vector<8x32xf32>
    %45 = arith.truncf %44 : vector<8x32xf32> to vector<8x32xbf16>
    %cst_26 = arith.constant dense<0.000000e+00> : vector<8x8xf32>
    %46 = tpu.matmul %41, %43, %cst_26 {dimension_numbers = #tpu.dot_dimension_numbers<[1], [1], [0], [0], [0, 0, 1, 0], [], []>} : vector<8x32xbf16>, vector<8x32xbf16>, vector<8x8xf32> -> vector<8x8xf32>
    %cst_27 = arith.constant dense<0xFF800000> : vector<8xf32>
    %47 = vector.multi_reduction <maximumf>, %46, %cst_27 [1] : vector<8x8xf32> to vector<8xf32>
    %48 = vector.shape_cast %47 : vector<8xf32> to vector<8x1xf32>
    %49 = vector.broadcast %48 : vector<8x1xf32> to vector<8x8xf32>
    %50 = arith.subf %46, %49 : vector<8x8xf32>
    %51 = math.exp %50 : vector<8x8xf32>
    %cst_28 = arith.constant dense<0.000000e+00> : vector<8xf32>
    %52 = vector.multi_reduction <add>, %51, %cst_28 [1] : vector<8x8xf32> to vector<8xf32>
    %53 = vector.shape_cast %52 : vector<8xf32> to vector<8x1xf32>
    %54 = arith.truncf %51 : vector<8x8xf32> to vector<8x8xbf16>
    %cst_29 = arith.constant dense<0.000000e+00> : vector<8x32xf32>
    %55 = tpu.matmul %54, %45, %cst_29 {dimension_numbers = #tpu.dot_dimension_numbers<[1], [0], [0], [1], [0, 0, 1, 1], [], []>} : vector<8x8xbf16>, vector<8x32xbf16>, vector<8x32xf32> -> vector<8x32xf32>
    %56 = tpu.reciprocal %53 {approx = true} : vector<8x1xf32> -> vector<8x1xf32>
    %57 = vector.broadcast %56 : vector<8x1xf32> to vector<8x32xf32>
    %58 = arith.mulf %55, %57 : vector<8x32xf32>
    %59 = vector.extract_strided_slice %6 {offsets = [0, 64], sizes = [8, 32], strides = [1, 1]} : vector<8x256xf32> to vector<8x32xf32>
    %60 = arith.truncf %59 : vector<8x32xf32> to vector<8x32xbf16>
    %61 = vector.extract_strided_slice %13 {offsets = [0, 64], sizes = [8, 32], strides = [1, 1]} : vector<8x256xf32> to vector<8x32xf32>
    %62 = arith.truncf %61 : vector<8x32xf32> to vector<8x32xbf16>
    %63 = vector.extract_strided_slice %20 {offsets = [0, 64], sizes = [8, 32], strides = [1, 1]} : vector<8x256xf32> to vector<8x32xf32>
    %64 = arith.truncf %63 : vector<8x32xf32> to vector<8x32xbf16>
    %cst_30 = arith.constant dense<0.000000e+00> : vector<8x8xf32>
    %65 = tpu.matmul %60, %62, %cst_30 {dimension_numbers = #tpu.dot_dimension_numbers<[1], [1], [0], [0], [0, 0, 1, 0], [], []>} : vector<8x32xbf16>, vector<8x32xbf16>, vector<8x8xf32> -> vector<8x8xf32>
    %cst_31 = arith.constant dense<0xFF800000> : vector<8xf32>
    %66 = vector.multi_reduction <maximumf>, %65, %cst_31 [1] : vector<8x8xf32> to vector<8xf32>
    %67 = vector.shape_cast %66 : vector<8xf32> to vector<8x1xf32>
    %68 = vector.broadcast %67 : vector<8x1xf32> to vector<8x8xf32>
    %69 = arith.subf %65, %68 : vector<8x8xf32>
    %70 = math.exp %69 : vector<8x8xf32>
    %cst_32 = arith.constant dense<0.000000e+00> : vector<8xf32>
    %71 = vector.multi_reduction <add>, %70, %cst_32 [1] : vector<8x8xf32> to vector<8xf32>
    %72 = vector.shape_cast %71 : vector<8xf32> to vector<8x1xf32>
    %73 = arith.truncf %70 : vector<8x8xf32> to vector<8x8xbf16>
    %cst_33 = arith.constant dense<0.000000e+00> : vector<8x32xf32>
    %74 = tpu.matmul %73, %64, %cst_33 {dimension_numbers = #tpu.dot_dimension_numbers<[1], [0], [0], [1], [0, 0, 1, 1], [], []>} : vector<8x8xbf16>, vector<8x32xbf16>, vector<8x32xf32> -> vector<8x32xf32>
    %75 = tpu.reciprocal %72 {approx = true} : vector<8x1xf32> -> vector<8x1xf32>
    %76 = vector.broadcast %75 : vector<8x1xf32> to vector<8x32xf32>
    %77 = arith.mulf %74, %76 : vector<8x32xf32>
    %78 = vector.extract_strided_slice %6 {offsets = [0, 96], sizes = [8, 32], strides = [1, 1]} : vector<8x256xf32> to vector<8x32xf32>
    %79 = arith.truncf %78 : vector<8x32xf32> to vector<8x32xbf16>
    %80 = vector.extract_strided_slice %13 {offsets = [0, 96], sizes = [8, 32], strides = [1, 1]} : vector<8x256xf32> to vector<8x32xf32>
    %81 = arith.truncf %80 : vector<8x32xf32> to vector<8x32xbf16>
    %82 = vector.extract_strided_slice %20 {offsets = [0, 96], sizes = [8, 32], strides = [1, 1]} : vector<8x256xf32> to vector<8x32xf32>
    %83 = arith.truncf %82 : vector<8x32xf32> to vector<8x32xbf16>
    %cst_34 = arith.constant dense<0.000000e+00> : vector<8x8xf32>
    %84 = tpu.matmul %79, %81, %cst_34 {dimension_numbers = #tpu.dot_dimension_numbers<[1], [1], [0], [0], [0, 0, 1, 0], [], []>} : vector<8x32xbf16>, vector<8x32xbf16>, vector<8x8xf32> -> vector<8x8xf32>
    %cst_35 = arith.constant dense<0xFF800000> : vector<8xf32>
    %85 = vector.multi_reduction <maximumf>, %84, %cst_35 [1] : vector<8x8xf32> to vector<8xf32>
    %86 = vector.shape_cast %85 : vector<8xf32> to vector<8x1xf32>
    %87 = vector.broadcast %86 : vector<8x1xf32> to vector<8x8xf32>
    %88 = arith.subf %84, %87 : vector<8x8xf32>
    %89 = math.exp %88 : vector<8x8xf32>
    %cst_36 = arith.constant dense<0.000000e+00> : vector<8xf32>
    %90 = vector.multi_reduction <add>, %89, %cst_36 [1] : vector<8x8xf32> to vector<8xf32>
    %91 = vector.shape_cast %90 : vector<8xf32> to vector<8x1xf32>
    %92 = arith.truncf %89 : vector<8x8xf32> to vector<8x8xbf16>
    %cst_37 = arith.constant dense<0.000000e+00> : vector<8x32xf32>
    %93 = tpu.matmul %92, %83, %cst_37 {dimension_numbers = #tpu.dot_dimension_numbers<[1], [0], [0], [1], [0, 0, 1, 1], [], []>} : vector<8x8xbf16>, vector<8x32xbf16>, vector<8x32xf32> -> vector<8x32xf32>
    %94 = tpu.reciprocal %91 {approx = true} : vector<8x1xf32> -> vector<8x1xf32>
    %95 = vector.broadcast %94 : vector<8x1xf32> to vector<8x32xf32>
    %96 = arith.mulf %93, %95 : vector<8x32xf32>
    %97 = vector.extract_strided_slice %6 {offsets = [0, 128], sizes = [8, 32], strides = [1, 1]} : vector<8x256xf32> to vector<8x32xf32>
    %98 = arith.truncf %97 : vector<8x32xf32> to vector<8x32xbf16>
    %99 = vector.extract_strided_slice %13 {offsets = [0, 128], sizes = [8, 32], strides = [1, 1]} : vector<8x256xf32> to vector<8x32xf32>
    %100 = arith.truncf %99 : vector<8x32xf32> to vector<8x32xbf16>
    %101 = vector.extract_strided_slice %20 {offsets = [0, 128], sizes = [8, 32], strides = [1, 1]} : vector<8x256xf32> to vector<8x32xf32>
    %102 = arith.truncf %101 : vector<8x32xf32> to vector<8x32xbf16>
    %cst_38 = arith.constant dense<0.000000e+00> : vector<8x8xf32>
    %103 = tpu.matmul %98, %100, %cst_38 {dimension_numbers = #tpu.dot_dimension_numbers<[1], [1], [0], [0], [0, 0, 1, 0], [], []>} : vector<8x32xbf16>, vector<8x32xbf16>, vector<8x8xf32> -> vector<8x8xf32>
    %cst_39 = arith.constant dense<0xFF800000> : vector<8xf32>
    %104 = vector.multi_reduction <maximumf>, %103, %cst_39 [1] : vector<8x8xf32> to vector<8xf32>
    %105 = vector.shape_cast %104 : vector<8xf32> to vector<8x1xf32>
    %106 = vector.broadcast %105 : vector<8x1xf32> to vector<8x8xf32>
    %107 = arith.subf %103, %106 : vector<8x8xf32>
    %108 = math.exp %107 : vector<8x8xf32>
    %cst_40 = arith.constant dense<0.000000e+00> : vector<8xf32>
    %109 = vector.multi_reduction <add>, %108, %cst_40 [1] : vector<8x8xf32> to vector<8xf32>
    %110 = vector.shape_cast %109 : vector<8xf32> to vector<8x1xf32>
    %111 = arith.truncf %108 : vector<8x8xf32> to vector<8x8xbf16>
    %cst_41 = arith.constant dense<0.000000e+00> : vector<8x32xf32>
    %112 = tpu.matmul %111, %102, %cst_41 {dimension_numbers = #tpu.dot_dimension_numbers<[1], [0], [0], [1], [0, 0, 1, 1], [], []>} : vector<8x8xbf16>, vector<8x32xbf16>, vector<8x32xf32> -> vector<8x32xf32>
    %113 = tpu.reciprocal %110 {approx = true} : vector<8x1xf32> -> vector<8x1xf32>
    %114 = vector.broadcast %113 : vector<8x1xf32> to vector<8x32xf32>
    %115 = arith.mulf %112, %114 : vector<8x32xf32>
    %116 = vector.extract_strided_slice %6 {offsets = [0, 160], sizes = [8, 32], strides = [1, 1]} : vector<8x256xf32> to vector<8x32xf32>
    %117 = arith.truncf %116 : vector<8x32xf32> to vector<8x32xbf16>
    %118 = vector.extract_strided_slice %13 {offsets = [0, 160], sizes = [8, 32], strides = [1, 1]} : vector<8x256xf32> to vector<8x32xf32>
    %119 = arith.truncf %118 : vector<8x32xf32> to vector<8x32xbf16>
    %120 = vector.extract_strided_slice %20 {offsets = [0, 160], sizes = [8, 32], strides = [1, 1]} : vector<8x256xf32> to vector<8x32xf32>
    %121 = arith.truncf %120 : vector<8x32xf32> to vector<8x32xbf16>
    %cst_42 = arith.constant dense<0.000000e+00> : vector<8x8xf32>
    %122 = tpu.matmul %117, %119, %cst_42 {dimension_numbers = #tpu.dot_dimension_numbers<[1], [1], [0], [0], [0, 0, 1, 0], [], []>} : vector<8x32xbf16>, vector<8x32xbf16>, vector<8x8xf32> -> vector<8x8xf32>
    %cst_43 = arith.constant dense<0xFF800000> : vector<8xf32>
    %123 = vector.multi_reduction <maximumf>, %122, %cst_43 [1] : vector<8x8xf32> to vector<8xf32>
    %124 = vector.shape_cast %123 : vector<8xf32> to vector<8x1xf32>
    %125 = vector.broadcast %124 : vector<8x1xf32> to vector<8x8xf32>
    %126 = arith.subf %122, %125 : vector<8x8xf32>
    %127 = math.exp %126 : vector<8x8xf32>
    %cst_44 = arith.constant dense<0.000000e+00> : vector<8xf32>
    %128 = vector.multi_reduction <add>, %127, %cst_44 [1] : vector<8x8xf32> to vector<8xf32>
    %129 = vector.shape_cast %128 : vector<8xf32> to vector<8x1xf32>
    %130 = arith.truncf %127 : vector<8x8xf32> to vector<8x8xbf16>
    %cst_45 = arith.constant dense<0.000000e+00> : vector<8x32xf32>
    %131 = tpu.matmul %130, %121, %cst_45 {dimension_numbers = #tpu.dot_dimension_numbers<[1], [0], [0], [1], [0, 0, 1, 1], [], []>} : vector<8x8xbf16>, vector<8x32xbf16>, vector<8x32xf32> -> vector<8x32xf32>
    %132 = tpu.reciprocal %129 {approx = true} : vector<8x1xf32> -> vector<8x1xf32>
    %133 = vector.broadcast %132 : vector<8x1xf32> to vector<8x32xf32>
    %134 = arith.mulf %131, %133 : vector<8x32xf32>
    %135 = vector.extract_strided_slice %6 {offsets = [0, 192], sizes = [8, 32], strides = [1, 1]} : vector<8x256xf32> to vector<8x32xf32>
    %136 = arith.truncf %135 : vector<8x32xf32> to vector<8x32xbf16>
    %137 = vector.extract_strided_slice %13 {offsets = [0, 192], sizes = [8, 32], strides = [1, 1]} : vector<8x256xf32> to vector<8x32xf32>
    %138 = arith.truncf %137 : vector<8x32xf32> to vector<8x32xbf16>
    %139 = vector.extract_strided_slice %20 {offsets = [0, 192], sizes = [8, 32], strides = [1, 1]} : vector<8x256xf32> to vector<8x32xf32>
    %140 = arith.truncf %139 : vector<8x32xf32> to vector<8x32xbf16>
    %cst_46 = arith.constant dense<0.000000e+00> : vector<8x8xf32>
    %141 = tpu.matmul %136, %138, %cst_46 {dimension_numbers = #tpu.dot_dimension_numbers<[1], [1], [0], [0], [0, 0, 1, 0], [], []>} : vector<8x32xbf16>, vector<8x32xbf16>, vector<8x8xf32> -> vector<8x8xf32>
    %cst_47 = arith.constant dense<0xFF800000> : vector<8xf32>
    %142 = vector.multi_reduction <maximumf>, %141, %cst_47 [1] : vector<8x8xf32> to vector<8xf32>
    %143 = vector.shape_cast %142 : vector<8xf32> to vector<8x1xf32>
    %144 = vector.broadcast %143 : vector<8x1xf32> to vector<8x8xf32>
    %145 = arith.subf %141, %144 : vector<8x8xf32>
    %146 = math.exp %145 : vector<8x8xf32>
    %cst_48 = arith.constant dense<0.000000e+00> : vector<8xf32>
    %147 = vector.multi_reduction <add>, %146, %cst_48 [1] : vector<8x8xf32> to vector<8xf32>
    %148 = vector.shape_cast %147 : vector<8xf32> to vector<8x1xf32>
    %149 = arith.truncf %146 : vector<8x8xf32> to vector<8x8xbf16>
    %cst_49 = arith.constant dense<0.000000e+00> : vector<8x32xf32>
    %150 = tpu.matmul %149, %140, %cst_49 {dimension_numbers = #tpu.dot_dimension_numbers<[1], [0], [0], [1], [0, 0, 1, 1], [], []>} : vector<8x8xbf16>, vector<8x32xbf16>, vector<8x32xf32> -> vector<8x32xf32>
    %151 = tpu.reciprocal %148 {approx = true} : vector<8x1xf32> -> vector<8x1xf32>
    %152 = vector.broadcast %151 : vector<8x1xf32> to vector<8x32xf32>
    %153 = arith.mulf %150, %152 : vector<8x32xf32>
    %154 = vector.extract_strided_slice %6 {offsets = [0, 224], sizes = [8, 32], strides = [1, 1]} : vector<8x256xf32> to vector<8x32xf32>
    %155 = arith.truncf %154 : vector<8x32xf32> to vector<8x32xbf16>
    %156 = vector.extract_strided_slice %13 {offsets = [0, 224], sizes = [8, 32], strides = [1, 1]} : vector<8x256xf32> to vector<8x32xf32>
    %157 = arith.truncf %156 : vector<8x32xf32> to vector<8x32xbf16>
    %158 = vector.extract_strided_slice %20 {offsets = [0, 224], sizes = [8, 32], strides = [1, 1]} : vector<8x256xf32> to vector<8x32xf32>
    %159 = arith.truncf %158 : vector<8x32xf32> to vector<8x32xbf16>
    %cst_50 = arith.constant dense<0.000000e+00> : vector<8x8xf32>
    %160 = tpu.matmul %155, %157, %cst_50 {dimension_numbers = #tpu.dot_dimension_numbers<[1], [1], [0], [0], [0, 0, 1, 0], [], []>} : vector<8x32xbf16>, vector<8x32xbf16>, vector<8x8xf32> -> vector<8x8xf32>
    %cst_51 = arith.constant dense<0xFF800000> : vector<8xf32>
    %161 = vector.multi_reduction <maximumf>, %160, %cst_51 [1] : vector<8x8xf32> to vector<8xf32>
    %162 = vector.shape_cast %161 : vector<8xf32> to vector<8x1xf32>
    %163 = vector.broadcast %162 : vector<8x1xf32> to vector<8x8xf32>
    %164 = arith.subf %160, %163 : vector<8x8xf32>
    %165 = math.exp %164 : vector<8x8xf32>
    %cst_52 = arith.constant dense<0.000000e+00> : vector<8xf32>
    %166 = vector.multi_reduction <add>, %165, %cst_52 [1] : vector<8x8xf32> to vector<8xf32>
    %167 = vector.shape_cast %166 : vector<8xf32> to vector<8x1xf32>
    %168 = arith.truncf %165 : vector<8x8xf32> to vector<8x8xbf16>
    %cst_53 = arith.constant dense<0.000000e+00> : vector<8x32xf32>
    %169 = tpu.matmul %168, %159, %cst_53 {dimension_numbers = #tpu.dot_dimension_numbers<[1], [0], [0], [1], [0, 0, 1, 1], [], []>} : vector<8x8xbf16>, vector<8x32xbf16>, vector<8x32xf32> -> vector<8x32xf32>
    %170 = tpu.reciprocal %167 {approx = true} : vector<8x1xf32> -> vector<8x1xf32>
    %171 = vector.broadcast %170 : vector<8x1xf32> to vector<8x32xf32>
    %172 = arith.mulf %169, %171 : vector<8x32xf32>
    %173 = tpu.concatenate %39, %58, %77, %96, %115, %134, %153, %172 in 1 : vector<8x32xf32>, vector<8x32xf32>, vector<8x32xf32>, vector<8x32xf32>, vector<8x32xf32>, vector<8x32xf32>, vector<8x32xf32>, vector<8x32xf32> -> vector<8x256xf32>
    %174 = arith.truncf %173 : vector<8x256xf32> to vector<8x256xbf16>
    %c0_54 = arith.constant 0 : index
    %c0_55 = arith.constant 0 : index
    %175 = vector.load %arg10[%c0_54, %c0_55] : memref<256x256xbf16, #tpu.memory_space<vmem>>, vector<256x256xbf16>
    %cst_56 = arith.constant dense<0.000000e+00> : vector<8x256xf32>
    %176 = tpu.matmul %174, %175, %cst_56 {dimension_numbers = #tpu.dot_dimension_numbers<[1], [0], [0], [1], [0, 0, 1, 1], [], []>} : vector<8x256xbf16>, vector<256x256xbf16>, vector<8x256xf32> -> vector<8x256xf32>
    %c0_57 = arith.constant 0 : index
    %c0_58 = arith.constant 0 : index
    %177 = vector.load %arg11[%c0_57, %c0_58] : memref<1x256xf32, #tpu.memory_space<vmem>>, vector<1x256xf32>
    %178 = vector.broadcast %177 : vector<1x256xf32> to vector<8x256xf32>
    %179 = arith.addf %176, %178 : vector<8x256xf32>
    %c0_59 = arith.constant 0 : index
    %c0_60 = arith.constant 0 : index
    %c0_61 = arith.constant 0 : index
    %180 = vector.load %arg12[%c0_59, %c0_60, %c0_61] : memref<1x8x256xf32, #tpu.memory_space<vmem>>, vector<1x8x256xf32>
    %181 = vector.shape_cast %180 : vector<1x8x256xf32> to vector<8x256xf32>
    %182 = vector.shape_cast %179 : vector<8x256xf32> to vector<1x8x256xf32>
    tpu.vector_store %arg12[%c0_59, %c0_60, %c0_61], %182 {strides = array<i32>} : memref<1x8x256xf32, #tpu.memory_space<vmem>>, vector<1x8x256xf32>,
    return
  }
  func.func @transform_0(%arg0: i32) -> (i32, i32, i32) {
    %c0_i32 = arith.constant 0 : i32
    %c0_i32_0 = arith.constant 0 : i32
    %c0_i32_1 = arith.constant 0 : i32
    return %arg0, %c0_i32, %c0_i32_0 : i32, i32, i32
  }
  func.func @transform_1(%arg0: i32) -> (i32, i32, i32) {
    %c0_i32 = arith.constant 0 : i32
    %c0_i32_0 = arith.constant 0 : i32
    %c0_i32_1 = arith.constant 0 : i32
    return %arg0, %c0_i32, %c0_i32_0 : i32, i32, i32
  }
  func.func @transform_2(%arg0: i32) -> (i32, i32, i32) {
    %c0_i32 = arith.constant 0 : i32
    %c0_i32_0 = arith.constant 0 : i32
    %c0_i32_1 = arith.constant 0 : i32
    return %arg0, %c0_i32, %c0_i32_0 : i32, i32, i32
  }
  func.func @transform_3(%arg0: i32) -> (i32, i32) {
    %c0_i32 = arith.constant 0 : i32
    %c0_i32_0 = arith.constant 0 : i32
    %c0_i32_1 = arith.constant 0 : i32
    return %c0_i32, %c0_i32_0 : i32, i32
  }
  func.func @transform_4(%arg0: i32) -> (i32, i32) {
    %c0_i32 = arith.constant 0 : i32
    %c0_i32_0 = arith.constant 0 : i32
    %c0_i32_1 = arith.constant 0 : i32
    return %c0_i32, %c0_i32_0 : i32, i32
  }
  func.func @transform_5(%arg0: i32) -> (i32, i32) {
    %c0_i32 = arith.constant 0 : i32
    %c0_i32_0 = arith.constant 0 : i32
    %c0_i32_1 = arith.constant 0 : i32
    return %c0_i32, %c0_i32_0 : i32, i32
  }
  func.func @transform_6(%arg0: i32) -> (i32, i32) {
    %c0_i32 = arith.constant 0 : i32
    %c0_i32_0 = arith.constant 0 : i32
    %c0_i32_1 = arith.constant 0 : i32
    return %c0_i32, %c0_i32_0 : i32, i32
  }
  func.func @transform_7(%arg0: i32) -> (i32, i32) {
    %c0_i32 = arith.constant 0 : i32
    %c0_i32_0 = arith.constant 0 : i32
    %c0_i32_1 = arith.constant 0 : i32
    return %c0_i32, %c0_i32_0 : i32, i32
  }
  func.func @transform_8(%arg0: i32) -> (i32, i32) {
    %c0_i32 = arith.constant 0 : i32
    %c0_i32_0 = arith.constant 0 : i32
    %c0_i32_1 = arith.constant 0 : i32
    return %c0_i32, %c0_i32_0 : i32, i32
  }
  func.func @transform_9(%arg0: i32) -> (i32, i32) {
    %c0_i32 = arith.constant 0 : i32
    %c0_i32_0 = arith.constant 0 : i32
    %c0_i32_1 = arith.constant 0 : i32
    return %c0_i32, %c0_i32_0 : i32, i32
  }
  func.func @transform_10(%arg0: i32) -> (i32, i32) {
    %c0_i32 = arith.constant 0 : i32
    %c0_i32_0 = arith.constant 0 : i32
    %c0_i32_1 = arith.constant 0 : i32
    return %c0_i32, %c0_i32_0 : i32, i32
  }
  func.func @transform_11(%arg0: i32) -> (i32, i32, i32) {
    %c0_i32 = arith.constant 0 : i32
    %c0_i32_0 = arith.constant 0 : i32
    %c0_i32_1 = arith.constant 0 : i32
    return %arg0, %c0_i32, %c0_i32_0 : i32, i32, i32
  }
}

</mosaic_0001>

<bundles_post_ra>
// kernel: model_forward.3
= control target key start
LH: loop header
LB: loop body
LE: loop exit
PB: predicated region body
PF: predicated region fallthrough
CT: control target
= control target key end

     0   :  { %s3575_s0 = inlined_call_operand.vmem [shape: bf16[2,8,256], index: 0, kind: input, shape index: {}, may-alias: {0,1,2}]   ;;  %s3576_s1 = inlined_call_operand.vmem [shape: bf16[2,8,256], index: 1, kind: input, shape index: {}, may-alias: {0,1,2}]   ;;  %s3577_s2 = inlined_call_operand.vmem [shape: bf16[2,8,256], index: 2, kind: input, shape index: {}, may-alias: {0,1,2}]   ;;  %s3578_s3 = inlined_call_operand.hbm [shape: bf16[256,256], index: 3, kind: input, shape index: {}]   ;;  %s3579_s4 = inlined_call_operand.hbm [shape: bf16[256,256], index: 4, kind: input, shape index: {}]   ;;  %s3580_s5 = inlined_call_operand.hbm [shape: bf16[256,256], index: 5, kind: input, shape index: {}]   ;;  %s3581_s6 = inlined_call_operand.vmem [shape: f32[1,256], index: 6, kind: input, shape index: {}]   ;;  %s3582_s7 = inlined_call_operand.vmem [shape: f32[1,256], index: 7, kind: input, shape index: {}]   ;;  %s3583_s8 = inlined_call_operand.vmem [shape: f32[1,256], index: 8, kind: input, shape index: {}]   ;;  %s3584_s9 = inlined_call_operand.hbm [shape: bf16[256,256], index: 9, kind: input, shape index: {}]   ;;  %s3585_s10 = inlined_call_operand.hbm [shape: f32[1,256], index: 10, kind: input, shape index: {}]   ;;  %s3586_s11 = inlined_call_operand.hbm [shape: f32[2,8,256], index: 11, kind: output, shape index: {}]  }
   0x1   :  { %3592 = sst [smem:[#allocation21_spill]] %s3579_s4 }
   0x2   :  { %3593 = sst [smem:[#allocation22_spill]] %s3584_s9 }
   0x3   :  { %16 = vsyncpa [#allocation3], 0 }
   0x4   :  { %17 = vsyncpa [#allocation6], 0 }
   0x5   :  { %18 = vsyncpa [#allocation9], 0 }
   0x6   :  { %19 = vsyncpa [#allocation4], 0 }
   0x7   :  { %21 = vsyncpa [#allocation4 + $0x1], 0  ;;  %s3292_s17 = smov 0   ;;  %s3294_s18 = smov 0  }
   0x8   :  { %s3296_s19 = smov 0   ;;  %s3298_s20 = smov 0  }
   0x9 LB: > { %3594 = sst [smem:[#allocation16_spill]] %s3208_s17  ;;  %s3313_s21 = sadd.s32 4294967295, %s3220_s20   ;;  %s3220_s20 = sphi %s3298_s20, %s3607_s20   ;;  %s3216_s19 = sphi %s3296_s19, %s3609_s19   ;;  %s3212_s18 = sphi %s3294_s18, %s3611_s18   ;;  %s3208_s17 = sphi %s3292_s17, %s3610_s17  }
   0xa   : > { %3595 = sst [smem:[#allocation17_spill]] %s3216_s19  ;;  %s2168_s22 = sadd.s32 4294967294, %s3220_s20  }
   0xb   : > { %s3317_s23 = sadd.s32 1, %s3220_s20   ;;  %s280_s24 = sadd.s32 1, %s3216_s19 }
   0xc   : > { %3596 = sst [smem:[#allocation18_spill]] %s3317_s23  ;;  %s277_s25 = ssub.s32 %s3220_s20, %s3317_s23 }
   0xd   : > { %p290_p0 = scmp.ne.s32.totalorder %s3216_s19, %s3212_s18  ;;  %p278_p1 = scmp.eq.s32.totalorder %s277_s25, 0 }
   0xe   : > { %p291_p2 = scmp.eq.s32.totalorder %s3313_s21, 1  ;;  %p296_p3 = scmp.ne.s32.totalorder %s3212_s18, %s3208_s17 }
   0xf   : > { %p297_p4 = scmp.eq.s32.totalorder %s2168_s22, 1  ;;  %p2169_p7 = scmp.ge.s32.totalorder %s3220_s20, 1 }
  0x10   : > { %s3328_s26 = scalar_select %p278_p1, %s3216_s19, %s280_s24  }
  0x11   : > { %p3330_p5 = por %p291_p2, %p290_p0  ;;  %p3334_p6 = por %p297_p4, %p296_p3 }
  0x12   : > { %3597 = sst [smem:[#allocation19_spill]] %s3328_s26  ;;  %p304_p8 = scmp.lt.s32.totalorder %s3220_s20, 3 }
  0x13   : > { %s3599_s28 = scalar_select %p3334_p6, 1, 0 }
  0x14   : > { %p2896_p9 = scmp.eq.s32.totalorder %s3313_s21, 0  ;;  %p3341_p10 = pnand %p2169_p7, %p304_p8 }
  0x15   : > { %3600 = sst [smem:[#allocation20_spill]] %s3599_s28  ;;  %s3222_s24 = smov [#allocation5]  }
  0x16   : > { %s3602_s4 = sld [smem:[#allocation21_spill]]  ;;  %p2876_p11 = pneg %p3341_p10 }
  0x17   : > { %s3603_s9 = sld [smem:[#allocation22_spill]]  ;;  %s331_s25 = sshll.u32 %s3222_s24, 4  ;;  %s332_s25 = int_to_ptr.vmem [resolvable:$true] %s331_s25 }
  0x18   : > { %p3355_p12 = pnand %p2896_p9, %p2876_p11  ;;  %s3223_s30 = smov 128  }
  0x19   : > { %s3224_s12 = smov 8   ;;  %s315_s26 = sshll.u32 %s3578_s3, 4  ;;  %s316_s26 = int_to_ptr.hbm [resolvable:$true] %s315_s26 }
  0x1a   : > { %s343_s23 = sshll.u32 %s3580_s5, 4  ;;  %s3226_s28 = smov [#allocation2]   ;;  %s344_s23 = int_to_ptr.hbm [resolvable:$true] %s343_s23 }
  0x1b   : > { %s317_s17 = sshll.u32 %s3226_s28, 4  ;;  %s381_s15 = sshll.u32 %s3585_s10, 4  ;;  %s318_s17 = int_to_ptr.vmem [resolvable:$true] %s317_s17  ;;  %s382_s15 = int_to_ptr.hbm [resolvable:$true] %s381_s15 }
  0x1c   : > { %s329_s13 = sshll.u32 %s3602_s4, 4  ;;  %s3225_s4 = smov [#allocation8]   ;;  %s330_s13 = int_to_ptr.hbm [resolvable:$true] %s329_s13 }
  0x1d   : > { %s366_s16 = sshll.u32 %s3603_s9, 4  ;;  %s368_s14 = sshll.u32 %s3225_s4, 4  ;;  %s367_s16 = int_to_ptr.hbm [resolvable:$true] %s366_s16  ;;  %s369_s14 = int_to_ptr.vmem [resolvable:$true] %s368_s14 }
  0x1e   : > { %2882 = dma.hbm_to_vmem [thread:$0]  (!%p3355_p12), %s330_s13, 4096, %s332_s25, [#allocation6], %s3223_s30, %s3223_s30, %s3224_s12  }
  0x1f   : > { %2888 = dma.hbm_to_vmem [thread:$0]  (!%p3355_p12), %s367_s16, 4096, %s369_s14, [#allocation9], %s3223_s30, %s3223_s30, %s3224_s12  }
  0x20   : > { %2879 = dma.hbm_to_vmem [thread:$0]  (!%p3355_p12), %s316_s26, 4096, %s318_s17, [#allocation3], %s3223_s30, %s3223_s30, %s3224_s12  }
  0x21   : > { %s3227_s4 = smov [#allocation7]   ;;  %s3228_s16 = smov [#allocation10]  }
  0x22   : > { %s345_s13 = sshll.u32 %s3227_s4, 4  ;;  %s383_s19 = sshll.u32 %s3228_s16, 4  ;;  %s346_s13 = int_to_ptr.vmem [resolvable:$true] %s345_s13  ;;  %s384_s19 = int_to_ptr.vmem [resolvable:$true] %s383_s19 }
  0x23   : > { %2885 = dma.hbm_to_vmem [thread:$0]  (!%p3355_p12), %s344_s23, 4096, %s346_s13, [#allocation6], %s3223_s30, %s3223_s30, %s3224_s12  }
  0x24   : > { %2891 = dma.hbm_to_vmem [thread:$0]  (!%p3355_p12), %s382_s15, 32, %s384_s19, [#allocation9]  }
  0x25   : > { %420 = sbr.rel (%p3341_p10) target bundleno = 1124 (0x464), region = 64 }
  0x2a   : > { %3191 = dma.done.wait (%p2896_p9), [#allocation3], 4096  }
  0x2b   : > { %3193 = vsyncadd (%p2896_p9), [#allocation3], 4294963200 }
  0x2c   : > { %3195 = dma.done.wait (%p2896_p9), [#allocation6], 8192  }
  0x2d   : > { %3197 = vsyncadd (%p2896_p9), [#allocation6], 4294959104 }
  0x2e   : > { %3199 = dma.done.wait (%p2896_p9), [#allocation9], 4128  }
  0x2f   : > { %3201 = vsyncadd (%p2896_p9), [#allocation9], 4294963168  ;;  %v2247_v0 = vld [vmem:[#allocation2 + $0x70] sm:$0xf]  ;;  %v2740_v1 = vld [vmem:[#allocation2 + $0x74] sm:$0xf0] }
  0x30   : > { %v2311_v2 = vld [vmem:[#allocation2 + $0xf0] sm:$0xf]  ;;  %v2248_v3 = vor.u32 %v2740_v1, %v2247_v0  ;;  %v2756_v4 = vld [vmem:[#allocation2 + $0xf4] sm:$0xf0]  ;;  %v2239_v5 = vld [vmem:[#allocation2 + $0x60] sm:$0xf] }
  0x31   : > { %v2738_v6 = vld [vmem:[#allocation2 + $0x64] sm:$0xf0]  ;;  %v2312_v7 = vor.u32 %v2756_v4, %v2311_v2  ;;  %v2303_v8 = vld [vmem:[#allocation2 + $0xe0] sm:$0xf]  ;;  %v2231_v12 = vld [vmem:[#allocation2 + $0x50] sm:$0xf] }
  0x32   : > { %v2754_v9 = vld [vmem:[#allocation2 + $0xe4] sm:$0xf0]  ;;  %713 = vmatpush.bf16.msra.mxu0 %v2248_v3  ;;  %v2240_v10 = vor.u32 %v2738_v6, %v2239_v5  ;;  %v2736_v13 = vld [vmem:[#allocation2 + $0x54] sm:$0xf0]  ;;  %v2295_v14 = vld [vmem:[#allocation2 + $0xd0] sm:$0xf] }
  0x33   : > { %726 = vmatpush.bf16.msra.mxu1 %v2312_v7  ;;  %v2304_v11 = vor.u32 %v2754_v9, %v2303_v8  ;;  %v2752_v15 = vld [vmem:[#allocation2 + $0xd4] sm:$0xf0]  ;;  %v2232_v16 = vor.u32 %v2736_v13, %v2231_v12  ;;  %p491_p13 = scmp.lt.s32.totalorder %s3313_s21, 1  ;;  %v2223_v18 = vld [vmem:[#allocation2 + $0x40] sm:$0xf]  ;;  %vm1284_vm0 = vcmask 261120  }
  0x34   : > { %v2296_v17 = vor.u32 %v2752_v15, %v2295_v14  ;;  %v2734_v19 = vld [vmem:[#allocation2 + $0x44] sm:$0xf0]  ;;  %v2287_v20 = vld [vmem:[#allocation2 + $0xc0] sm:$0xf]  ;;  %v2215_v24 = vld [vmem:[#allocation2 + $0x30] sm:$0xf] }
  0x35   : > { %v2750_v21 = vld [vmem:[#allocation2 + $0xc4] sm:$0xf0]  ;;  %v2224_v22 = vor.u32 %v2734_v19, %v2223_v18  ;;  %s492_s17 = scalar_select %p491_p13, %s3313_s21, 1  ;;  %v2732_v25 = vld [vmem:[#allocation2 + $0x34] sm:$0xf0]  ;;  %vm1304_vm1 = vcmask 64512  }
  0x36   : > { %714 = vmatpush.bf16.msra.mxu0 %v2240_v10  ;;  %v2288_v23 = vor.u32 %v2750_v21, %v2287_v20  ;;  %v2279_v26 = vld [vmem:[#allocation2 + $0xb0] sm:$0xf]  ;;  %v2748_v27 = vld [vmem:[#allocation2 + $0xb4] sm:$0xf0]  ;;  %v2739_v28 = vld [vmem:[#allocation2 + $0x74] sm:$0xf]  ;;  %v2216_v33 = vor.u32 %v2732_v25, %v2215_v24 }
  0x37   : > { %727 = vmatpush.bf16.msra.mxu1 %v2304_v11  ;;  %v2249_v29 = vld [vmem:[#allocation2 + $0x78] sm:$0xf0]  ;;  %v2755_v31 = vld [vmem:[#allocation2 + $0xf4] sm:$0xf]  ;;  %v2207_v34 = vld [vmem:[#allocation2 + $0x20] sm:$0xf]  ;;  %v2280_v37 = vor.u32 %v2748_v27, %v2279_v26 }
  0x38   : > { %v2252_v30 = vor.u32 %v2739_v28, %v2249_v29  ;;  %v2313_v32 = vld [vmem:[#allocation2 + $0xf8] sm:$0xf0]  ;;  %v2730_v35 = vld [vmem:[#allocation2 + $0x24] sm:$0xf0]  ;;  %s3394_s23 = sshll.u32 %s492_s17, 3  ;;  %s3229_s16 = smov 64  }
  0x39   : > { %v2316_v36 = vor.u32 %v2755_v31, %v2313_v32  ;;  %v2271_v38 = vld [vmem:[#allocation2 + $0xa0] sm:$0xf]  ;;  %v2737_v39 = vld [vmem:[#allocation2 + $0x64] sm:$0xf]  ;;  %v2241_v40 = vld [vmem:[#allocation2 + $0x68] sm:$0xf0]  ;;  %v2208_v46 = vor.u32 %v2730_v35, %v2207_v34  ;;  %s495_s29 = scalar_lea.vmem %s3575_s0, %s3394_s23  ;;  %s500_s12 = scalar_lea.vmem %s3576_s1, %s3394_s23 }
  0x3a   : > { %715 = vmatpush.bf16.msra.mxu0 %v2232_v16  ;;  %739 = vmatpush.bf16.msra.mxu2 %v2252_v30  ;;  %v2746_v41 = vld [vmem:[#allocation2 + $0xa4] sm:$0xf0]  ;;  %v2244_v42 = vor.u32 %v2737_v39, %v2241_v40  ;;  %v2753_v43 = vld [vmem:[#allocation2 + $0xe4] sm:$0xf]  ;;  %v2305_v44 = vld [vmem:[#allocation2 + $0xe8] sm:$0xf0]  ;;  %s505_s4 = scalar_lea.vmem %s3577_s2, %s3394_s23 }
  0x3b   : > { %728 = vmatpush.bf16.msra.mxu1 %v2296_v17  ;;  %752 = vmatpush.bf16.msra.mxu3 %v2316_v36  ;;  %v2308_v45 = vor.u32 %v2753_v43, %v2305_v44  ;;  %v2735_v47 = vld [vmem:[#allocation2 + $0x54] sm:$0xf]  ;;  %v2233_v48 = vld [vmem:[#allocation2 + $0x58] sm:$0xf0]  ;;  %v2272_v50 = vor.u32 %v2746_v41, %v2271_v38  ;;  %v2199_v51 = vld [vmem:[#allocation2 + $0x10] sm:$0xf] }
  0x3c   : > { %v2751_v49 = vld [vmem:[#allocation2 + $0xd4] sm:$0xf]  ;;  %v2728_v52 = vld [vmem:[#allocation2 + $0x14] sm:$0xf0]  ;;  %v2236_v53 = vor.u32 %v2735_v47, %v2233_v48  ;;  %v2297_v54 = vld [vmem:[#allocation2 + $0xd8] sm:$0xf0] }
  0x3d   : > { %v2263_v55 = vld [vmem:[#allocation2 + $0x90] sm:$0xf]  ;;  %v2744_v56 = vld [vmem:[#allocation2 + $0x94] sm:$0xf0]  ;;  %v2300_v57 = vor.u32 %v2751_v49, %v2297_v54  ;;  %v2733_v58 = vld [vmem:[#allocation2 + $0x44] sm:$0xf]  ;;  %v2200_v62 = vor.u32 %v2728_v52, %v2199_v51 }
  0x3e   : > { %716 = vmatpush.bf16.msra.mxu0 %v2224_v22  ;;  %740 = vmatpush.bf16.msra.mxu2 %v2244_v42  ;;  %v2225_v59 = vld [vmem:[#allocation2 + $0x48] sm:$0xf0]  ;;  %v2749_v60 = vld [vmem:[#allocation2 + $0xc4] sm:$0xf]  ;;  %v2191_v63 = vld [vmem:[#allocation2] sm:$0xf]  ;;  %v2264_v1 = vor.u32 %v2744_v56, %v2263_v55 }
  0x3f   : > { %729 = vmatpush.bf16.msra.mxu1 %v2288_v23  ;;  %753 = vmatpush.bf16.msra.mxu3 %v2308_v45  ;;  %v2289_v61 = vld [vmem:[#allocation2 + $0xc8] sm:$0xf0]  ;;  %v507_v0 = vld [vmem:[%s495_s29] sm:$0xff]  ;;  %v2726_v2 = vld [vmem:[#allocation2 + $0x4] sm:$0xf0]  ;;  %v2228_v5 = vor.u32 %v2733_v58, %v2225_v59  ;;  %s3230_s19 = smov 32  }
  0x40   : > { %v2255_v3 = vld [vmem:[#allocation2 + $0x80] sm:$0xf]  ;;  %v2742_v4 = vld [vmem:[#allocation2 + $0x84] sm:$0xf0]  ;;  %v2375_v6 = vld [vmem:[#allocation5 + $0x70] sm:$0xf]  ;;  %v2292_v9 = vor.u32 %v2749_v60, %v2289_v61  ;;  %v547_v11 = vunpack.c.l.b16 %v507_v0  ;;  %v2192_v14 = vor.u32 %v2726_v2, %v2191_v63  ;;  %v548_v15 = vunpack.c.h.b16 %v507_v0 }
  0x41   : > { %v2772_v7 = vld [vmem:[#allocation5 + $0x74] sm:$0xf0]  ;;  %v2439_v8 = vld [vmem:[#allocation5 + $0xf0] sm:$0xf]  ;;  %v2731_v12 = vld [vmem:[#allocation2 + $0x34] sm:$0xf]  ;;  %v2256_v18 = vor.u32 %v2742_v4, %v2255_v3 }
  0x42   : > { %717 = vmatpush.bf16.msra.mxu0 %v2216_v33  ;;  %741 = vmatpush.bf16.msra.mxu2 %v2236_v53  ;;  %v2788_v10 = vld [vmem:[#allocation5 + $0xf4] sm:$0xf0]  ;;  %v2217_v13 = vld [vmem:[#allocation2 + $0x38] sm:$0xf0]  ;;  %v2747_v16 = vld [vmem:[#allocation2 + $0xb4] sm:$0xf]  ;;  %v2376_v19 = vor.u32 %v2772_v7, %v2375_v6  ;;  %v3400_v26 = vpack.c.b16 %v547_v11, %v547_v11  ;;  %v3402_v30 = vpack.c.b16 %v548_v15, %v548_v15 }
  0x43   : > { %730 = vmatpush.bf16.msra.mxu1 %v2280_v37  ;;  %754 = vmatpush.bf16.msra.mxu3 %v2300_v57  ;;  %v2281_v17 = vld [vmem:[#allocation2 + $0xb8] sm:$0xf0]  ;;  %v2440_v20 = vor.u32 %v2788_v10, %v2439_v8  ;;  %v2367_v21 = vld [vmem:[#allocation5 + $0x60] sm:$0xf]  ;;  %v2770_v22 = vld [vmem:[#allocation5 + $0x64] sm:$0xf0]  ;;  %v2220_v24 = vor.u32 %v2731_v12, %v2217_v13 }
  0x44   : > { %v2431_v23 = vld [vmem:[#allocation5 + $0xe0] sm:$0xf]  ;;  %v2786_v25 = vld [vmem:[#allocation5 + $0xe4] sm:$0xf0]  ;;  %v2284_v27 = vor.u32 %v2747_v16, %v2281_v17  ;;  %v2729_v28 = vld [vmem:[#allocation2 + $0x24] sm:$0xf]  ;;  %v2368_v33 = vor.u32 %v2770_v22, %v2367_v21 }
  0x45   : > { %v2209_v29 = vld [vmem:[#allocation2 + $0x28] sm:$0xf0]  ;;  %v2745_v31 = vld [vmem:[#allocation2 + $0xa4] sm:$0xf]  ;;  %v2432_v34 = vor.u32 %v2786_v25, %v2431_v23  ;;  %v2359_v35 = vld [vmem:[#allocation5 + $0x50] sm:$0xf] }
  0x46   : > { %718 = vmatpush.bf16.msra.mxu0 %v2208_v46  ;;  %742 = vmatpush.bf16.msra.mxu2 %v2228_v5  ;;  %v2273_v32 = vld [vmem:[#allocation2 + $0xa8] sm:$0xf0]  ;;  %v2768_v36 = vld [vmem:[#allocation5 + $0x54] sm:$0xf0]  ;;  %v2423_v37 = vld [vmem:[#allocation5 + $0xd0] sm:$0xf]  ;;  %v2212_v38 = vor.u32 %v2729_v28, %v2209_v29 }
  0x47   : > { %731 = vmatpush.bf16.msra.mxu1 %v2272_v50  ;;  %755 = vmatpush.bf16.msra.mxu3 %v2292_v9  ;;  %v2784_v39 = vld [vmem:[#allocation5 + $0xd4] sm:$0xf0]  ;;  %v2276_v40 = vor.u32 %v2745_v31, %v2273_v32  ;;  %v2727_v41 = vld [vmem:[#allocation2 + $0x14] sm:$0xf]  ;;  %v2201_v42 = vld [vmem:[#allocation2 + $0x18] sm:$0xf0]  ;;  %v2360_v45 = vor.u32 %v2768_v36, %v2359_v35 }
  0x48   : > { %v2743_v43 = vld [vmem:[#allocation2 + $0x94] sm:$0xf]  ;;  %v2265_v44 = vld [vmem:[#allocation2 + $0x98] sm:$0xf0]  ;;  %v2351_v46 = vld [vmem:[#allocation5 + $0x40] sm:$0xf]  ;;  %v2424_v47 = vor.u32 %v2784_v39, %v2423_v37  ;;  %v2204_v51 = vor.u32 %v2727_v41, %v2201_v42 }
  0x49   : > { %v2766_v48 = vld [vmem:[#allocation5 + $0x44] sm:$0xf0]  ;;  %v2415_v49 = vld [vmem:[#allocation5 + $0xc0] sm:$0xf]  ;;  %v2268_v52 = vor.u32 %v2743_v43, %v2265_v44  ;;  %v2725_v53 = vld [vmem:[#allocation2 + $0x4] sm:$0xf] }
  0x4a   : > { %719 = vmatpush.bf16.msra.mxu0 %v2200_v62  ;;  %743 = vmatpush.bf16.msra.mxu2 %v2220_v24  ;;  %v2782_v50 = vld [vmem:[#allocation5 + $0xc4] sm:$0xf0]  ;;  %v2193_v54 = vld [vmem:[#allocation2 + $0x8] sm:$0xf0]  ;;  %v2771_v55 = vld [vmem:[#allocation5 + $0x74] sm:$0xf]  ;;  %v2352_v59 = vor.u32 %v2766_v48, %v2351_v46 }
  0x4b   : > { %732 = vmatpush.bf16.msra.mxu1 %v2264_v1  ;;  %756 = vmatpush.bf16.msra.mxu3 %v2284_v27  ;;  %v2377_v56 = vld [vmem:[#allocation5 + $0x78] sm:$0xf0]  ;;  %v2741_v57 = vld [vmem:[#allocation2 + $0x84] sm:$0xf]  ;;  %v2257_v58 = vld [vmem:[#allocation2 + $0x88] sm:$0xf0]  ;;  %v2416_v62 = vor.u32 %v2782_v50, %v2415_v49  ;;  %v2196_v1 = vor.u32 %v2725_v53, %v2193_v54 }
  0x4c   : > { %v2787_v60 = vld [vmem:[#allocation5 + $0xf4] sm:$0xf]  ;;  %v2441_v61 = vld [vmem:[#allocation5 + $0xf8] sm:$0xf0]  ;;  %v2343_v63 = vld [vmem:[#allocation5 + $0x30] sm:$0xf]  ;;  %v2380_v4 = vor.u32 %v2771_v55, %v2377_v56  ;;  %v2260_v5 = vor.u32 %v2741_v57, %v2257_v58 }
  0x4d   : > { %v2764_v0 = vld [vmem:[#allocation5 + $0x34] sm:$0xf0]  ;;  %v2407_v2 = vld [vmem:[#allocation5 + $0xb0] sm:$0xf]  ;;  %v2444_v6 = vor.u32 %v2787_v60, %v2441_v61  ;;  %v2769_v7 = vld [vmem:[#allocation5 + $0x64] sm:$0xf] }
  0x4e   : > { %720 = vmatpush.bf16.msra.mxu0 %v2192_v14  ;;  %744 = vmatpush.bf16.msra.mxu2 %v2212_v38  ;;  %v2780_v3 = vld [vmem:[#allocation5 + $0xb4] sm:$0xf0]  ;;  %v2369_v8 = vld [vmem:[#allocation5 + $0x68] sm:$0xf0]  ;;  %v2344_v9 = vor.u32 %v2764_v0, %v2343_v63  ;;  %v2785_v10 = vld [vmem:[#allocation5 + $0xe4] sm:$0xf] }
  0x4f   : > { %733 = vmatpush.bf16.msra.mxu1 %v2256_v18  ;;  %757 = vmatpush.bf16.msra.mxu3 %v2276_v40  ;;  %v2433_v11 = vld [vmem:[#allocation5 + $0xe8] sm:$0xf0]  ;;  %v2408_v12 = vor.u32 %v2780_v3, %v2407_v2  ;;  %v2335_v13 = vld [vmem:[#allocation5 + $0x20] sm:$0xf]  ;;  %v2762_v14 = vld [vmem:[#allocation5 + $0x24] sm:$0xf0]  ;;  %v2372_v17 = vor.u32 %v2769_v7, %v2369_v8 }
  0x50   : > { %v2399_v15 = vld [vmem:[#allocation5 + $0xa0] sm:$0xf]  ;;  %v2778_v16 = vld [vmem:[#allocation5 + $0xa4] sm:$0xf0]  ;;  %v2436_v18 = vor.u32 %v2785_v10, %v2433_v11  ;;  %v2336_v21 = vor.u32 %v2762_v14, %v2335_v13  ;;  %v2783_v22 = vld [vmem:[#allocation5 + $0xd4] sm:$0xf] }
  0x51   : > { %721 = vmatmul.bf16.vlgmr.msra.gmra.mxu0 %v3400_v26  ;;  %v2425_v23 = vld [vmem:[#allocation5 + $0xd8] sm:$0xf0]  ;;  %v2400_v24 = vor.u32 %v2778_v16, %v2399_v15  ;;  %v2327_v25 = vld [vmem:[#allocation5 + $0x10] sm:$0xf]  ;;  %v2760_v27 = vld [vmem:[#allocation5 + $0x14] sm:$0xf0] }
  0x52   : > { %971 = vmatpush.bf16.msrb.mxu0 %v2376_v19  ;;  %734 = vmatmul.bf16.vlgmr.msra.gmra.mxu1 %v3402_v30  ;;  %v2767_v19 = vld [vmem:[#allocation5 + $0x54] sm:$0xf]  ;;  %v2391_v28 = vld [vmem:[#allocation5 + $0x90] sm:$0xf]  ;;  %v2776_v29 = vld [vmem:[#allocation5 + $0x94] sm:$0xf0]  ;;  %v2428_v32 = vor.u32 %v2783_v22, %v2425_v23 }
  0x53   : > { %984 = vmatpush.bf16.msrb.mxu1 %v2440_v20  ;;  %745 = vmatpush.bf16.msra.mxu2 %v2204_v51  ;;  %v2361_v20 = vld [vmem:[#allocation5 + $0x58] sm:$0xf0]  ;;  %v765_v35 = vld [vmem:[%s500_s12] sm:$0xff]  ;;  %v2417_v37 = vld [vmem:[#allocation5 + $0xc8] sm:$0xf0]  ;;  %v2392_v38 = vor.u32 %v2776_v29, %v2391_v28  ;;  %s3231_s17 = smov 96  }
  0x54   : > { %758 = vmatpush.bf16.msra.mxu3 %v2268_v52  ;;  %v2364_v31 = vor.u32 %v2767_v19, %v2361_v20  ;;  %v2781_v36 = vld [vmem:[#allocation5 + $0xc4] sm:$0xf]  ;;  %v2319_v39 = vld [vmem:[#allocation5] sm:$0xf]  ;;  %v2758_v40 = vld [vmem:[#allocation5 + $0x4] sm:$0xf0]  ;;  %v806_v50 = vunpack.c.h.b16 %v765_v35 }
  0x55   : > { %v2383_v41 = vld [vmem:[#allocation5 + $0x80] sm:$0xf]  ;;  %v2774_v42 = vld [vmem:[#allocation5 + $0x84] sm:$0xf0]  ;;  %v2503_v43 = vld [vmem:[#allocation7 + $0x70] sm:$0xf]  ;;  %v2420_v46 = vor.u32 %v2781_v36, %v2417_v37  ;;  %v2320_v49 = vor.u32 %v2758_v40, %v2319_v39 }
  0x56   : > { %972 = vmatpush.bf16.msrb.mxu0 %v2368_v33  ;;  %v2765_v33 = vld [vmem:[#allocation5 + $0x44] sm:$0xf]  ;;  %v2804_v44 = vld [vmem:[#allocation7 + $0x74] sm:$0xf0]  ;;  %v2345_v48 = vld [vmem:[#allocation5 + $0x38] sm:$0xf0]  ;;  %v2384_v53 = vor.u32 %v2774_v42, %v2383_v41 }
  0x57   : > { %985 = vmatpush.bf16.msrb.mxu1 %v2432_v34  ;;  %746 = vmatpush.bf16.msra.mxu2 %v2196_v1  ;;  %v2353_v34 = vld [vmem:[#allocation5 + $0x48] sm:$0xf0]  ;;  %v2779_v51 = vld [vmem:[#allocation5 + $0xb4] sm:$0xf]  ;;  %v2409_v52 = vld [vmem:[#allocation5 + $0xb8] sm:$0xf0]  ;;  %v2504_v54 = vor.u32 %v2804_v44, %v2503_v43 }
  0x58   : > { %759 = vmatpush.bf16.msra.mxu3 %v2260_v5  ;;  %v2495_v56 = vld [vmem:[#allocation7 + $0x60] sm:$0xf]  ;;  %v2802_v57 = vld [vmem:[#allocation7 + $0x64] sm:$0xf0]  ;;  %v2761_v60 = vld [vmem:[#allocation5 + $0x24] sm:$0xf] }
  0x59   : > { %v2337_v61 = vld [vmem:[#allocation5 + $0x28] sm:$0xf0]  ;;  %v2777_v63 = vld [vmem:[#allocation5 + $0xa4] sm:$0xf]  ;;  %v2496_v1 = vor.u32 %v2802_v57, %v2495_v56  ;;  %v2329_v5 = vld [vmem:[#allocation5 + $0x18] sm:$0xf0] }
  0x5a   : > { %973 = vmatpush.bf16.msrb.mxu0 %v2360_v45  ;;  %747 = vmatmul.bf16.vlgmr.msra.gmra.mxu2 %v3400_v26  ;;  %v2328_v26 = vor.u32 %v2760_v27, %v2327_v25  ;;  %v805_v45 = vunpack.c.l.b16 %v765_v35  ;;  %v2401_v0 = vld [vmem:[#allocation5 + $0xa8] sm:$0xf0]  ;;  %v2340_v2 = vor.u32 %v2761_v60, %v2337_v61  ;;  %v2393_v7 = vld [vmem:[#allocation5 + $0x98] sm:$0xf0]  ;;  %v2757_v10 = vld [vmem:[#allocation5 + $0x4] sm:$0xf] }
  0x5b   : > { %986 = vmatpush.bf16.msrb.mxu1 %v2424_v47  ;;  %997 = vmatpush.bf16.msrb.mxu2 %v2380_v4  ;;  %v2763_v47 = vld [vmem:[#allocation5 + $0x34] sm:$0xf]  ;;  %v2404_v3 = vor.u32 %v2777_v63, %v2401_v0  ;;  %v2321_v11 = vld [vmem:[#allocation5 + $0x8] sm:$0xf0]  ;;  %v2487_v16 = vld [vmem:[#allocation7 + $0x50] sm:$0xf] }
  0x5c   : > { %1010 = vmatpush.bf16.msrb.mxu3 %v2444_v6  ;;  %v2348_v55 = vor.u32 %v2763_v47, %v2345_v48  ;;  %v807_v58 = vpack.c.b16 %v805_v45, %v805_v45  ;;  %v2759_v4 = vld [vmem:[#allocation5 + $0x14] sm:$0xf]  ;;  %v2385_v13 = vld [vmem:[#allocation5 + $0x88] sm:$0xf0]  ;;  %v2324_v14 = vor.u32 %v2757_v10, %v2321_v11  ;;  %v2479_v19 = vld [vmem:[#allocation7 + $0x40] sm:$0xf] }
  0x5d   : > { %760 = vmatmul.bf16.vlgmr.msra.gmra.mxu3 %v3402_v30  ;;  %v2356_v30 = vor.u32 %v2765_v33, %v2353_v34  ;;  %v2775_v6 = vld [vmem:[#allocation5 + $0x94] sm:$0xf]  ;;  %v2332_v8 = vor.u32 %v2759_v4, %v2329_v5  ;;  %v2798_v20 = vld [vmem:[#allocation7 + $0x44] sm:$0xf0]  ;;  %v2471_v22 = vld [vmem:[#allocation7 + $0x30] sm:$0xf] }
  0x5e   : > { %974 = vmatpush.bf16.msrb.mxu0 %v2352_v59  ;;  %v2412_v59 = vor.u32 %v2779_v51, %v2409_v52  ;;  %v2796_v23 = vld [vmem:[#allocation7 + $0x34] sm:$0xf0]  ;;  %v2463_v25 = vld [vmem:[#allocation7 + $0x20] sm:$0xf]  ;;  %v2794_v27 = vld [vmem:[#allocation7 + $0x24] sm:$0xf0] }
  0x5f   : > { %987 = vmatpush.bf16.msrb.mxu1 %v2416_v62  ;;  %998 = vmatpush.bf16.msrb.mxu2 %v2372_v17  ;;  %v808_v62 = vpack.c.b16 %v806_v50, %v806_v50  ;;  %v2800_v17 = vld [vmem:[#allocation7 + $0x54] sm:$0xf0]  ;;  %v2464_v28 = vor.u32 %v2794_v27, %v2463_v25  ;;  %v2455_v29 = vld [vmem:[#allocation7 + $0x10] sm:$0xf]  ;;  %v3416_v33 = vld [vmem:[%s505_s4] sm:$0xff]  ;;  %vm1318_vm2 = vcmask 1043456  }
  0x60   : > { %1011 = vmatpush.bf16.msrb.mxu3 %v2436_v18  ;;  %v2488_v18 = vor.u32 %v2800_v17, %v2487_v16  ;;  %v2447_v34 = vld [vmem:[#allocation7] sm:$0xf]  ;;  %v1063_v35 = vunpack.c.l.b16 %v3416_v33  ;;  %v2505_v4 = vld [vmem:[#allocation7 + $0x78] sm:$0xf0]  ;;  %v2551_v5 = vld [vmem:[#allocation7 + $0xd0] sm:$0xf] }
  0x61   : > { %v3425_v43 = vld [vmem:[%s3582_s7] sm:$0x3]  ;;  %v2497_v10 = vld [vmem:[#allocation7 + $0x68] sm:$0xf0]  ;;  %v2819_v16 = vld [vmem:[#allocation7 + $0xf4] sm:$0xf] }
  0x62   : > { %975 = vmatpush.bf16.msrb.mxu0 %v2344_v9  ;;  %v2396_v9 = vor.u32 %v2775_v6, %v2393_v7  ;;  %v3419_v37 = vpack.c.b16 %v1063_v35, %v1063_v35  ;;  %v800_v44 = vperm.slane %v3425_v43, 0  ;;  %v540_v45 = vld [vmem:[%s3581_s6] sm:$0x3]  ;;  %v2816_v6 = vld [vmem:[#allocation7 + $0xd4] sm:$0xf0]  ;;  %vm1757_vm3 = vcmask 523264  }
  0x63   : > { %988 = vmatpush.bf16.msrb.mxu1 %v2408_v12  ;;  %999 = vmatpush.bf16.msrb.mxu2 %v2364_v31  ;;  %v2773_v12 = vld [vmem:[#allocation5 + $0x84] sm:$0xf]  ;;  %v2792_v31 = vld [vmem:[#allocation7 + $0x14] sm:$0xf0]  ;;  %v542_v48 = vperm.slane %v540_v45, 0  ;;  %v2552_v11 = vor.u32 %v2816_v6, %v2551_v5  ;;  %vm1759_vm4 = vcmask 785408  }
  0x64   : > { %1012 = vmatpush.bf16.msrb.mxu3 %v2428_v32  ;;  %v2388_v15 = vor.u32 %v2773_v12, %v2385_v13  ;;  %v2456_v32 = vor.u32 %v2792_v31, %v2455_v29  ;;  %v2559_v0 = vld [vmem:[#allocation7 + $0xe0] sm:$0xf]  ;;  %v2569_v17 = vld [vmem:[#allocation7 + $0xf8] sm:$0xf0]  ;;  %v2812_v25 = vld [vmem:[#allocation7 + $0xb4] sm:$0xf0] }
  0x65   : > { %v2543_v13 = vld [vmem:[#allocation7 + $0xc0] sm:$0xf]  ;;  %v2537_v5 = vld [vmem:[#allocation7 + $0xb8] sm:$0xf0]  ;;  %s488_s28 = sand.u32 1, %s3212_s18   ;;  %s2853_s22 = sshll.u32 %s3313_s21, 4 }
  0x66   : > { %976 = vmatpush.bf16.msrb.mxu0 %v2336_v21  ;;  %v2480_v21 = vor.u32 %v2798_v20, %v2479_v19  ;;  %v2799_v19 = vld [vmem:[#allocation7 + $0x54] sm:$0xf]  ;;  %v2489_v20 = vld [vmem:[#allocation7 + $0x58] sm:$0xf0]  ;;  %s2182_s29 = sshll.u32 %s488_s28, 4  ;;  %s2030_s14 = scalar_lea.hbm %s3586_s11, %s2853_s22 }
  0x67   : > { %989 = vmatpush.bf16.msrb.mxu1 %v2400_v24  ;;  %1000 = vmatpush.bf16.msrb.mxu2 %v2356_v30  ;;  %v2472_v24 = vor.u32 %v2796_v23, %v2471_v22  ;;  %s490_s24 = scalar_lea.vmem [#allocation11], %s2182_s29  ;;  %s2034_s13 = sshll.u32 %s2030_s14, 4  ;;  %s2035_s13 = int_to_ptr.hbm [resolvable:$true] %s2034_s13 }
  0x68   : > { %1013 = vmatpush.bf16.msrb.mxu3 %v2420_v46  ;;  %s2032_s4 = sshll.u32 %s490_s24, 4  ;;  %s2019_s21 = scalar_lea.sflag [#allocation4], %s488_s28  ;;  %s2033_s4 = int_to_ptr.vmem [resolvable:$true] %s2032_s4 }
  0x69   : > { %s3160_s25 = sshra.s32 %s2035_s13, 4  ;;  %s3161_s25 = int_to_ptr.hbm [resolvable:$true] %s3160_s25 }
  0x6a   : > { %977 = vmatpush.bf16.msrb.mxu0 %v2328_v26  ;;  %v2790_v26 = vld [vmem:[#allocation7 + $0x4] sm:$0xf0]  ;;  %s3162_s9 = scalar_lea.hbm %s3161_s25, 16  ;;  %p3167_p3 = scmp.lt.s32.totalorder %s3161_s25, %s3586_s11 }
  0x6b   : > { %990 = vmatpush.bf16.msrb.mxu1 %v2392_v38  ;;  %1001 = vmatpush.bf16.msrb.mxu2 %v2348_v55  ;;  %v2448_v36 = vor.u32 %v2790_v26, %v2447_v34  ;;  %v2481_v34 = vld [vmem:[#allocation7 + $0x48] sm:$0xf0]  ;;  %p3163_p0 = scmp.ne.s32.totalorder %s3161_s25, %s3162_s9 }
  0x6c   : > { %1014 = vmatpush.bf16.msrb.mxu3 %v2412_v59  ;;  %v543_v59 = vperm.slane %v540_v45, 1  ;;  %v2795_v45 = vld [vmem:[#allocation7 + $0x34] sm:$0xf] }
  0x6d   : > { %p3164_p1 = pnand %p3163_p0, %p3330_p5 }
  0x6e   : > { %978 = vmatpush.bf16.msrb.mxu0 %v2320_v49 }
  0x6f   : > { %991 = vmatpush.bf16.msrb.mxu1 %v2384_v53  ;;  %1002 = vmatpush.bf16.msrb.mxu2 %v2340_v2  ;;  %v2567_v53 = vld [vmem:[#allocation7 + $0xf0] sm:$0xf]  ;;  %v2803_v2 = vld [vmem:[#allocation7 + $0x74] sm:$0xf]  ;;  %p3165_p2 = pneg %p3164_p1 }
  0x70   : > { %1015 = vmatpush.bf16.msrb.mxu3 %v2404_v3 }
  0x71   : > { %979 = vmatmul.bf16.vlgmr.msrb.gmra.mxu0 %v807_v58 }
  0x72   : > { %1229 = vmatpush.bf16.msra.mxu0 %v2504_v54  ;;  %992 = vmatmul.bf16.vlgmr.msrb.gmra.mxu1 %v808_v62  ;;  %v2820_v54 = vld [vmem:[#allocation7 + $0xf4] sm:$0xf0] }
  0x73   : > { %1003 = vmatpush.bf16.msrb.mxu2 %v2332_v8  ;;  %v2568_v55 = vor.u32 %v2820_v54, %v2567_v53  ;;  %v2508_v8 = vor.u32 %v2803_v2, %v2505_v4  ;;  %v2465_v53 = vld [vmem:[#allocation7 + $0x28] sm:$0xf0]  ;;  %v2815_v54 = vld [vmem:[#allocation7 + $0xd4] sm:$0xf] }
  0x74   : > { %1016 = vmatpush.bf16.msrb.mxu3 %v2396_v9  ;;  %v2801_v9 = vld [vmem:[#allocation7 + $0x64] sm:$0xf]  ;;  %v2811_v4 = vld [vmem:[#allocation7 + $0xb4] sm:$0xf] }
  0x75   : > { %1242 = vmatpush.bf16.msra.mxu1 %v2568_v55  ;;  %v2553_v55 = vld [vmem:[#allocation7 + $0xd8] sm:$0xf0] }
  0x76   : > { %1230 = vmatpush.bf16.msra.mxu0 %v2496_v1  ;;  %v2818_v1 = vld [vmem:[#allocation7 + $0xe4] sm:$0xf0] }
  0x77   : > { %1004 = vmatpush.bf16.msrb.mxu2 %v2324_v14  ;;  %v2560_v3 = vor.u32 %v2818_v1, %v2559_v0  ;;  %v2814_v14 = vld [vmem:[#allocation7 + $0xc4] sm:$0xf0]  ;;  %v2813_v0 = vld [vmem:[#allocation7 + $0xc4] sm:$0xf]  ;;  %v2545_v1 = vld [vmem:[#allocation7 + $0xc8] sm:$0xf0] }
  0x78   : > { %1017 = vmatpush.bf16.msrb.mxu3 %v2388_v15  ;;  %v2500_v15 = vor.u32 %v2801_v9, %v2497_v10  ;;  %v2544_v22 = vor.u32 %v2814_v14, %v2543_v13  ;;  %v2540_v9 = vor.u32 %v2811_v4, %v2537_v5  ;;  %v2809_v10 = vld [vmem:[#allocation7 + $0xa4] sm:$0xf]  ;;  %v2807_v13 = vld [vmem:[#allocation7 + $0x94] sm:$0xf]  ;;  %v2521_v14 = vld [vmem:[#allocation7 + $0x98] sm:$0xf0] }
  0x79   : > { %1243 = vmatpush.bf16.msra.mxu1 %v2560_v3  ;;  %v2548_v3 = vor.u32 %v2813_v0, %v2545_v1 }
  0x7a   : > { %1005 = vmatmul.bf16.vlgmr.msrb.gmra.mxu2 %v807_v58  ;;  %1231 = vmatpush.bf16.msra.mxu0 %v2488_v18  ;;  %v801_v18 = vperm.slane %v3425_v43, 1  ;;  %v2817_v43 = vld [vmem:[#allocation7 + $0xe4] sm:$0xf] }
  0x7b   : > { %1018 = vmatmul.bf16.vlgmr.msrb.gmra.mxu3 %v808_v62  ;;  %1255 = vmatpush.bf16.msra.mxu2 %v2508_v8  ;;  %v2449_v8 = vld [vmem:[#allocation7 + $0x8] sm:$0xf0] }
  0x7d   : > { %1244 = vmatpush.bf16.msra.mxu1 %v2552_v11  ;;  %v2529_v11 = vld [vmem:[#allocation7 + $0xa8] sm:$0xf0] }
  0x7e   : > { %1232 = vmatpush.bf16.msra.mxu0 %v2480_v21  ;;  %v2572_v21 = vor.u32 %v2819_v16, %v2569_v17  ;;  %v2805_v16 = vld [vmem:[#allocation7 + $0x84] sm:$0xf]  ;;  %v2513_v17 = vld [vmem:[#allocation7 + $0x88] sm:$0xf0] }
  0x7f   : > { %1256 = vmatpush.bf16.msra.mxu2 %v2500_v15  ;;  %v2524_v15 = vor.u32 %v2807_v13, %v2521_v14 }
  0x80   : > { %1268 = vmatpush.bf16.msra.mxu3 %v2572_v21 }
  0x81   : > { %1245 = vmatpush.bf16.msra.mxu1 %v2544_v22 }
  0x82   : > { %1233 = vmatpush.bf16.msra.mxu0 %v2472_v24  ;;  %v2535_v24 = vld [vmem:[#allocation7 + $0xb0] sm:$0xf] }
  0x83   : > { %v2536_v26 = vor.u32 %v2812_v25, %v2535_v24 }
  0x85   : > { %1246 = vmatpush.bf16.msra.mxu1 %v2536_v26 }
  0x86   : > { %1234 = vmatpush.bf16.msra.mxu0 %v2464_v28  ;;  %v2492_v28 = vor.u32 %v2799_v19, %v2489_v20 }
  0x88   : > { %1257 = vmatpush.bf16.msra.mxu2 %v2492_v28 }
  0x8a   : > { %1235 = vmatpush.bf16.msra.mxu0 %v2456_v32  ;;  %v2797_v32 = vld [vmem:[#allocation7 + $0x44] sm:$0xf] }
  0x8e   : > { %1236 = vmatpush.bf16.msra.mxu0 %v2448_v36  ;;  %v2527_v36 = vld [vmem:[#allocation7 + $0xa0] sm:$0xf] }
  0x91   : > { %1237 = vmatmul.bf16.vlgmr.msra.gmra.mxu0 %v3419_v37 }
  0xce   : > { %v722_v38 = vpop.f32.mrf.mxu0 }
  0xcf   : > { %v735_v39 = vpop.f32.mrf.mxu1  ;;  %v723_v56 = vadd.f32 %v722_v38, %v542_v48  ;;  %v2810_v38 = vld [vmem:[#allocation7 + $0xa4] sm:$0xf0] }
  0xd1   : > { %v736_v61 = vadd.f32 %v735_v39, %v723_v56  ;;  %v2484_v39 = vor.u32 %v2797_v32, %v2481_v34 }
  0xd3   : > { %v1281_v7 = vpack.c.bf16 %v736_v61, %v736_v61  ;;  %1258 = vmatpush.bf16.msra.mxu2 %v2484_v39 }
  0xd6   : > { %v724_v40 = vpop.f32.mrf.mxu0 }
  0xd7   : > { %v737_v41 = vpop.f32.mrf.mxu1 }
  0xd8   : > { %v2528_v41 = vor.u32 %v2810_v38, %v2527_v36 }
  0xda   : > { %1247 = vmatpush.bf16.msra.mxu1 %v2528_v41 }
  0xdd   : > { %v748_v42 = vpop.f32.mrf.mxu2 }
  0xde   : > { %v749_v63 = vadd.f32 %v748_v42, %v543_v59  ;;  %v2806_v59 = vld [vmem:[#allocation7 + $0x84] sm:$0xf0] }
  0xe0   : > { %v761_v30 = vpop.f32.mrf.mxu3 }
  0xe1   : > { %v762_v12 = vadd.f32 %v761_v30, %v749_v63  ;;  %v2457_v63 = vld [vmem:[#allocation7 + $0x18] sm:$0xf0] }
  0xe3   : > { %v3439_v23 = vpack.c.bf16 %v762_v12, %v762_v12  ;;  %v2532_v12 = vor.u32 %v2809_v10, %v2529_v11 }
  0xe5   : > { %v750_v47 = vpop.f32.mrf.mxu2 }
  0xe8   : > { %v763_v51 = vpop.f32.mrf.mxu3 }
  0xe9   : > { %v2793_v51 = vld [vmem:[#allocation7 + $0x24] sm:$0xf] }
  0xea   : > { %v2468_v56 = vor.u32 %v2793_v51, %v2465_v53 }
  0xee   : > { %v980_v46 = vpop.f32.mrf.mxu0 }
  0xef   : > { %v981_v49 = vadd.f32 %v980_v46, %v800_v44  ;;  %v993_v50 = vpop.f32.mrf.mxu1  ;;  %v2561_v44 = vld [vmem:[#allocation7 + $0xe8] sm:$0xf0]  ;;  %v2473_v46 = vld [vmem:[#allocation7 + $0x38] sm:$0xf0] }
  0xf0   : > { %v2564_v47 = vor.u32 %v2817_v43, %v2561_v44  ;;  %v2476_v48 = vor.u32 %v2795_v45, %v2473_v46  ;;  %v1056_v45 = vld [vmem:[%s3583_s8] sm:$0x3] }
  0xf1   : > { %v994_v52 = vadd.f32 %v993_v50, %v981_v49  ;;  %v2519_v49 = vld [vmem:[#allocation7 + $0x90] sm:$0xf]  ;;  %v2808_v50 = vld [vmem:[#allocation7 + $0x94] sm:$0xf0]  ;;  %v1058_v46 = vperm.slane %v1056_v45, 0  ;;  %v1059_v53 = vperm.slane %v1056_v45, 1 }
  0xf2   : > { %1269 = vmatpush.bf16.msra.mxu3 %v2564_v47  ;;  %1259 = vmatpush.bf16.msra.mxu2 %v2476_v48 }
  0xf3   : > { %v1282_v57 = vpack.c.bf16 %v994_v52, %v994_v52  ;;  %v2520_v52 = vor.u32 %v2808_v50, %v2519_v49 }
  0xf5   : > { %1398 = vrot.lane.b32.xlu2 %v1282_v57, %s3229_s16  ;;  %1454 = vrot.lane.b32.xlu1 %v1282_v57, %s3230_s19  ;;  %v1289_v58 = vsel %vm1284_vm0, %v1282_v57, 0 }
  0xf6   : > { %1341 = vrot.lane.b32.xlu0 %v1282_v57, %s3231_s17  ;;  %v982_v60 = vpop.f32.mrf.mxu0  ;;  %1298 = vmatpush.bf16.xpose.msrb.mxu0 %v1289_v58  ;;  %v2556_v57 = vor.u32 %v2815_v54, %v2553_v55  ;;  %v2511_v58 = vld [vmem:[#allocation7 + $0x80] sm:$0xf] }
  0xf7   : > { %v995_v62 = vpop.f32.mrf.mxu1  ;;  %v1064_v60 = vunpack.c.h.b16 %v3416_v33  ;;  %1248 = vmatpush.bf16.msra.mxu1 %v2520_v52  ;;  %v2512_v61 = vor.u32 %v2806_v59, %v2511_v58  ;;  %1260 = vmatpush.bf16.msra.mxu2 %v2468_v56 }
  0xf8   : > { %v2791_v62 = vld [vmem:[#allocation7 + $0x14] sm:$0xf]  ;;  %1270 = vmatpush.bf16.msra.mxu3 %v2556_v57 }
  0xf9   : > { %v2460_v2 = vor.u32 %v2791_v62, %v2457_v63  ;;  %v1066_v6 = vpack.c.b16 %v1064_v60, %v1064_v60 }
  0xfb   : > { %1249 = vmatpush.bf16.msra.mxu1 %v2512_v61  ;;  %1261 = vmatpush.bf16.msra.mxu2 %v2460_v2 }
  0xfc   : > { %1271 = vmatpush.bf16.msra.mxu3 %v2548_v3 }
  0xfd   : > { %1452 = vrot.lane.b32.xlu1 %v1281_v7, %s3230_s19  ;;  %2573 = vmatmul.msk.bf16.vlgmr.msrb.gmra.mxu0 %vm1284_vm0, %v1281_v7  ;;  %v1006_v27 = vpop.f32.mrf.mxu2 }
  0xfe   : > { %1338 = vrot.lane.b32.xlu0 %v1281_v7, %s3231_s17  ;;  %v1007_v29 = vadd.f32 %v1006_v27, %v801_v18  ;;  %v1019_v31 = vpop.f32.mrf.mxu3  ;;  %1250 = vmatmul.bf16.vlgmr.msra.gmra.mxu1 %v1066_v6  ;;  %v2516_v18 = vor.u32 %v2805_v16, %v2513_v17 }
 0x100   : > { %v1020_v35 = vadd.f32 %v1019_v31, %v1007_v29  ;;  %1272 = vmatpush.bf16.msra.mxu3 %v2540_v9 }
 0x102   : > { %v3444_v40 = vpack.c.bf16 %v1020_v35, %v1020_v35 }
 0x104   : > { %1565 = vrot.lane.b32.xlu2 %v3444_v40, %s3231_s17  ;;  %1273 = vmatpush.bf16.msra.mxu3 %v2532_v12  ;;  %v1515_v21 = vsel %vm1284_vm0, %v3444_v40, 0 }
 0x105   : > { %1562 = vrot.lane.b32.xlu1 %v3439_v23, %s3231_s17  ;;  %v1008_v42 = vpop.f32.mrf.mxu2 }
 0x106   : > { %1396 = vrot.lane.b32.xlu0 %v1281_v7, %s3229_s16  ;;  %v1021_v30 = vpop.f32.mrf.mxu3  ;;  %v2789_v7 = vld [vmem:[#allocation7 + $0x4] sm:$0xf] }
 0x107   : > { %v2452_v33 = vor.u32 %v2789_v7, %v2449_v8 }
 0x108   : > { %1274 = vmatpush.bf16.msra.mxu3 %v2524_v15 }
 0x109   : > { %1262 = vmatpush.bf16.msra.mxu2 %v2452_v33 }
 0x10c   : > { %1678 = vrot.lane.b32.xlu2 %v3444_v40, %s3230_s19  ;;  %1263 = vmatmul.bf16.vlgmr.msra.gmra.mxu2 %v3419_v37 }
 0x10d   : > { %1622 = vrot.lane.b32.xlu1 %v3444_v40, %s3229_s16  ;;  %1275 = vmatpush.bf16.msra.mxu3 %v2516_v18 }
 0x10e   : > { %1676 = vrot.lane.b32.xlu0 %v3439_v23, %s3230_s19  ;;  %v1238_v19 = vpop.f32.mrf.mxu0 }
 0x10f   : > { %v1239_v47 = vadd.f32 %v1238_v19, %v1058_v46 }
 0x110   : > { %1276 = vmatmul.bf16.vlgmr.msra.gmra.mxu3 %v1066_v6 }
 0x114   : > { %1620 = vrot.lane.b32.xlu2 %v3439_v23, %s3229_s16 }
 0x116   : > { %v1240_v24 = vpop.f32.mrf.mxu0 }
 0x14f   : > { %v1399_v20 = vpop.permute.xlu2 %1398 }
 0x150   : > { %v1404_v22 = vsel %vm1284_vm0, %v1399_v20, 0 }
 0x151   : > { %1413 = vmatpush.bf16.xpose.msra.mxu0 %v1404_v22 }
 0x159   : > { %1524 = vmatpush.bf16.xpose.msrb.mxu0 %v1515_v21 }
 0x15e   : > { %v1566_v29 = vpop.permute.xlu2 %1565 }
 0x15f   : > { %v1571_v32 = vsel %vm1284_vm0, %v1566_v29, 0 }
 0x166   : > { %v1679_v39 = vpop.permute.xlu2 %1678 }
 0x167   : > { %v1455_v25 = vpop.permute.xlu1 %1454  ;;  %v1684_v40 = vsel %vm1284_vm0, %v1679_v39, 0 }
 0x168   : > { %v1460_v37 = vsel %vm1284_vm0, %v1455_v25, 0  ;;  %v1342_v27 = vpop.permute.xlu0 %1341 }
 0x169   : > { %v1347_v28 = vsel %vm1284_vm0, %v1342_v27, 0 }
 0x16a   : > { %1356 = vmatpush.bf16.xpose.msrb.mxu2 %v1347_v28 }
 0x16e   : > { %v1621_v43 = vpop.permute.xlu2 %1620 }
 0x16f   : > { %v1453_v31 = vpop.permute.xlu1 %1452 }
 0x170   : > { %v1339_v34 = vpop.permute.xlu0 %1338 }
 0x171   : > { %2575 = vmatmul.msk.bf16.vlgmr.msrb.gmra.mxu2 %vm1284_vm0, %v1339_v34 }
 0x172   : > { %1469 = vmatpush.bf16.xpose.msra.mxu2 %v1460_v37 }
 0x177   : > { %v1563_v26 = vpop.permute.xlu1 %1562 }
 0x178   : > { %v1397_v35 = vpop.permute.xlu0 %1396 }
 0x179   : > { %2577 = vmatmul.msk.bf16.vlgmr.msra.gmra.mxu0 %vm1284_vm0, %v1397_v35 }
 0x17a   : > { %1580 = vmatpush.bf16.xpose.msrb.mxu2 %v1571_v32  ;;  %v1300_v36 = vpop.f32.mrf.mxu0 }
 0x17b   : > { %v1305_v38 = vsel %vm1304_vm1, %v1300_v36, -inf  ;;  %v1251_v48 = vpop.f32.mrf.mxu1 }
 0x17c   : > { %1306 = vmax.xlane.f32.xlu1 %v1305_v38  ;;  %v1252_v49 = vadd.f32 %v1251_v48, %v1239_v47 }
 0x17e   : > { %v1283_v50 = vpack.c.bf16 %v1252_v49, %v1252_v49 }
 0x17f   : > { %v1623_v41 = vpop.permute.xlu1 %1622 }
 0x180   : > { %v1628_v42 = vsel %vm1284_vm0, %v1623_v41, 0  ;;  %v1677_v44 = vpop.permute.xlu0 %1676  ;;  %1373 = vrot.lane.b32.xlu2 %v1283_v50, %s3231_s17 }
 0x181   : > { %2579 = vmatmul.msk.bf16.vlgmr.msra.gmra.mxu2 %vm1284_vm0, %v1453_v31  ;;  %1637 = vmatpush.bf16.xpose.msra.mxu0 %v1628_v42 }
 0x182   : > { %v1302_v30 = vpop.f32.mrf.mxu0  ;;  %1693 = vmatpush.bf16.xpose.msra.mxu2 %v1684_v40 }
 0x183   : > { %v1253_v51 = vpop.f32.mrf.mxu1 }
 0x189   : > { %2581 = vmatmul.msk.bf16.vlgmr.msrb.gmra.mxu0 %vm1284_vm0, %v3439_v23  ;;  %v1320_v23 = vsel %vm1318_vm2, %v1283_v50, 0 }
 0x18a   : > { %1329 = vmatpush.bf16.msrb.mxu1 %v1320_v23 }
 0x18f   : > { %v1264_v52 = vpop.f32.mrf.mxu2 }
 0x190   : > { %v1265_v54 = vadd.f32 %v1264_v52, %v1059_v53 }
 0x191   : > { %2583 = vmatmul.msk.bf16.vlgmr.msrb.gmra.mxu2 %vm1284_vm0, %v1563_v26 }
 0x193   : > { %v1277_v56 = vpop.f32.mrf.mxu3 }
 0x194   : > { %v1278_v57 = vadd.f32 %v1277_v56, %v1265_v54 }
 0x195   : > { %1485 = vrot.lane.b32.xlu1 %v1283_v50, %s3230_s19 }
 0x196   : > { %v1510_v15 = vpack.c.bf16 %v1278_v57, %v1278_v57 }
 0x197   : > { %v1266_v55 = vpop.f32.mrf.mxu2 }
 0x198   : > { %v1544_v46 = vsel %vm1318_vm2, %v1510_v15, 0 }
 0x199   : > { %2585 = vmatmul.msk.bf16.vlgmr.msra.gmra.mxu0 %vm1284_vm0, %v1621_v43 }
 0x19b   : > { %v1279_v58 = vpop.f32.mrf.mxu3 }
 0x1a1   : > { %2587 = vmatmul.msk.bf16.vlgmr.msra.gmra.mxu2 %vm1284_vm0, %v1677_v44 }
 0x1da   : > { %v1374_v13 = vpop.permute.xlu2 %1373 }
 0x1db   : > { %v1379_v14 = vsel %vm1318_vm2, %v1374_v13, 0 }
 0x1dc   : > { %1388 = vmatpush.bf16.msrb.mxu3 %v1379_v14 }
 0x1ef   : > { %v1307_v59 = vpop.xlane.xlu1 %1306 }
 0x1f0   : > { %v1308_v60 = vsub.f32 %v1300_v36, %v1307_v59 }
 0x1f2   : > { %v1309_v61 = vmul.f32 1.442695, %v1308_v60 }
 0x1f4   : > { %2964 = vpow2.f32 %v1309_v61  ;;  %v1358_v62 = vpop.f32.mrf.mxu2 }
 0x1f5   : > { %v1362_v5 = vsel %vm1304_vm1, %v1358_v62, -inf }
 0x1f6   : > { %v1415_v63 = vpop.f32.mrf.mxu0 }
 0x1f7   : > { %v1419_v0 = vsel %vm1304_vm1, %v1415_v63, -inf }
 0x1f8   : > { %1420 = vmax.xlane.f32.xlu0 %v1419_v0 }
 0x1fa   : > { %v3482_v1 = vpop.eup %2964 }
 0x1fb   : > { %v1314_v2 = vpack.c.bf16 %v3482_v1, %v3482_v1  ;;  %v1311_v51 = vsel %vm1304_vm1, %v3482_v1, 0.0 }
 0x1fc   : > { %v1360_v3 = vpop.f32.mrf.mxu2 }
 0x1fd   : > { %2574 = vmatmul.msk.bf16.vlgmr.msrb.gmra.mxu1 %vm1304_vm1, %v1314_v2 }
 0x1fe   : > { %v1417_v4 = vpop.f32.mrf.mxu0 }
 0x200   : > { %1363 = vmax.xlane.f32.xlu0 %v1362_v5 }
 0x204   : > { %v1471_v6 = vpop.f32.mrf.mxu2 }
 0x205   : > { %v1475_v7 = vsel %vm1304_vm1, %v1471_v6, -inf }
 0x206   : > { %1476 = vmax.xlane.f32.xlu2 %v1475_v7  ;;  %v1526_v8 = vpop.f32.mrf.mxu0 }
 0x207   : > { %v1530_v9 = vsel %vm1304_vm1, %v1526_v8, -inf  ;;  %v1486_v21 = vpop.permute.xlu1 %1485 }
 0x208   : > { %1531 = vmax.xlane.f32.xlu0 %v1530_v9  ;;  %v1491_v22 = vsel %vm1318_vm2, %v1486_v21, 0 }
 0x209   : > { %1500 = vmatpush.bf16.msra.mxu3 %v1491_v22 }
 0x20c   : > { %v1473_v33 = vpop.f32.mrf.mxu2 }
 0x20e   : > { %v1528_v10 = vpop.f32.mrf.mxu0 }
 0x214   : > { %v3490_v11 = vpop.f32.mrf.mxu2 }
 0x215   : > { %v1586_v24 = vsel %vm1304_vm1, %v3490_v11, -inf }
 0x216   : > { %v3492_v12 = vpop.f32.mrf.mxu0 }
 0x217   : > { %v1643_v25 = vsel %vm1304_vm1, %v3492_v12, -inf }
 0x21c   : > { %v1584_v16 = vpop.f32.mrf.mxu2  ;;  %1597 = vrot.lane.b32.xlu0 %v1510_v15, %s3231_s17 }
 0x21e   : > { %1429 = vrot.lane.b32.xlu2 %v1283_v50, %s3229_s16  ;;  %v1641_v17 = vpop.f32.mrf.mxu0 }
 0x224   : > { %v3497_v18 = vpop.f32.mrf.mxu2 }
 0x225   : > { %v1699_v19 = vsel %vm1304_vm1, %v3497_v18, -inf }
 0x226   : > { %1700 = vmax.xlane.f32.xlu1 %v1699_v19 }
 0x22c   : > { %v1697_v20 = vpop.f32.mrf.mxu2 }
 0x246   : > { %1587 = vmax.xlane.f32.xlu0 %v1586_v24 }
 0x247   : > { %1644 = vmax.xlane.f32.xlu2 %v1643_v25 }
 0x25a   : > { %1709 = vrot.lane.b32.xlu0 %v1510_v15, %s3230_s19 }
 0x262   : > { %1653 = vrot.lane.b32.xlu0 %v1510_v15, %s3229_s16 }
 0x26b   : > { %v1421_v37 = vpop.xlane.xlu0 %1420 }
 0x26c   : > { %v1422_v27 = vsub.f32 %v1415_v63, %v1421_v37 }
 0x26e   : > { %v1423_v28 = vmul.f32 1.442695, %v1422_v27 }
 0x270   : > { %2966 = vpow2.f32 %v1423_v28 }
 0x273   : > { %v1364_v29 = vpop.xlane.xlu0 %1363 }
 0x274   : > { %v1365_v31 = vsub.f32 %v1358_v62, %v1364_v29 }
 0x276   : > { %v2967_v32 = vpop.eup %2966  ;;  %v1366_v34 = vmul.f32 1.442695, %v1365_v31 }
 0x277   : > { %v1425_v26 = vsel %vm1304_vm1, %v2967_v32, 0.0  ;;  %v1428_v48 = vpack.c.bf16 %v2967_v32, %v2967_v32 }
 0x278   : > { %2968 = vpow2.f32 %v1366_v34  ;;  %1426 = vadd.xlane.f32.xlu2 %v1425_v26 }
 0x279   : > { %v1477_v35 = vpop.xlane.xlu2 %1476 }
 0x27a   : > { %v1478_v36 = vsub.f32 %v1471_v6, %v1477_v35  ;;  %v3509_v38 = vpop.f32.mrf.mxu1 }
 0x27b   : > { %v1532_v42 = vpop.xlane.xlu0 %1531 }
 0x27c   : > { %v1479_v39 = vmul.f32 1.442695, %v1478_v36  ;;  %v1533_v45 = vsub.f32 %v1526_v8, %v1532_v42 }
 0x27e   : > { %v2969_v40 = vpop.eup %2968  ;;  %2970 = vpow2.f32 %v1479_v39  ;;  %v1534_v50 = vmul.f32 1.442695, %v1533_v45 }
 0x27f   : > { %v1371_v41 = vpack.c.bf16 %v2969_v40, %v2969_v40  ;;  %v1368_v23 = vsel %vm1304_vm1, %v2969_v40, 0.0 }
 0x280   : > { %2972 = vpow2.f32 %v1534_v50 }
 0x281   : > { %v1430_v30 = vpop.permute.xlu2 %1429  ;;  %2576 = vmatmul.msk.bf16.vlgmr.msrb.gmra.mxu3 %vm1304_vm1, %v1371_v41 }
 0x282   : > { %v1435_v43 = vsel %vm1318_vm2, %v1430_v30, 0  ;;  %v1333_v44 = vpop.f32.mrf.mxu1 }
 0x283   : > { %1444 = vmatpush.bf16.msra.mxu1 %v1435_v43 }
 0x284   : > { %v2971_v47 = vpop.eup %2970 }
 0x285   : > { %v1481_v49 = vsel %vm1304_vm1, %v2971_v47, 0.0  ;;  %v1484_v53 = vpack.c.bf16 %v2971_v47, %v2971_v47 }
 0x286   : > { %2578 = vmatmul.msk.bf16.vlgmr.msra.gmra.mxu1 %vm1304_vm1, %v1428_v48  ;;  %1482 = vadd.xlane.f32.xlu2 %v1481_v49  ;;  %v2973_v55 = vpop.eup %2972 }
 0x287   : > { %1553 = vmatpush.bf16.msrb.mxu1 %v1544_v46  ;;  %v1539_v56 = vpack.c.bf16 %v2973_v55, %v2973_v55  ;;  %v1536_v14 = vsel %vm1304_vm1, %v2973_v55, 0.0 }
 0x28c   : > { %1369 = vadd.xlane.f32.xlu0 %v1368_v23 }
 0x28e   : > { %v1598_v52 = vpop.permute.xlu0 %1597  ;;  %1312 = vadd.xlane.f32.xlu2 %v1311_v51 }
 0x28f   : > { %v1603_v54 = vsel %vm1318_vm2, %v1598_v52, 0  ;;  %v2647_v52 = vld [vmem:[#allocation8 + $0x70] sm:$0xf] }
 0x290   : > { %1612 = vmatpush.bf16.msrb.mxu3 %v1603_v54  ;;  %v2711_v54 = vld [vmem:[#allocation8 + $0xf0] sm:$0xf] }
 0x291   : > { %2580 = vmatmul.msk.bf16.vlgmr.msra.gmra.mxu3 %vm1304_vm1, %v1484_v53  ;;  %v2836_v53 = vld [vmem:[#allocation8 + $0x74] sm:$0xf0] }
 0x292   : > { %v2648_v55 = vor.u32 %v2836_v53, %v2647_v52  ;;  %v2842_v53 = vld [vmem:[#allocation8 + $0xa4] sm:$0xf0] }
 0x294   : > { %1964 = vmatpush.bf16.msrb.mxu0 %v2648_v55  ;;  %v2609_v55 = vld [vmem:[#allocation8 + $0x28] sm:$0xf0] }
 0x296   : > { %2582 = vmatmul.msk.bf16.vlgmr.msrb.gmra.mxu1 %vm1304_vm1, %v1539_v56  ;;  %v2852_v56 = vld [vmem:[#allocation8 + $0xf4] sm:$0xf0] }
 0x299   : > { %v1701_v63 = vpop.xlane.xlu1 %1700 }
 0x29a   : > { %v1702_v1 = vsub.f32 %v3497_v18, %v1701_v63  ;;  %v2639_v63 = vld [vmem:[#allocation8 + $0x60] sm:$0xf] }
 0x29c   : > { %v1703_v5 = vmul.f32 1.442695, %v1702_v1  ;;  %v2834_v1 = vld [vmem:[#allocation8 + $0x64] sm:$0xf0] }
 0x2b9   : > { %v1588_v57 = vpop.xlane.xlu0 %1587 }
 0x2ba   : > { %v1589_v58 = vsub.f32 %v3490_v11, %v1588_v57  ;;  %v1645_v59 = vpop.xlane.xlu2 %1644  ;;  %v2835_v57 = vld [vmem:[#allocation8 + $0x74] sm:$0xf] }
 0x2bb   : > { %v1646_v60 = vsub.f32 %v3492_v12, %v1645_v59  ;;  %v2712_v59 = vor.u32 %v2852_v56, %v2711_v54  ;;  %v2825_v54 = vld [vmem:[#allocation8 + $0x24] sm:$0xf] }
 0x2bc   : > { %v1590_v61 = vmul.f32 1.442695, %v1589_v58  ;;  %v2649_v58 = vld [vmem:[#allocation8 + $0x78] sm:$0xf0]  ;;  %v2841_v56 = vld [vmem:[#allocation8 + $0xa4] sm:$0xf] }
 0x2bd   : > { %v1647_v62 = vmul.f32 1.442695, %v1646_v60  ;;  %v2652_v60 = vor.u32 %v2835_v57, %v2649_v58  ;;  %v2673_v57 = vld [vmem:[#allocation8 + $0xa8] sm:$0xf0] }
 0x2be   : > { %2974 = vpow2.f32 %v1590_v61  ;;  %v2851_v61 = vld [vmem:[#allocation8 + $0xf4] sm:$0xf] }
 0x2bf   : > { %2976 = vpow2.f32 %v1647_v62  ;;  %v2713_v62 = vld [vmem:[#allocation8 + $0xf8] sm:$0xf0]  ;;  %1990 = vmatpush.bf16.msrb.mxu2 %v2652_v60  ;;  %v2612_v60 = vor.u32 %v2825_v54, %v2609_v55 }
 0x2c0   : > { %2978 = vpow2.f32 %v1703_v5 }
 0x2c4   : > { %v2975_v0 = vpop.eup %2974 }
 0x2c5   : > { %v2977_v2 = vpop.eup %2976  ;;  %v1595_v3 = vpack.c.bf16 %v2975_v0, %v2975_v0  ;;  %v1592_v8 = vsel %vm1304_vm1, %v2975_v0, 0.0  ;;  %v2716_v0 = vor.u32 %v2851_v61, %v2713_v62  ;;  %v2676_v61 = vor.u32 %v2841_v56, %v2673_v57  ;;  %v2599_v62 = vld [vmem:[#allocation8 + $0x10] sm:$0xf] }
 0x2c6   : > { %v1649_v4 = vsel %vm1304_vm1, %v2977_v2, 0.0  ;;  %v2979_v9 = vpop.eup %2978  ;;  %v1652_v13 = vpack.c.bf16 %v2977_v2, %v2977_v2  ;;  %v2703_v2 = vld [vmem:[#allocation8 + $0xe0] sm:$0xf] }
 0x2c7   : > { %2584 = vmatmul.msk.bf16.vlgmr.msrb.gmra.mxu3 %vm1304_vm1, %v1595_v3  ;;  %1650 = vadd.xlane.f32.xlu1 %v1649_v4  ;;  %v1708_v10 = vpack.c.bf16 %v2979_v9, %v2979_v9  ;;  %v1705_v12 = vsel %vm1304_vm1, %v2979_v9, 0.0  ;;  %v2850_v3 = vld [vmem:[#allocation8 + $0xe4] sm:$0xf0]  ;;  %v2640_v4 = vor.u32 %v2834_v1, %v2639_v63  ;;  %v2824_v63 = vld [vmem:[#allocation8 + $0x14] sm:$0xf0] }
 0x2c8   : > { %v2704_v5 = vor.u32 %v2850_v3, %v2703_v2  ;;  %v2600_v1 = vor.u32 %v2824_v63, %v2599_v62  ;;  %v2840_v2 = vld [vmem:[#allocation8 + $0x94] sm:$0xf0]  ;;  %v2823_v3 = vld [vmem:[#allocation8 + $0x14] sm:$0xf] }
 0x2c9   : > { %1965 = vmatpush.bf16.msrb.mxu0 %v2640_v4  ;;  %v2601_v4 = vld [vmem:[#allocation8 + $0x18] sm:$0xf0] }
 0x2cc   : > { %v1710_v6 = vpop.permute.xlu0 %1709 }
 0x2cd   : > { %v1715_v7 = vsel %vm1318_vm2, %v1710_v6, 0  ;;  %v2833_v6 = vld [vmem:[#allocation8 + $0x64] sm:$0xf] }
 0x2ce   : > { %1724 = vmatpush.bf16.msra.mxu3 %v1715_v7  ;;  %v2641_v7 = vld [vmem:[#allocation8 + $0x68] sm:$0xf0] }
 0x2cf   : > { %1593 = vadd.xlane.f32.xlu1 %v1592_v8  ;;  %v2849_v8 = vld [vmem:[#allocation8 + $0xe4] sm:$0xf]  ;;  %v2644_v9 = vor.u32 %v2833_v6, %v2641_v7  ;;  %v2604_v6 = vor.u32 %v2823_v3, %v2601_v4  ;;  %v2839_v7 = vld [vmem:[#allocation8 + $0x94] sm:$0xf] }
 0x2d1   : > { %1991 = vmatpush.bf16.msrb.mxu2 %v2644_v9 }
 0x2d2   : > { %2003 = vmatpush.bf16.msrb.mxu3 %v2716_v0  ;;  %v2663_v0 = vld [vmem:[#allocation8 + $0x90] sm:$0xf] }
 0x2d4   : > { %v1654_v33 = vpop.permute.xlu0 %1653 }
 0x2d5   : > { %v1659_v11 = vsel %vm1318_vm2, %v1654_v33, 0  ;;  %v2705_v33 = vld [vmem:[#allocation8 + $0xe8] sm:$0xf0] }
 0x2d6   : > { %1668 = vmatpush.bf16.msra.mxu1 %v1659_v11  ;;  %v2832_v11 = vld [vmem:[#allocation8 + $0x54] sm:$0xf0] }
 0x2d7   : > { %2588 = vmatmul.msk.bf16.vlgmr.msra.gmra.mxu3 %vm1304_vm1, %v1708_v10  ;;  %1706 = vadd.xlane.f32.xlu1 %v1705_v12  ;;  %v2631_v10 = vld [vmem:[#allocation8 + $0x50] sm:$0xf]  ;;  %v2708_v12 = vor.u32 %v2849_v8, %v2705_v33  ;;  %v2665_v8 = vld [vmem:[#allocation8 + $0x98] sm:$0xf0]  ;;  %v2591_v33 = vld [vmem:[#allocation8] sm:$0xf] }
 0x2d8   : > { %v2668_v9 = vor.u32 %v2839_v7, %v2665_v8 }
 0x2d9   : > { %2586 = vmatmul.msk.bf16.vlgmr.msra.gmra.mxu1 %vm1304_vm1, %v1652_v13  ;;  %v2695_v13 = vld [vmem:[#allocation8 + $0xd0] sm:$0xf]  ;;  %2004 = vmatpush.bf16.msrb.mxu3 %v2708_v12 }
 0x2da   : > { %1977 = vmatpush.bf16.msrb.mxu1 %v2712_v59 }
 0x2de   : > { %1978 = vmatpush.bf16.msrb.mxu1 %v2704_v5  ;;  %v2664_v5 = vor.u32 %v2840_v2, %v2663_v0 }
 0x2df   : > { %1537 = vadd.xlane.f32.xlu1 %v1536_v14  ;;  %v2848_v14 = vld [vmem:[#allocation8 + $0xd4] sm:$0xf0] }
 0x2eb   : > { %v1427_v28 = vpop.xlane.xlu2 %1426 }
 0x2f9   : > { %v1483_v35 = vpop.xlane.xlu2 %1482 }
 0x2ff   : > { %v1370_v25 = vpop.xlane.xlu0 %1369 }
 0x300   : > { %2980 = vrcp.f32 %v1370_v25  ;;  %v2830_v25 = vld [vmem:[#allocation8 + $0x44] sm:$0xf0] }
 0x303   : > { %v1446_v15 = vpop.f32.mrf.mxu1 }
 0x304   : > { %v1390_v16 = vpop.f32.mrf.mxu3 }
 0x306   : > { %v2981_v27 = vpop.eup %2980 }
 0x307   : > { %v1395_v32 = vmul.f32 %v2981_v27, %v1390_v16  ;;  %v2632_v16 = vor.u32 %v2832_v11, %v2631_v10  ;;  %v2822_v10 = vld [vmem:[#allocation8 + $0x4] sm:$0xf0]  ;;  %v2655_v11 = vld [vmem:[#allocation8 + $0x80] sm:$0xf] }
 0x308   : > { %v2592_v12 = vor.u32 %v2822_v10, %v2591_v33 }
 0x309   : > { %1966 = vmatpush.bf16.msrb.mxu0 %v2632_v16 }
 0x30b   : > { %v1448_v17 = vpop.f32.mrf.mxu1 }
 0x30c   : > { %v1392_v18 = vpop.f32.mrf.mxu3  ;;  %v2633_v17 = vld [vmem:[#allocation8 + $0x58] sm:$0xf0] }
 0x30d   : > { %v2847_v18 = vld [vmem:[#allocation8 + $0xd4] sm:$0xf] }
 0x313   : > { %v3534_v19 = vpop.f32.mrf.mxu1 }
 0x314   : > { %v1502_v20 = vpop.f32.mrf.mxu3 }
 0x31b   : > { %v1557_v21 = vpop.f32.mrf.mxu1 }
 0x31c   : > { %v1504_v22 = vpop.f32.mrf.mxu3  ;;  %v2696_v21 = vor.u32 %v2848_v14, %v2695_v13  ;;  %v2838_v13 = vld [vmem:[#allocation8 + $0x84] sm:$0xf0]  ;;  %v2821_v14 = vld [vmem:[#allocation8 + $0x4] sm:$0xf] }
 0x31d   : > { %v2656_v16 = vor.u32 %v2838_v13, %v2655_v11 }
 0x31e   : > { %1979 = vmatpush.bf16.msrb.mxu1 %v2696_v21 }
 0x33a   : > { %v1651_v24 = vpop.xlane.xlu1 %1650 }
 0x342   : > { %v1594_v37 = vpop.xlane.xlu1 %1593 }
 0x343   : > { %2982 = vrcp.f32 %v1594_v37  ;;  %v2687_v37 = vld [vmem:[#allocation8 + $0xc0] sm:$0xf] }
 0x344   : > { %2984 = vrcp.f32 %v1427_v28  ;;  %v2846_v28 = vld [vmem:[#allocation8 + $0xc4] sm:$0xf0] }
 0x345   : > { %2986 = vrcp.f32 %v1651_v24  ;;  %v2623_v24 = vld [vmem:[#allocation8 + $0x40] sm:$0xf] }
 0x346   : > { %2988 = vrcp.f32 %v1483_v35  ;;  %v2688_v35 = vor.u32 %v2846_v28, %v2687_v37 }
 0x348   : > { %1980 = vmatpush.bf16.msrb.mxu1 %v2688_v35 }
 0x349   : > { %v2983_v29 = vpop.eup %2982 }
 0x34a   : > { %v1614_v31 = vpop.f32.mrf.mxu3  ;;  %v1707_v36 = vpop.xlane.xlu1 %1706 }
 0x34b   : > { %v1619_v34 = vmul.f32 %v2983_v29, %v1614_v31  ;;  %2990 = vrcp.f32 %v1707_v36  ;;  %v2985_v40 = vpop.eup %2984  ;;  %v2829_v29 = vld [vmem:[#allocation8 + $0x44] sm:$0xf]  ;;  %v2625_v31 = vld [vmem:[#allocation8 + $0x48] sm:$0xf0] }
 0x34c   : > { %v2987_v41 = vpop.eup %2986  ;;  %v1451_v30 = vmul.f32 %v2985_v40, %v1446_v15  ;;  %v2831_v15 = vld [vmem:[#allocation8 + $0x54] sm:$0xf]  ;;  %v2628_v36 = vor.u32 %v2829_v29, %v2625_v31  ;;  %v2828_v40 = vld [vmem:[#allocation8 + $0x34] sm:$0xf0] }
 0x34d   : > { %v2949_v26 = vpack.i.bf16 %v1619_v34, %v1395_v32  ;;  %v2989_v44 = vpop.eup %2988  ;;  %v2636_v22 = vor.u32 %v2831_v15, %v2633_v17  ;;  %v2845_v32 = vld [vmem:[#allocation8 + $0xc4] sm:$0xf]  ;;  %v2689_v34 = vld [vmem:[#allocation8 + $0xc8] sm:$0xf0] }
 0x34e   : > { %v1507_v48 = vmul.f32 %v2989_v44, %v1502_v20  ;;  %v2697_v20 = vld [vmem:[#allocation8 + $0xd8] sm:$0xf0]  ;;  %v2593_v15 = vld [vmem:[#allocation8 + $0x8] sm:$0xf0] }
 0x34f   : > { %2950 = vrot.lane.b32.xlu2 %v2949_v26, %s3230_s19  ;;  %v2700_v27 = vor.u32 %v2847_v18, %v2697_v20  ;;  %v2624_v26 = vor.u32 %v2830_v25, %v2623_v24  ;;  %1992 = vmatpush.bf16.msrb.mxu2 %v2636_v22  ;;  %v2617_v44 = vld [vmem:[#allocation8 + $0x38] sm:$0xf0]  ;;  %v2596_v17 = vor.u32 %v2821_v14, %v2593_v15  ;;  %v2837_v18 = vld [vmem:[#allocation8 + $0x84] sm:$0xf]  ;;  %v2657_v20 = vld [vmem:[#allocation8 + $0x88] sm:$0xf0]  ;;  %v1313_v22 = vpop.xlane.xlu2 %1312 }
 0x350   : > { %v2660_v21 = vor.u32 %v2837_v18, %v2657_v20  ;;  %2992 = vrcp.f32 %v1313_v22  ;;  %s3166_s19 = scalar_lea.hbm %s3586_s11, 32 }
 0x351   : > { %v2991_v46 = vpop.eup %2990  ;;  %2005 = vmatpush.bf16.msrb.mxu3 %v2700_v27  ;;  %1967 = vmatpush.bf16.msrb.mxu0 %v2624_v26  ;;  %p3168_p4 = scmp.lt.s32.totalorder %s3166_s19, %s3162_s9 }
 0x352   : > { %v1616_v39 = vpop.f32.mrf.mxu3  ;;  %v1538_v24 = vpop.xlane.xlu1 %1537 }
 0x353   : > { %v2615_v39 = vld [vmem:[#allocation8 + $0x30] sm:$0xf]  ;;  %1993 = vmatpush.bf16.msrb.mxu2 %v2628_v36  ;;  %2994 = vrcp.f32 %v1538_v24  ;;  %p3169_p7 = por %p3168_p4, %p3167_p3 }
 0x355   : > { %p3170_p8 = pnand %p3169_p7, %p3165_p2 }
 0x356   : > { %v1670_v42 = vpop.f32.mrf.mxu1  ;;  %v2993_v37 = vpop.eup %2992 }
 0x357   : > { %v1675_v43 = vmul.f32 %v2987_v41, %v1670_v42  ;;  %v2679_v41 = vld [vmem:[#allocation8 + $0xb0] sm:$0xf]  ;;  %v2692_v42 = vor.u32 %v2845_v32, %v2689_v34  ;;  %v1336_v26 = vmul.f32 %v2993_v37, %v3509_v38  ;;  %v1798_v38 = vld [vmem:[#allocation10] sm:$0x3] }
 0x359   : > { %v2954_v45 = vpack.i.bf16 %v1675_v43, %v1451_v30  ;;  %v2844_v30 = vld [vmem:[#allocation8 + $0xb4] sm:$0xf0]  ;;  %v2827_v43 = vld [vmem:[#allocation8 + $0x34] sm:$0xf]  ;;  %2006 = vmatpush.bf16.msrb.mxu3 %v2692_v42  ;;  %v2995_v27 = vpop.eup %2994 }
 0x35a   : > { %v1726_v47 = vpop.f32.mrf.mxu3  ;;  %v1560_v35 = vmul.f32 %v2995_v27, %v3534_v19  ;;  %v1800_v19 = vperm.slane %v1798_v38, 0 }
 0x35b   : > { %v1731_v49 = vmul.f32 %v2991_v46, %v1726_v47  ;;  %2955 = vrot.lane.b32.xlu1 %v2954_v45, %s3229_s16  ;;  %v2843_v45 = vld [vmem:[#allocation8 + $0xb4] sm:$0xf]  ;;  %v2681_v46 = vld [vmem:[#allocation8 + $0xb8] sm:$0xf0]  ;;  %v2616_v47 = vor.u32 %v2828_v40, %v2615_v39 }
 0x35c   : > { %v2684_v52 = vor.u32 %v2843_v45, %v2681_v46 }
 0x35d   : > { %v2959_v50 = vpack.i.bf16 %v1731_v49, %v1507_v48  ;;  %v2680_v48 = vor.u32 %v2844_v30, %v2679_v41  ;;  %v2620_v49 = vor.u32 %v2827_v43, %v2617_v44  ;;  %1968 = vmatpush.bf16.msrb.mxu0 %v2616_v47 }
 0x35e   : > { %v1672_v23 = vpop.f32.mrf.mxu1  ;;  %2007 = vmatpush.bf16.msrb.mxu3 %v2684_v52 }
 0x35f   : > { %2960 = vrot.lane.b32.xlu0 %v2959_v50, %s3231_s17  ;;  %v2607_v50 = vld [vmem:[#allocation8 + $0x20] sm:$0xf]  ;;  %v2826_v23 = vld [vmem:[#allocation8 + $0x24] sm:$0xf0]  ;;  %1981 = vmatpush.bf16.msrb.mxu1 %v2680_v48 }
 0x360   : > { %v2608_v58 = vor.u32 %v2826_v23, %v2607_v50  ;;  %1994 = vmatpush.bf16.msrb.mxu2 %v2620_v49 }
 0x362   : > { %v1728_v51 = vpop.f32.mrf.mxu3  ;;  %1969 = vmatpush.bf16.msrb.mxu0 %v2608_v58  ;;  %2008 = vmatpush.bf16.msrb.mxu3 %v2676_v61 }
 0x363   : > { %v2671_v51 = vld [vmem:[#allocation8 + $0xa0] sm:$0xf] }
 0x364   : > { %v2672_v59 = vor.u32 %v2842_v53, %v2671_v51  ;;  %1995 = vmatpush.bf16.msrb.mxu2 %v2612_v60  ;;  %v1801_v51 = vperm.slane %v1798_v38, 1 }
 0x366   : > { %1982 = vmatpush.bf16.msrb.mxu1 %v2672_v59  ;;  %1970 = vmatpush.bf16.msrb.mxu0 %v2600_v1 }
 0x367   : > { %2009 = vmatpush.bf16.msrb.mxu3 %v2668_v9 }
 0x368   : > { %1996 = vmatpush.bf16.msrb.mxu2 %v2604_v6 }
 0x36a   : > { %1983 = vmatpush.bf16.msrb.mxu1 %v2664_v5  ;;  %1971 = vmatpush.bf16.msrb.mxu0 %v2592_v12 }
 0x36b   : > { %2010 = vmatpush.bf16.msrb.mxu3 %v2660_v21 }
 0x36c   : > { %1997 = vmatpush.bf16.msrb.mxu2 %v2596_v17 }
 0x36e   : > { %1984 = vmatpush.bf16.msrb.mxu1 %v2656_v16 }
 0x3a9   : > { %v2951_v25 = vpop.permute.xlu2 %2950 }
 0x3aa   : > { %v2953_v29 = vunpack.i.h.bf16 %v2951_v25  ;;  %v2952_v31 = vunpack.i.l.bf16 %v2951_v25 }
 0x3ac   : > { %v1761_v39 = vsel %vm1284_vm0, %v1560_v35, %v2953_v29  ;;  %v1756_v40 = vsel %vm1284_vm0, %v1336_v26, %v2952_v31 }
 0x3cd   : > { %v2956_v28 = vpop.permute.xlu1 %2955 }
 0x3ce   : > { %v2958_v32 = vunpack.i.h.bf16 %v2956_v28  ;;  %v2957_v34 = vunpack.i.l.bf16 %v2956_v28 }
 0x3d0   : > { %v1758_v30 = vsel %vm1757_vm3, %v1756_v40, %v2957_v34  ;;  %v1762_v43 = vsel %vm1757_vm3, %v1761_v39, %v2958_v32 }
 0x3d1   : > { %v2961_v36 = vpop.permute.xlu0 %2960 }
 0x3d2   : > { %v2963_v41 = vunpack.i.h.bf16 %v2961_v36  ;;  %v2962_v42 = vunpack.i.l.bf16 %v2961_v36 }
 0x3d4   : > { %v1760_v44 = vsel %vm1759_vm4, %v1758_v30, %v2962_v42  ;;  %v1763_v45 = vsel %vm1759_vm4, %v1762_v43, %v2963_v41 }
 0x3d5   : > { %v1764_v46 = vpack.c.bf16 %v1760_v44, %v1760_v44  ;;  %v1765_v47 = vpack.c.bf16 %v1763_v45, %v1763_v45 }
 0x3d7   : > { %1972 = vmatmul.bf16.vlgmr.msrb.gmra.mxu0 %v1764_v46  ;;  %1985 = vmatmul.bf16.vlgmr.msrb.gmra.mxu1 %v1765_v47 }
 0x3d8   : > { %1998 = vmatmul.bf16.vlgmr.msrb.gmra.mxu2 %v1764_v46  ;;  %2011 = vmatmul.bf16.vlgmr.msrb.gmra.mxu3 %v1765_v47 }
 0x454   : > { %v1973_v48 = vpop.f32.mrf.mxu0  ;;  %v1986_v49 = vpop.f32.mrf.mxu1 }
 0x455   : > { %v1974_v50 = vadd.f32 %v1973_v48, %v1800_v19 }
 0x457   : > { %v1987_v23 = vadd.f32 %v1986_v49, %v1974_v50 }
 0x459   : > { %2016 = vst [vmem:[%s490_s24] sm:$0xff] %v1987_v23 }
 0x45b   : > { %v1999_v52 = vpop.f32.mrf.mxu2  ;;  %v2012_v53 = vpop.f32.mrf.mxu3 }
 0x45c   : > { %v2000_v54 = vadd.f32 %v1999_v52, %v1801_v51  ;;  %v1975_v55 = vpop.f32.mrf.mxu0  ;;  %v1988_v56 = vpop.f32.mrf.mxu1 }
 0x45e   : > { %v2013_v57 = vadd.f32 %v2012_v53, %v2000_v54 }
 0x460   : > { %2017 = vst [vmem:[%s490_s24 + $0x8] sm:$0xff] %v2013_v57 }
 0x461   : > { %3173 = shalt.err (!%p3170_p8)
}
 0x462   : > { %2874 = dma.vmem_to_hbm [thread:$0]  (%p3330_p5), %s2033_s4, 256, %s2035_s13, %s2019_s21  }
 0x463   : > { %v2001_v58 = vpop.f32.mrf.mxu2  ;;  %v2014_v59 = vpop.f32.mrf.mxu3 }
 0x464 PF: > { %s3605_s26 = sld [smem:[#allocation16_spill]]  ;;  %p2906_p9 = scmp.ge.s32.totalorder %s3220_s20, 2 }
 0x466   : > { %p2893_p10 = pnand %p2906_p9, %p3334_p6 }
 0x468   : > { %p2894_p11 = pneg %p2893_p10 }
 0x46a   : > { %s2046_s29 = sand.u32 1, %s3605_s26  }
 0x46b   : > { %s2047_s22 = scalar_lea.sflag [#allocation4], %s2046_s29 }
 0x46c   : > { %3203 = dma.done.wait (%p2894_p11), %s2047_s22, 256  }
 0x46d   : > { %3205 = vsyncadd (%p2894_p11), %s2047_s22, 4294967040  ;;  %s3607_s20 = sld [smem:[#allocation18_spill]]  ;;  %s3610_s17 = smov %s3212_s18 }
 0x46e   : > { %s3608_s30 = sld [smem:[#allocation17_spill]] }
 0x46f   : > { %s3609_s19 = sld [smem:[#allocation19_spill]] }
 0x473   : > { %p24_p5 = scmp.ge.s32.totalorder %s3607_s20, 4  }
 0x474   : > { %s3611_s18 = smov %s3608_s30 }
 0x475   :  { %26 = sbr.rel (!%p24_p5) target bundleno = 9 (0x9), region = 126 }
 0x47a   :  { %2053 = vsyncpa [#allocation3], 1 }
 0x47b   :  { %2055 = vsyncpa [#allocation3 + $0x1], 1 }
 0x47c   :  { %2056 = vsyncpa [#allocation6], 1 }
 0x47d   :  { %2057 = vsyncpa [#allocation9], 1 }
 0x47e   :  { %2058 = vsyncpa [#allocation4], 1 }
 0x47f   :  { %2060 = vsyncpa [#allocation4 + $0x1], 1 }

// kernel: model_forward.2
= control target key start
LH: loop header
LB: loop body
LE: loop exit
PB: predicated region body
PF: predicated region fallthrough
CT: control target
= control target key end

     0   :  { %s3928_s0 = inlined_call_operand.hbm [shape: f32[2,8,256], index: 0, kind: input, shape index: {}]   ;;  %s3929_s1 = inlined_call_operand.hbm [shape: f32[2,8,256], index: 1, kind: input, shape index: {}]   ;;  %s3930_s2 = inlined_call_operand.hbm [shape: f32[2,8,256], index: 2, kind: input, shape index: {}]   ;;  %s3931_s3 = inlined_call_operand.hbm [shape: bf16[256,256], index: 3, kind: input, shape index: {}]   ;;  %s3932_s4 = inlined_call_operand.hbm [shape: bf16[256,256], index: 4, kind: input, shape index: {}]   ;;  %s3933_s5 = inlined_call_operand.hbm [shape: bf16[256,256], index: 5, kind: input, shape index: {}]   ;;  %s3934_s6 = inlined_call_operand.hbm [shape: f32[1,256], index: 6, kind: input, shape index: {}]   ;;  %s3935_s7 = inlined_call_operand.hbm [shape: f32[1,256], index: 7, kind: input, shape index: {}]   ;;  %s3936_s8 = inlined_call_operand.vmem [shape: f32[1,256], index: 8, kind: input, shape index: {}]   ;;  %s3937_s9 = inlined_call_operand.hbm [shape: bf16[256,256], index: 9, kind: input, shape index: {}]   ;;  %s3938_s10 = inlined_call_operand.hbm [shape: f32[1,256], index: 10, kind: input, shape index: {}]   ;;  %s3939_s11 = inlined_call_operand.vmem [shape: bf16[2,8,256], index: 11, kind: output, shape index: {}]  }
   0x1   :  { %3947 = sst [smem:[#allocation26_spill]] %s3929_s1 }
   0x2   :  { %3948 = sst [smem:[#allocation27_spill]] %s3931_s3 }
   0x3   :  { %3949 = sst [smem:[#allocation28_spill]] %s3932_s4 }
   0x4   :  { %3950 = sst [smem:[#allocation29_spill]] %s3933_s5 }
   0x5   :  { %3951 = sst [smem:[#allocation30_spill]] %s3934_s6 }
   0x6   :  { %3952 = sst [smem:[#allocation31_spill]] %s3935_s7 }
   0x7   :  { %3953 = sst [smem:[#allocation32_spill]] %s3937_s9 }
   0x8   :  { %16 = vsyncpa [#allocation3], 0 }
   0x9   :  { %18 = vsyncpa [#allocation3 + $0x1], 0 }
   0xa   :  { %19 = vsyncpa [#allocation5], 0 }
   0xb   :  { %21 = vsyncpa [#allocation5 + $0x1], 0 }
   0xc   :  { %22 = vsyncpa [#allocation8], 0 }
   0xd   :  { %23 = vsyncpa [#allocation11], 0 }
   0xe   :  { %24 = vsyncpa [#allocation14], 0 }
   0xf   :  { %25 = vsyncpa [#allocation17], 0  ;;  %s3565_s17 = smov 0   ;;  %s3567_s18 = smov 0  }
  0x10   :  { %s3569_s19 = smov 0   ;;  %s3571_s20 = smov 0  }
  0x11 LB: > { %s3954_s3 = sld [smem:[#allocation27_spill]]  ;;  %s3589_s24 = sadd.s32 4294967295, %s3491_s20   ;;  %s3491_s20 = sphi %s3571_s20, %s3970_s20   ;;  %s3487_s19 = sphi %s3569_s19, %s3974_s19   ;;  %s3483_s18 = sphi %s3567_s18, %s3973_s18   ;;  %s3479_s17 = sphi %s3565_s17, %s3972_s17  }
  0x12   : > { %p2272_p0 = scmp.ge.s32.totalorder %s3491_s20, 1  ;;  %p52_p1 = scmp.eq.s32.totalorder %s3589_s24, 0 }
  0x13   : > { %p308_p2 = scmp.lt.s32.totalorder %s3491_s20, 3  ;;  %s3493_s26 = smov [#allocation7]  }
  0x14   : > { %s321_s27 = sshll.u32 %s3493_s26, 4  ;;  %s3956_s5 = sld [smem:[#allocation29_spill]]  ;;  %s322_s27 = int_to_ptr.vmem [resolvable:$true] %s321_s27 }
  0x15   : > { %p3594_p3 = pnand %p2272_p0, %p308_p2  ;;  %s3958_s7 = sld [smem:[#allocation31_spill]] }
  0x16   : > { %s3494_s16 = smov [#allocation10]   ;;  %s3940_s22 = smov 128  }
  0x17   : > { %s319_s23 = sshll.u32 %s3954_s3, 4  ;;  %p2999_p4 = pneg %p3594_p3  ;;  %s320_s23 = int_to_ptr.hbm [resolvable:$true] %s319_s23 }
  0x18   : > { %s349_s21 = sshll.u32 %s3494_s16, 4  ;;  %s3942_s26 = smov 8   ;;  %s350_s21 = int_to_ptr.vmem [resolvable:$true] %s349_s21 }
  0x19   : > { %p3605_p5 = pnand %p2999_p4, %p52_p1  ;;  %s3497_s28 = smov [#allocation13]  }
  0x1a   : > { %s347_s30 = sshll.u32 %s3956_s5, 4  ;;  %s376_s29 = sshll.u32 %s3497_s28, 4  ;;  %s348_s30 = int_to_ptr.hbm [resolvable:$true] %s347_s30  ;;  %s377_s29 = int_to_ptr.vmem [resolvable:$true] %s376_s29 }
  0x1b   : > { %s374_s15 = sshll.u32 %s3958_s7, 4  ;;  %s3625_s13 = sadd.s32 1, %s3491_s20   ;;  %s375_s15 = int_to_ptr.hbm [resolvable:$true] %s374_s15 }
  0x1c   : > { %3002 = dma.hbm_to_vmem [thread:$0]  (!%p3605_p5), %s320_s23, 4096, %s322_s27, [#allocation8], %s3940_s22, %s3940_s22, %s3942_s26  }
  0x1d   : > { %3008 = dma.hbm_to_vmem [thread:$0]  (!%p3605_p5), %s348_s30, 4096, %s350_s21, [#allocation11], %s3940_s22, %s3940_s22, %s3942_s26  }
  0x1e   : > { %3014 = dma.hbm_to_vmem [thread:$0]  (!%p3605_p5), %s375_s15, 32, %s377_s29, [#allocation14]  }
  0x1f   : > { %3959 = sst [smem:[#allocation24_spill]] %s3625_s13  ;;  %s35_s23 = ssub.s32 %s3491_s20, %s3625_s13 }
  0x20   : > { %s38_s27 = sadd.s32 1, %s3487_s19  ;;  %p36_p6 = scmp.eq.s32.totalorder %s35_s23, 0 }
  0x21   : > { %p45_p7 = scmp.ne.s32.totalorder %s3487_s19, %s3483_s18  ;;  %p46_p8 = scmp.eq.s32.totalorder %s3491_s20, 0 }
  0x22   : > { %p51_p9 = scmp.ne.s32.totalorder %s3483_s18, %s3479_s17  ;;  %p3038_p12 = scmp.lt.s32.totalorder %s3491_s20, 2 }
  0x23   : > { %s3636_s14 = scalar_select %p36_p6, %s3487_s19, %s38_s27  }
  0x24   : > { %p47_p10 = por %p46_p8, %p45_p7  ;;  %p3640_p11 = por %p52_p1, %p51_p9 }
  0x25   : > { %3960 = sst [smem:[#allocation25_spill]] %s3636_s14  ;;  %s3944_s15 = sand.u32 1, %s3487_s19  }
  0x26   : > { %s3648_s16 = sshll.u32 %s3944_s15, 4  ;;  %s3651_s21 = sshll.u32 %s3491_s20, 4 }
  0x27   : > { %p3653_p13 = pnand %p3038_p12, %p47_p10  ;;  %s436_s17 = sand.u32 1, %s3491_s20  }
  0x28   : > { %s3963_s1 = sld [smem:[#allocation26_spill]]  ;;  %s440_s26 = scalar_lea.vmem [#allocation4], %s3648_s16 }
  0x29   : > { %s449_s3 = sshll.u32 %s440_s26, 4  ;;  %s3663_s15 = scalar_lea.sflag [#allocation5], %s436_s17  ;;  %s450_s3 = int_to_ptr.vmem [resolvable:$true] %s449_s3 }
  0x2a   : > { %p3231_p2 = pneg %p3653_p13 }
  0x2e   : > { %s445_s27 = scalar_lea.hbm %s3963_s1, %s3651_s21  ;;  %s3234_s23 = scalar_lea.hbm %s3963_s1, 32 }
  0x2f   : > { %s447_s22 = sshll.u32 %s445_s27, 4  ;;  %s448_s22 = int_to_ptr.hbm [resolvable:$true] %s447_s22 }
  0x30   : > { %s3227_s5 = sshra.s32 %s448_s22, 4  ;;  %s3228_s5 = int_to_ptr.hbm [resolvable:$true] %s3227_s5 }
  0x31   : > { %s3229_s7 = scalar_lea.hbm %s3228_s5, 16  ;;  %p3235_p7 = scmp.lt.s32.totalorder %s3228_s5, %s3963_s1 }
  0x32   : > { %p3230_p0 = scmp.ne.s32.totalorder %s3228_s5, %s3229_s7  ;;  %p3236_p8 = scmp.lt.s32.totalorder %s3234_s23, %s3229_s7 }
  0x34   : > { %p3232_p4 = pnand %p3231_p2, %p3230_p0  ;;  %p3237_p9 = por %p3236_p8, %p3235_p7 }
  0x36   : > { %p3233_p6 = pneg %p3232_p4 }
  0x38   : > { %p3238_p10 = pnand %p3237_p9, %p3233_p6 }
  0x3a   : > { %3241 = shalt.err (!%p3238_p10)
}
  0x3b   : > { %3027 = dma.hbm_to_vmem [thread:$0]  (!%p3653_p13), %s448_s22, 256, %s450_s3, %s3663_s15  }
  0x3c   : > { %s3964_s4 = sld [smem:[#allocation28_spill]]  ;;  %s3498_s20 = smov [#allocation9]  }
  0x3d   : > { %s335_s29 = sshll.u32 %s3498_s20, 4  ;;  %s3965_s6 = sld [smem:[#allocation30_spill]]  ;;  %s336_s29 = int_to_ptr.vmem [resolvable:$true] %s335_s29 }
  0x3e   : > { %s3966_s27 = smov 8   ;;  %s3967_s26 = smov 128  }
  0x3f   : > { %s3499_s3 = smov [#allocation12]   ;;  %s3968_s9 = sld [smem:[#allocation32_spill]] }
  0x40   : > { %s364_s22 = sshll.u32 %s3499_s3, 4  ;;  %s403_s1 = sshll.u32 %s3938_s10, 4  ;;  %s365_s22 = int_to_ptr.vmem [resolvable:$true] %s364_s22  ;;  %s404_s1 = int_to_ptr.hbm [resolvable:$true] %s403_s1 }
  0x41   : > { %s3501_s3 = smov [#allocation16]   ;;  %s425_s17 = scalar_lea.hbm %s3928_s0, %s3651_s21 }
  0x42   : > { %s333_s13 = sshll.u32 %s3964_s4, 4  ;;  %s405_s14 = sshll.u32 %s3501_s3, 4  ;;  %s334_s13 = int_to_ptr.hbm [resolvable:$true] %s333_s13  ;;  %s406_s14 = int_to_ptr.vmem [resolvable:$true] %s405_s14 }
  0x43   : > { %s362_s23 = sshll.u32 %s3965_s6, 4  ;;  %s420_s5 = scalar_lea.vmem [#allocation2], %s3648_s16  ;;  %s363_s23 = int_to_ptr.hbm [resolvable:$true] %s362_s23 }
  0x44   : > { %3005 = dma.hbm_to_vmem [thread:$0]  (!%p3605_p5), %s334_s13, 4096, %s336_s29, [#allocation8], %s3967_s26, %s3967_s26, %s3966_s27  }
  0x45   : > { %s388_s20 = sshll.u32 %s3968_s9, 4  ;;  %s3500_s13 = smov [#allocation15]   ;;  %s389_s20 = int_to_ptr.hbm [resolvable:$true] %s388_s20 }
  0x46   : > { %3011 = dma.hbm_to_vmem [thread:$0]  (!%p3605_p5), %s363_s23, 32, %s365_s22, [#allocation11]  }
  0x47   : > { %s390_s29 = sshll.u32 %s3500_s13, 4  ;;  %s429_s7 = sshll.u32 %s420_s5, 4  ;;  %s391_s29 = int_to_ptr.vmem [resolvable:$true] %s390_s29  ;;  %s430_s7 = int_to_ptr.vmem [resolvable:$true] %s429_s7 }
  0x48   : > { %3017 = dma.hbm_to_vmem [thread:$0]  (!%p3605_p5), %s389_s20, 4096, %s391_s29, [#allocation14], %s3967_s26, %s3967_s26, %s3966_s27  }
  0x49   : > { %3020 = dma.hbm_to_vmem [thread:$0]  (!%p3605_p5), %s404_s1, 32, %s406_s14, [#allocation17]  }
  0x4a   : > { %s427_s13 = sshll.u32 %s425_s17, 4  ;;  %s3969_s4 = sand.u32 1, %s3487_s19   ;;  %s428_s13 = int_to_ptr.hbm [resolvable:$true] %s427_s13 }
  0x4b   : > { %s417_s6 = scalar_lea.sflag [#allocation3], %s3969_s4  ;;  %s3377_s9 = sshra.s32 %s428_s13, 4  ;;  %s3378_s9 = int_to_ptr.hbm [resolvable:$true] %s3377_s9 }
  0x4c   : > { %s3379_s27 = scalar_lea.hbm %s3378_s9, 16  ;;  %s3384_s26 = scalar_lea.hbm %s3928_s0, 32 }
  0x4d   : > { %p3380_p12 = scmp.ne.s32.totalorder %s3378_s9, %s3379_s27  ;;  %p3385_p5 = scmp.lt.s32.totalorder %s3378_s9, %s3928_s0 }
  0x4e   : > { %p3386_p6 = scmp.lt.s32.totalorder %s3384_s26, %s3379_s27 }
  0x4f   : > { %p3382_p0 = pnand %p3380_p12, %p3231_p2 }
  0x50   : > { %p3387_p7 = por %p3386_p6, %p3385_p5 }
  0x51   : > { %p3383_p4 = pneg %p3382_p0 }
  0x53   : > { %p3388_p8 = pnand %p3387_p7, %p3383_p4 }
  0x55   : > { %3391 = shalt.err (!%p3388_p8)
}
  0x56   : > { %3024 = dma.hbm_to_vmem [thread:$0]  (!%p3653_p13), %s428_s13, 256, %s430_s7, %s417_s6  }
  0x57   : > { %s465_s14 = scalar_lea.hbm %s3930_s2, %s3651_s21  ;;  %s460_s23 = scalar_lea.vmem [#allocation6], %s3648_s16 }
  0x58   : > { %s469_s22 = sshll.u32 %s460_s23, 4  ;;  %s467_s17 = sshll.u32 %s465_s14, 4  ;;  %s470_s22 = int_to_ptr.vmem [resolvable:$true] %s469_s22  ;;  %s468_s17 = int_to_ptr.hbm [resolvable:$true] %s467_s17 }
  0x59   : > { %s3407_s9 = sshra.s32 %s468_s17, 4  ;;  %s3414_s6 = scalar_lea.hbm %s3930_s2, 32  ;;  %s3408_s9 = int_to_ptr.hbm [resolvable:$true] %s3407_s9 }
  0x5a   : > { %s3409_s5 = scalar_lea.hbm %s3408_s9, 16  ;;  %p3415_p0 = scmp.lt.s32.totalorder %s3408_s9, %s3930_s2 }
  0x5b   : > { %p3410_p9 = scmp.ne.s32.totalorder %s3408_s9, %s3409_s5  ;;  %p3416_p4 = scmp.lt.s32.totalorder %s3414_s6, %s3409_s5 }
  0x5d   : > { %p3412_p10 = pnand %p3410_p9, %p3231_p2  ;;  %p3417_p5 = por %p3416_p4, %p3415_p0 }
  0x5f   : > { %p3413_p12 = pneg %p3412_p10 }
  0x61   : > { %p3418_p6 = pnand %p3417_p5, %p3413_p12 }
  0x63   : > { %3421 = shalt.err (!%p3418_p6)
}
  0x64   : > { %3030 = dma.hbm_to_vmem [thread:$0]  (!%p3653_p13), %s468_s17, 256, %s470_s22, %s3663_s15  }
  0x65   : > { %478 = sbr.rel (%p3594_p3) target bundleno = 1195 (0x4ab), region = 64  ;;  %s480_s16 = sand.u32 (!%p3594_p3), 1, %s3483_s18  }
  0x66   : > { %s3743_s21 = sshll.u32 (!%p3594_p3), %s480_s16, 4  ;;  %s481_s12 = scalar_lea.sflag (!%p3594_p3), [#allocation3], %s480_s16 }
  0x67   : > { %s484_s26 = scalar_lea.vmem (!%p3594_p3), [#allocation2], %s3743_s21 }
  0x6a   : > { %3454 = dma.done.wait (%p3640_p11), %s481_s12, 256  }
  0x6b   : > { %3456 = vsyncadd (%p3640_p11), %s481_s12, 4294967040  ;;  %s490_s15 = sand.u32 1, %s3589_s24   ;;  %s494_s25 = scalar_lea.vmem [#allocation4], %s3743_s21 }
  0x6c   : > { %s491_s28 = scalar_lea.sflag [#allocation5], %s490_s15 }
  0x6d   : > { %3458 = dma.done.wait (%p3640_p11), %s491_s28, 512  }
  0x6e   : > { %3460 = vsyncadd (%p3640_p11), %s491_s28, 4294966784  ;;  %s504_s20 = scalar_lea.vmem [#allocation6], %s3743_s21 }
  0x6f   : > { %3462 = dma.done.wait (%p52_p1), [#allocation8], 8192  }
  0x70   : > { %3464 = vsyncadd (%p52_p1), [#allocation8], 4294959104 }
  0x71   : > { %3466 = dma.done.wait (%p52_p1), [#allocation11], 4128  }
  0x72   : > { %3468 = vsyncadd (%p52_p1), [#allocation11], 4294963168 }
  0x73   : > { %3470 = dma.done.wait (%p52_p1), [#allocation14], 4128  }
  0x74   : > { %3472 = vsyncadd (%p52_p1), [#allocation14], 4294963168 }
  0x75   : > { %3474 = dma.done.wait (%p52_p1), [#allocation17], 32  }
  0x76   : > { %3476 = vsyncadd (%p52_p1), [#allocation17], 4294967264  ;;  %v2361_v0 = vld [vmem:[#allocation7 + $0x70] sm:$0xf]  ;;  %v2852_v1 = vld [vmem:[#allocation7 + $0x74] sm:$0xf0] }
  0x77   : > { %v2425_v2 = vld [vmem:[#allocation7 + $0xf0] sm:$0xf]  ;;  %v2362_v3 = vor.u32 %v2852_v1, %v2361_v0  ;;  %v2868_v4 = vld [vmem:[#allocation7 + $0xf4] sm:$0xf0]  ;;  %v2353_v5 = vld [vmem:[#allocation7 + $0x60] sm:$0xf] }
  0x78   : > { %v2850_v6 = vld [vmem:[#allocation7 + $0x64] sm:$0xf0]  ;;  %v2426_v7 = vor.u32 %v2868_v4, %v2425_v2  ;;  %v2417_v8 = vld [vmem:[#allocation7 + $0xe0] sm:$0xf]  ;;  %v2345_v12 = vld [vmem:[#allocation7 + $0x50] sm:$0xf] }
  0x79   : > { %v2866_v9 = vld [vmem:[#allocation7 + $0xe4] sm:$0xf0]  ;;  %797 = vmatpush.bf16.msra.mxu0 %v2362_v3  ;;  %v2354_v10 = vor.u32 %v2850_v6, %v2353_v5  ;;  %v2848_v13 = vld [vmem:[#allocation7 + $0x54] sm:$0xf0]  ;;  %v2409_v14 = vld [vmem:[#allocation7 + $0xd0] sm:$0xf] }
  0x7a   : > { %810 = vmatpush.bf16.msra.mxu1 %v2426_v7  ;;  %v2418_v11 = vor.u32 %v2866_v9, %v2417_v8  ;;  %v2864_v15 = vld [vmem:[#allocation7 + $0xd4] sm:$0xf0]  ;;  %v2346_v16 = vor.u32 %v2848_v13, %v2345_v12  ;;  %v2337_v18 = vld [vmem:[#allocation7 + $0x40] sm:$0xf]  ;;  %v2846_v19 = vld [vmem:[#allocation7 + $0x44] sm:$0xf0] }
  0x7b   : > { %v2410_v17 = vor.u32 %v2864_v15, %v2409_v14  ;;  %v2401_v20 = vld [vmem:[#allocation7 + $0xc0] sm:$0xf]  ;;  %v2862_v21 = vld [vmem:[#allocation7 + $0xc4] sm:$0xf0]  ;;  %v2338_v22 = vor.u32 %v2846_v19, %v2337_v18  ;;  %v2329_v24 = vld [vmem:[#allocation7 + $0x30] sm:$0xf] }
  0x7c   : > { %v2402_v23 = vor.u32 %v2862_v21, %v2401_v20  ;;  %v2844_v25 = vld [vmem:[#allocation7 + $0x34] sm:$0xf0]  ;;  %v2393_v26 = vld [vmem:[#allocation7 + $0xb0] sm:$0xf]  ;;  %v2851_v28 = vld [vmem:[#allocation7 + $0x74] sm:$0xf] }
  0x7d   : > { %798 = vmatpush.bf16.msra.mxu0 %v2354_v10  ;;  %v2860_v27 = vld [vmem:[#allocation7 + $0xb4] sm:$0xf0]  ;;  %v2363_v29 = vld [vmem:[#allocation7 + $0x78] sm:$0xf0]  ;;  %v2867_v31 = vld [vmem:[#allocation7 + $0xf4] sm:$0xf]  ;;  %v2330_v33 = vor.u32 %v2844_v25, %v2329_v24 }
  0x7e   : > { %811 = vmatpush.bf16.msra.mxu1 %v2418_v11  ;;  %v2366_v30 = vor.u32 %v2851_v28, %v2363_v29  ;;  %v2427_v32 = vld [vmem:[#allocation7 + $0xf8] sm:$0xf0]  ;;  %v2321_v34 = vld [vmem:[#allocation7 + $0x20] sm:$0xf]  ;;  %v2842_v35 = vld [vmem:[#allocation7 + $0x24] sm:$0xf0]  ;;  %v2394_v37 = vor.u32 %v2860_v27, %v2393_v26 }
  0x7f   : > { %v2430_v36 = vor.u32 %v2867_v31, %v2427_v32  ;;  %v2385_v38 = vld [vmem:[#allocation7 + $0xa0] sm:$0xf]  ;;  %v2858_v39 = vld [vmem:[#allocation7 + $0xa4] sm:$0xf0]  ;;  %v2849_v40 = vld [vmem:[#allocation7 + $0x64] sm:$0xf]  ;;  %v2322_v46 = vor.u32 %v2842_v35, %v2321_v34 }
  0x80   : > { %823 = vmatpush.bf16.msra.mxu2 %v2366_v30  ;;  %v2355_v41 = vld [vmem:[#allocation7 + $0x68] sm:$0xf0]  ;;  %v2865_v42 = vld [vmem:[#allocation7 + $0xe4] sm:$0xf]  ;;  %v2313_v47 = vld [vmem:[#allocation7 + $0x10] sm:$0xf]  ;;  %v2386_v50 = vor.u32 %v2858_v39, %v2385_v38 }
  0x81   : > { %799 = vmatpush.bf16.msra.mxu0 %v2346_v16  ;;  %836 = vmatpush.bf16.msra.mxu3 %v2430_v36  ;;  %v2419_v43 = vld [vmem:[#allocation7 + $0xe8] sm:$0xf0]  ;;  %v2358_v44 = vor.u32 %v2849_v40, %v2355_v41  ;;  %v2847_v48 = vld [vmem:[#allocation7 + $0x54] sm:$0xf]  ;;  %v2347_v49 = vld [vmem:[#allocation7 + $0x58] sm:$0xf0] }
  0x82   : > { %812 = vmatpush.bf16.msra.mxu1 %v2410_v17  ;;  %v2422_v45 = vor.u32 %v2865_v42, %v2419_v43  ;;  %v2840_v51 = vld [vmem:[#allocation7 + $0x14] sm:$0xf0]  ;;  %v2350_v52 = vor.u32 %v2847_v48, %v2347_v49  ;;  %v2863_v53 = vld [vmem:[#allocation7 + $0xd4] sm:$0xf]  ;;  %v2411_v54 = vld [vmem:[#allocation7 + $0xd8] sm:$0xf0] }
  0x83   : > { %v2377_v55 = vld [vmem:[#allocation7 + $0x90] sm:$0xf]  ;;  %v2856_v56 = vld [vmem:[#allocation7 + $0x94] sm:$0xf0]  ;;  %v2414_v57 = vor.u32 %v2863_v53, %v2411_v54  ;;  %v2845_v58 = vld [vmem:[#allocation7 + $0x44] sm:$0xf]  ;;  %v2314_v61 = vor.u32 %v2840_v51, %v2313_v47 }
  0x84   : > { %824 = vmatpush.bf16.msra.mxu2 %v2358_v44  ;;  %v2339_v59 = vld [vmem:[#allocation7 + $0x48] sm:$0xf0]  ;;  %v2861_v60 = vld [vmem:[#allocation7 + $0xc4] sm:$0xf]  ;;  %v2305_v62 = vld [vmem:[#allocation7] sm:$0xf]  ;;  %v2378_v0 = vor.u32 %v2856_v56, %v2377_v55 }
  0x85   : > { %800 = vmatpush.bf16.msra.mxu0 %v2338_v22  ;;  %837 = vmatpush.bf16.msra.mxu3 %v2422_v45  ;;  %v2403_v63 = vld [vmem:[#allocation7 + $0xc8] sm:$0xf0]  ;;  %v2838_v1 = vld [vmem:[#allocation7 + $0x4] sm:$0xf0]  ;;  %v2369_v2 = vld [vmem:[#allocation7 + $0x80] sm:$0xf]  ;;  %v2342_v4 = vor.u32 %v2845_v58, %v2339_v59 }
  0x86   : > { %813 = vmatpush.bf16.msra.mxu1 %v2402_v23  ;;  %v2854_v3 = vld [vmem:[#allocation7 + $0x84] sm:$0xf0]  ;;  %v2489_v5 = vld [vmem:[#allocation9 + $0x70] sm:$0xf]  ;;  %v2884_v6 = vld [vmem:[#allocation9 + $0x74] sm:$0xf0]  ;;  %v2406_v8 = vor.u32 %v2861_v60, %v2403_v63  ;;  %v2306_v12 = vor.u32 %v2838_v1, %v2305_v62 }
  0x87   : > { %v2553_v7 = vld [vmem:[#allocation9 + $0xf0] sm:$0xf]  ;;  %v2900_v9 = vld [vmem:[#allocation9 + $0xf4] sm:$0xf0]  ;;  %v2843_v10 = vld [vmem:[#allocation7 + $0x34] sm:$0xf]  ;;  %v2370_v16 = vor.u32 %v2854_v3, %v2369_v2  ;;  %v2490_v17 = vor.u32 %v2884_v6, %v2489_v5 }
  0x88   : > { %825 = vmatpush.bf16.msra.mxu2 %v2350_v52  ;;  %v2331_v11 = vld [vmem:[#allocation7 + $0x38] sm:$0xf0]  ;;  %v595_v13 = vld [vmem:[%s484_s26] sm:$0xff]  ;;  %v2554_v19 = vor.u32 %v2900_v9, %v2553_v7  ;;  %v2882_v21 = vld [vmem:[#allocation9 + $0x64] sm:$0xf0]  ;;  %vm1360_vm0 = vcmask 261120  }
  0x89   : > { %801 = vmatpush.bf16.msra.mxu0 %v2330_v33  ;;  %838 = vmatpush.bf16.msra.mxu3 %v2414_v57  ;;  %v2859_v14 = vld [vmem:[#allocation7 + $0xb4] sm:$0xf]  ;;  %v2395_v15 = vld [vmem:[#allocation7 + $0xb8] sm:$0xf0]  ;;  %v2481_v20 = vld [vmem:[#allocation9 + $0x60] sm:$0xf]  ;;  %v2334_v23 = vor.u32 %v2843_v10, %v2331_v11  ;;  %v3777_v25 = vpack.c.bf16 %v595_v13, %v595_v13 }
  0x8a   : > { %814 = vmatpush.bf16.msra.mxu1 %v2394_v37  ;;  %v596_v18 = vld [vmem:[%s484_s26 + $0x8] sm:$0xff]  ;;  %v2545_v22 = vld [vmem:[#allocation9 + $0xe0] sm:$0xf]  ;;  %v2398_v26 = vor.u32 %v2859_v14, %v2395_v15  ;;  %v2841_v27 = vld [vmem:[#allocation7 + $0x24] sm:$0xf]  ;;  %v2482_v32 = vor.u32 %v2882_v21, %v2481_v20  ;;  %s3502_s30 = smov 64  }
  0x8b   : > { %v2898_v24 = vld [vmem:[#allocation9 + $0xe4] sm:$0xf0]  ;;  %v2323_v28 = vld [vmem:[#allocation7 + $0x28] sm:$0xf0]  ;;  %v3779_v29 = vpack.c.bf16 %v596_v18, %v596_v18  ;;  %v2857_v30 = vld [vmem:[#allocation7 + $0xa4] sm:$0xf] }
  0x8c   : > { %826 = vmatpush.bf16.msra.mxu2 %v2342_v4  ;;  %v2387_v31 = vld [vmem:[#allocation7 + $0xa8] sm:$0xf0]  ;;  %v2546_v33 = vor.u32 %v2898_v24, %v2545_v22  ;;  %v2473_v34 = vld [vmem:[#allocation9 + $0x50] sm:$0xf]  ;;  %v2880_v35 = vld [vmem:[#allocation9 + $0x54] sm:$0xf0]  ;;  %v2326_v37 = vor.u32 %v2841_v27, %v2323_v28 }
  0x8d   : > { %802 = vmatpush.bf16.msra.mxu0 %v2322_v46  ;;  %839 = vmatpush.bf16.msra.mxu3 %v2406_v8  ;;  %v2537_v36 = vld [vmem:[#allocation9 + $0xd0] sm:$0xf]  ;;  %v2896_v38 = vld [vmem:[#allocation9 + $0xd4] sm:$0xf0]  ;;  %v2390_v39 = vor.u32 %v2857_v30, %v2387_v31  ;;  %v2839_v40 = vld [vmem:[#allocation7 + $0x14] sm:$0xf]  ;;  %v2474_v44 = vor.u32 %v2880_v35, %v2473_v34 }
  0x8e   : > { %815 = vmatpush.bf16.msra.mxu1 %v2386_v50  ;;  %v2315_v41 = vld [vmem:[#allocation7 + $0x18] sm:$0xf0]  ;;  %v2855_v42 = vld [vmem:[#allocation7 + $0x94] sm:$0xf]  ;;  %v2465_v45 = vld [vmem:[#allocation9 + $0x40] sm:$0xf]  ;;  %v2538_v46 = vor.u32 %v2896_v38, %v2537_v36 }
  0x8f   : > { %v2379_v43 = vld [vmem:[#allocation7 + $0x98] sm:$0xf0]  ;;  %v2878_v47 = vld [vmem:[#allocation9 + $0x44] sm:$0xf0]  ;;  %v2529_v48 = vld [vmem:[#allocation9 + $0xc0] sm:$0xf]  ;;  %v2318_v50 = vor.u32 %v2839_v40, %v2315_v41 }
  0x90   : > { %827 = vmatpush.bf16.msra.mxu2 %v2334_v23  ;;  %v2894_v49 = vld [vmem:[#allocation9 + $0xc4] sm:$0xf0]  ;;  %v2382_v51 = vor.u32 %v2855_v42, %v2379_v43  ;;  %v2837_v52 = vld [vmem:[#allocation7 + $0x4] sm:$0xf]  ;;  %v2307_v53 = vld [vmem:[#allocation7 + $0x8] sm:$0xf0]  ;;  %v2466_v58 = vor.u32 %v2878_v47, %v2465_v45 }
  0x91   : > { %803 = vmatpush.bf16.msra.mxu0 %v2314_v61  ;;  %840 = vmatpush.bf16.msra.mxu3 %v2398_v26  ;;  %v2883_v54 = vld [vmem:[#allocation9 + $0x74] sm:$0xf]  ;;  %v2491_v55 = vld [vmem:[#allocation9 + $0x78] sm:$0xf0]  ;;  %v2853_v56 = vld [vmem:[#allocation7 + $0x84] sm:$0xf]  ;;  %v2530_v61 = vor.u32 %v2894_v49, %v2529_v48 }
  0x92   : > { %816 = vmatpush.bf16.msra.mxu1 %v2378_v0  ;;  %v2371_v57 = vld [vmem:[#allocation7 + $0x88] sm:$0xf0]  ;;  %v2899_v59 = vld [vmem:[#allocation9 + $0xf4] sm:$0xf]  ;;  %v2555_v60 = vld [vmem:[#allocation9 + $0xf8] sm:$0xf0]  ;;  %v2310_v0 = vor.u32 %v2837_v52, %v2307_v53  ;;  %v2494_v3 = vor.u32 %v2883_v54, %v2491_v55 }
  0x93   : > { %v2457_v62 = vld [vmem:[#allocation9 + $0x30] sm:$0xf]  ;;  %v2876_v63 = vld [vmem:[#allocation9 + $0x34] sm:$0xf0]  ;;  %v2374_v4 = vor.u32 %v2853_v56, %v2371_v57  ;;  %v2558_v5 = vor.u32 %v2899_v59, %v2555_v60  ;;  %v2881_v6 = vld [vmem:[#allocation9 + $0x64] sm:$0xf] }
  0x94   : > { %828 = vmatpush.bf16.msra.mxu2 %v2326_v37  ;;  %v2521_v1 = vld [vmem:[#allocation9 + $0xb0] sm:$0xf]  ;;  %v2892_v2 = vld [vmem:[#allocation9 + $0xb4] sm:$0xf0]  ;;  %v2483_v7 = vld [vmem:[#allocation9 + $0x68] sm:$0xf0]  ;;  %v2458_v8 = vor.u32 %v2876_v63, %v2457_v62 }
  0x95   : > { %804 = vmatpush.bf16.msra.mxu0 %v2306_v12  ;;  %841 = vmatpush.bf16.msra.mxu3 %v2390_v39  ;;  %v2897_v9 = vld [vmem:[#allocation9 + $0xe4] sm:$0xf]  ;;  %v2547_v10 = vld [vmem:[#allocation9 + $0xe8] sm:$0xf0]  ;;  %v2522_v11 = vor.u32 %v2892_v2, %v2521_v1  ;;  %v2449_v12 = vld [vmem:[#allocation9 + $0x20] sm:$0xf] }
  0x96   : > { %817 = vmatpush.bf16.msra.mxu1 %v2370_v16  ;;  %v2874_v13 = vld [vmem:[#allocation9 + $0x24] sm:$0xf0]  ;;  %v2513_v14 = vld [vmem:[#allocation9 + $0xa0] sm:$0xf]  ;;  %v2486_v16 = vor.u32 %v2881_v6, %v2483_v7  ;;  %v2879_v18 = vld [vmem:[#allocation9 + $0x54] sm:$0xf] }
  0x97   : > { %v2890_v15 = vld [vmem:[#allocation9 + $0xa4] sm:$0xf0]  ;;  %v2450_v20 = vor.u32 %v2874_v13, %v2449_v12  ;;  %v2895_v21 = vld [vmem:[#allocation9 + $0xd4] sm:$0xf]  ;;  %v2539_v22 = vld [vmem:[#allocation9 + $0xd8] sm:$0xf0] }
  0x98   : > { %805 = vmatmul.bf16.vlgmr.msra.gmra.mxu0 %v3777_v25  ;;  %829 = vmatpush.bf16.msra.mxu2 %v2318_v50  ;;  %v2514_v23 = vor.u32 %v2890_v15, %v2513_v14  ;;  %v2441_v24 = vld [vmem:[#allocation9 + $0x10] sm:$0xf]  ;;  %v2872_v26 = vld [vmem:[#allocation9 + $0x14] sm:$0xf0]  ;;  %v2542_v31 = vor.u32 %v2895_v21, %v2539_v22  ;;  %v2893_v35 = vld [vmem:[#allocation9 + $0xc4] sm:$0xf] }
  0x99   : > { %1051 = vmatpush.bf16.msrb.mxu0 %v2490_v17  ;;  %818 = vmatmul.bf16.vlgmr.msra.gmra.mxu1 %v3779_v29  ;;  %v2550_v17 = vor.u32 %v2897_v9, %v2547_v10  ;;  %v2505_v27 = vld [vmem:[#allocation9 + $0x90] sm:$0xf]  ;;  %v2888_v28 = vld [vmem:[#allocation9 + $0x94] sm:$0xf0]  ;;  %v2442_v34 = vor.u32 %v2872_v26, %v2441_v24  ;;  %v2531_v36 = vld [vmem:[#allocation9 + $0xc8] sm:$0xf0] }
  0x9a   : > { %1064 = vmatpush.bf16.msrb.mxu1 %v2554_v19  ;;  %842 = vmatpush.bf16.msra.mxu3 %v2382_v51  ;;  %v2475_v19 = vld [vmem:[#allocation9 + $0x58] sm:$0xf0]  ;;  %v2433_v37 = vld [vmem:[#allocation9] sm:$0xf]  ;;  %v2870_v38 = vld [vmem:[#allocation9 + $0x4] sm:$0xf0]  ;;  %v2534_v43 = vor.u32 %v2893_v35, %v2531_v36 }
  0x9b   : > { %v2478_v30 = vor.u32 %v2879_v18, %v2475_v19  ;;  %v2497_v39 = vld [vmem:[#allocation9 + $0x80] sm:$0xf]  ;;  %v2886_v40 = vld [vmem:[#allocation9 + $0x84] sm:$0xf0]  ;;  %v2617_v41 = vld [vmem:[#allocation10 + $0x70] sm:$0xf] }
  0x9c   : > { %830 = vmatpush.bf16.msra.mxu2 %v2310_v0  ;;  %v2916_v42 = vld [vmem:[#allocation10 + $0x74] sm:$0xf0]  ;;  %v2459_v45 = vld [vmem:[#allocation9 + $0x38] sm:$0xf0]  ;;  %v849_v47 = vld [vmem:[%s494_s25] sm:$0xff]  ;;  %v2498_v50 = vor.u32 %v2886_v40, %v2497_v39  ;;  %s3503_s29 = smov 32  }
  0x9d   : > { %1052 = vmatpush.bf16.msrb.mxu0 %v2482_v32  ;;  %v2877_v32 = vld [vmem:[#allocation9 + $0x44] sm:$0xf]  ;;  %v2891_v48 = vld [vmem:[#allocation9 + $0xb4] sm:$0xf]  ;;  %v2523_v49 = vld [vmem:[#allocation9 + $0xb8] sm:$0xf0]  ;;  %v2618_v52 = vor.u32 %v2916_v42, %v2617_v41  ;;  %v851_v56 = vpack.c.bf16 %v849_v47, %v849_v47 }
  0x9e   : > { %1065 = vmatpush.bf16.msrb.mxu1 %v2546_v33  ;;  %843 = vmatpush.bf16.msra.mxu3 %v2374_v4  ;;  %v2467_v33 = vld [vmem:[#allocation9 + $0x48] sm:$0xf0]  ;;  %v2609_v54 = vld [vmem:[#allocation10 + $0x60] sm:$0xf]  ;;  %v2914_v55 = vld [vmem:[#allocation10 + $0x64] sm:$0xf0]  ;;  %v2526_v57 = vor.u32 %v2891_v48, %v2523_v49 }
  0x9f   : > { %831 = vmatmul.bf16.vlgmr.msra.gmra.mxu2 %v3777_v25  ;;  %v2506_v25 = vor.u32 %v2888_v28, %v2505_v27  ;;  %v850_v51 = vld [vmem:[%s494_s25 + $0x8] sm:$0xff]  ;;  %v2610_v63 = vor.u32 %v2914_v55, %v2609_v54  ;;  %v2871_v2 = vld [vmem:[#allocation9 + $0x14] sm:$0xf]  ;;  %v2885_v10 = vld [vmem:[#allocation9 + $0x84] sm:$0xf]  ;;  %s3504_s4 = smov 96  }
  0xa0   : > { %1077 = vmatpush.bf16.msrb.mxu2 %v2494_v3  ;;  %v2451_v59 = vld [vmem:[#allocation9 + $0x28] sm:$0xf0]  ;;  %v852_v60 = vpack.c.bf16 %v850_v51, %v850_v51  ;;  %v2443_v3 = vld [vmem:[#allocation9 + $0x18] sm:$0xf0]  ;;  %v2887_v4 = vld [vmem:[#allocation9 + $0x94] sm:$0xf] }
  0xa1   : > { %1053 = vmatpush.bf16.msrb.mxu0 %v2474_v44  ;;  %844 = vmatmul.bf16.vlgmr.msra.gmra.mxu3 %v3779_v29  ;;  %v2470_v29 = vor.u32 %v2877_v32, %v2467_v33  ;;  %v2875_v44 = vld [vmem:[#allocation9 + $0x34] sm:$0xf]  ;;  %v2515_v62 = vld [vmem:[#allocation9 + $0xa8] sm:$0xf0]  ;;  %v2446_v6 = vor.u32 %v2871_v2, %v2443_v3  ;;  %v2601_v14 = vld [vmem:[#allocation10 + $0x50] sm:$0xf] }
  0xa2   : > { %1066 = vmatpush.bf16.msrb.mxu1 %v2538_v46  ;;  %1090 = vmatpush.bf16.msrb.mxu3 %v2558_v5  ;;  %v2434_v46 = vor.u32 %v2870_v38, %v2433_v37  ;;  %v2462_v53 = vor.u32 %v2875_v44, %v2459_v45  ;;  %v2507_v5 = vld [vmem:[#allocation9 + $0x98] sm:$0xf0]  ;;  %v2435_v9 = vld [vmem:[#allocation9 + $0x8] sm:$0xf0]  ;;  %v2912_v15 = vld [vmem:[#allocation10 + $0x54] sm:$0xf0] }
  0xa3   : > { %v2510_v7 = vor.u32 %v2887_v4, %v2507_v5  ;;  %v2910_v18 = vld [vmem:[#allocation10 + $0x44] sm:$0xf0]  ;;  %v2908_v21 = vld [vmem:[#allocation10 + $0x34] sm:$0xf0]  ;;  %v2569_v27 = vld [vmem:[#allocation10 + $0x10] sm:$0xf] }
  0xa4   : > { %1078 = vmatpush.bf16.msrb.mxu2 %v2486_v16  ;;  %v2602_v16 = vor.u32 %v2912_v15, %v2601_v14  ;;  %v2906_v24 = vld [vmem:[#allocation10 + $0x24] sm:$0xf0]  ;;  %v2904_v28 = vld [vmem:[#allocation10 + $0x14] sm:$0xf0]  ;;  %v631_v42 = vld [vmem:[#allocation12] sm:$0x3] }
  0xa5   : > { %1054 = vmatpush.bf16.msrb.mxu0 %v2466_v58  ;;  %v2873_v58 = vld [vmem:[#allocation9 + $0x24] sm:$0xf]  ;;  %v2902_v32 = vld [vmem:[#allocation10 + $0x4] sm:$0xf0]  ;;  %v633_v45 = vperm.slane %v631_v42, 0  ;;  %vm1380_vm1 = vcmask 64512  }
  0xa6   : > { %1067 = vmatpush.bf16.msrb.mxu1 %v2530_v61  ;;  %1091 = vmatpush.bf16.msrb.mxu3 %v2550_v17  ;;  %v2889_v61 = vld [vmem:[#allocation9 + $0xa4] sm:$0xf]  ;;  %v2454_v0 = vor.u32 %v2873_v58, %v2451_v59  ;;  %v2593_v17 = vld [vmem:[#allocation10 + $0x40] sm:$0xf]  ;;  %v2932_v51 = vld [vmem:[#allocation10 + $0xf4] sm:$0xf0] }
  0xa7   : > { %v2518_v1 = vor.u32 %v2889_v61, %v2515_v62  ;;  %v2594_v19 = vor.u32 %v2910_v18, %v2593_v17  ;;  %v2673_v61 = vld [vmem:[#allocation10 + $0xe0] sm:$0xf]  ;;  %v2930_v62 = vld [vmem:[#allocation10 + $0xe4] sm:$0xf0]  ;;  %v2665_v2 = vld [vmem:[#allocation10 + $0xd0] sm:$0xf] }
  0xa8   : > { %1079 = vmatpush.bf16.msrb.mxu2 %v2478_v30  ;;  %v2570_v30 = vor.u32 %v2904_v28, %v2569_v27  ;;  %v2928_v3 = vld [vmem:[#allocation10 + $0xd4] sm:$0xf0]  ;;  %v2683_v14 = vld [vmem:[#allocation10 + $0xf8] sm:$0xf0]  ;;  %v2909_v28 = vld [vmem:[#allocation10 + $0x44] sm:$0xf] }
  0xa9   : > { %1055 = vmatpush.bf16.msrb.mxu0 %v2458_v8  ;;  %v2869_v8 = vld [vmem:[#allocation9 + $0x4] sm:$0xf]  ;;  %v2603_v17 = vld [vmem:[#allocation10 + $0x58] sm:$0xf0]  ;;  %vm1394_vm2 = vcmask 1043456   ;;  %vm1833_vm3 = vcmask 523264  }
  0xaa   : > { %1068 = vmatpush.bf16.msrb.mxu1 %v2522_v11  ;;  %1092 = vmatpush.bf16.msrb.mxu3 %v2542_v31  ;;  %v2499_v11 = vld [vmem:[#allocation9 + $0x88] sm:$0xf0]  ;;  %v2438_v12 = vor.u32 %v2869_v8, %v2435_v9  ;;  %v2561_v31 = vld [vmem:[#allocation10] sm:$0xf]  ;;  %v2666_v8 = vor.u32 %v2928_v3, %v2665_v2  ;;  %v2901_v3 = vld [vmem:[#allocation10 + $0x4] sm:$0xf] }
  0xab   : > { %v2502_v13 = vor.u32 %v2885_v10, %v2499_v11  ;;  %v2562_v33 = vor.u32 %v2902_v32, %v2561_v31  ;;  %v2657_v10 = vld [vmem:[#allocation10 + $0xc0] sm:$0xf]  ;;  %v2926_v11 = vld [vmem:[#allocation10 + $0xc4] sm:$0xf0]  ;;  %vm1835_vm4 = vcmask 785408   ;;  %p589_p1 = scmp.lt.s32.totalorder %s3589_s24, 1 }
  0xac   : > { %1080 = vmatpush.bf16.msrb.mxu2 %v2470_v29  ;;  %v3794_v29 = vld [vmem:[#allocation13] sm:$0x3] }
  0xad   : > { %1056 = vmatpush.bf16.msrb.mxu0 %v2450_v20  ;;  %v2585_v20 = vld [vmem:[#allocation10 + $0x30] sm:$0xf]  ;;  %v887_v41 = vperm.slane %v3794_v29, 0  ;;  %v888_v15 = vperm.slane %v3794_v29, 1  ;;  %v2675_v29 = vld [vmem:[#allocation10 + $0xe8] sm:$0xf0] }
  0xae   : > { %1069 = vmatpush.bf16.msrb.mxu1 %v2514_v23  ;;  %1093 = vmatpush.bf16.msrb.mxu3 %v2534_v43  ;;  %v2586_v22 = vor.u32 %v2908_v21, %v2585_v20  ;;  %v2577_v23 = vld [vmem:[#allocation10 + $0x20] sm:$0xf]  ;;  %v2649_v21 = vld [vmem:[#allocation10 + $0xb0] sm:$0xf]  ;;  %s3976_s24 = smov (!%p589_p1, %s3589_s24), 1 }
  0xaf   : > { %v2578_v26 = vor.u32 %v2906_v24, %v2577_v23  ;;  %s2836_s23 = sshll.u32 %s3976_s24, 3 }
  0xb0   : > { %1081 = vmatpush.bf16.msrb.mxu2 %v2462_v53  ;;  %s593_s9 = scalar_lea.vmem %s3939_s11, %s2836_s23 }
  0xb1   : > { %1057 = vmatpush.bf16.msrb.mxu0 %v2442_v34  ;;  %v1103_v34 = vld [vmem:[%s504_s20] sm:$0xff] }
  0xb2   : > { %1070 = vmatpush.bf16.msrb.mxu1 %v2506_v25  ;;  %1094 = vmatpush.bf16.msrb.mxu3 %v2526_v57  ;;  %v3791_v35 = vpack.c.bf16 %v1103_v34, %v1103_v34  ;;  %v2922_v34 = vld [vmem:[#allocation10 + $0xa4] sm:$0xf0] }
  0xb4   : > { %1082 = vmatpush.bf16.msrb.mxu2 %v2454_v0  ;;  %v2674_v0 = vor.u32 %v2930_v62, %v2673_v61  ;;  %v2659_v61 = vld [vmem:[#allocation10 + $0xc8] sm:$0xf0] }
  0xb5   : > { %1058 = vmatpush.bf16.msrb.mxu0 %v2434_v46 }
  0xb6   : > { %1071 = vmatpush.bf16.msrb.mxu1 %v2498_v50  ;;  %1095 = vmatpush.bf16.msrb.mxu3 %v2518_v1  ;;  %v2681_v50 = vld [vmem:[#allocation10 + $0xf0] sm:$0xf]  ;;  %v2619_v1 = vld [vmem:[#allocation10 + $0x78] sm:$0xf0] }
  0xb8   : > { %1059 = vmatmul.bf16.vlgmr.msrb.gmra.mxu0 %v851_v56  ;;  %1083 = vmatpush.bf16.msrb.mxu2 %v2446_v6  ;;  %v2913_v6 = vld [vmem:[#allocation10 + $0x64] sm:$0xf] }
  0xb9   : > { %1305 = vmatpush.bf16.msra.mxu0 %v2618_v52  ;;  %1072 = vmatmul.bf16.vlgmr.msrb.gmra.mxu1 %v852_v60  ;;  %v2682_v52 = vor.u32 %v2932_v51, %v2681_v50  ;;  %v2927_v50 = vld [vmem:[#allocation10 + $0xd4] sm:$0xf]  ;;  %v2667_v51 = vld [vmem:[#allocation10 + $0xd8] sm:$0xf0] }
  0xba   : > { %1096 = vmatpush.bf16.msrb.mxu3 %v2510_v7  ;;  %v2611_v7 = vld [vmem:[#allocation10 + $0x68] sm:$0xf0] }
  0xbb   : > { %1318 = vmatpush.bf16.msra.mxu1 %v2682_v52 }
  0xbc   : > { %1084 = vmatpush.bf16.msrb.mxu2 %v2438_v12  ;;  %v2614_v12 = vor.u32 %v2913_v6, %v2611_v7  ;;  %v2921_v7 = vld [vmem:[#allocation10 + $0xa4] sm:$0xf] }
  0xbd   : > { %1306 = vmatpush.bf16.msra.mxu0 %v2610_v63  ;;  %v2915_v63 = vld [vmem:[#allocation10 + $0x74] sm:$0xf] }
  0xbe   : > { %1097 = vmatpush.bf16.msrb.mxu3 %v2502_v13  ;;  %v2622_v5 = vor.u32 %v2915_v63, %v2619_v1  ;;  %v2931_v13 = vld [vmem:[#allocation10 + $0xf4] sm:$0xf]  ;;  %v2651_v1 = vld [vmem:[#allocation10 + $0xb8] sm:$0xf0] }
  0xbf   : > { %1085 = vmatmul.bf16.vlgmr.msrb.gmra.mxu2 %v851_v56  ;;  %v634_v56 = vperm.slane %v631_v42, 1  ;;  %1319 = vmatpush.bf16.msra.mxu1 %v2674_v0  ;;  %v2686_v18 = vor.u32 %v2931_v13, %v2683_v14  ;;  %v2587_v42 = vld [vmem:[#allocation10 + $0x38] sm:$0xf0]  ;;  %v2923_v0 = vld [vmem:[#allocation10 + $0xb4] sm:$0xf] }
  0xc0   : > { %1331 = vmatpush.bf16.msra.mxu2 %v2622_v5  ;;  %v2654_v5 = vor.u32 %v2923_v0, %v2651_v1  ;;  %v2917_v13 = vld [vmem:[#allocation10 + $0x84] sm:$0xf]  ;;  %v2627_v14 = vld [vmem:[#allocation10 + $0x88] sm:$0xf0] }
  0xc1   : > { %1098 = vmatmul.bf16.vlgmr.msrb.gmra.mxu3 %v852_v60  ;;  %1307 = vmatpush.bf16.msra.mxu0 %v2602_v16  ;;  %v2911_v16 = vld [vmem:[#allocation10 + $0x54] sm:$0xf] }
  0xc2   : > { %1344 = vmatpush.bf16.msra.mxu3 %v2686_v18  ;;  %v2606_v24 = vor.u32 %v2911_v16, %v2603_v17 }
  0xc3   : > { %1320 = vmatpush.bf16.msra.mxu1 %v2666_v8  ;;  %v2643_v8 = vld [vmem:[#allocation10 + $0xa8] sm:$0xf0] }
  0xc4   : > { %1332 = vmatpush.bf16.msra.mxu2 %v2614_v12 }
  0xc5   : > { %1308 = vmatpush.bf16.msra.mxu0 %v2594_v19  ;;  %v2658_v19 = vor.u32 %v2926_v11, %v2657_v10  ;;  %v2919_v10 = vld [vmem:[#allocation10 + $0x94] sm:$0xf]  ;;  %v2635_v11 = vld [vmem:[#allocation10 + $0x98] sm:$0xf0] }
  0xc6   : > { %v2638_v12 = vor.u32 %v2919_v10, %v2635_v11 }
  0xc7   : > { %1321 = vmatpush.bf16.msra.mxu1 %v2658_v19 }
  0xc8   : > { %1333 = vmatpush.bf16.msra.mxu2 %v2606_v24 }
  0xc9   : > { %1309 = vmatpush.bf16.msra.mxu0 %v2586_v22  ;;  %v2924_v22 = vld [vmem:[#allocation10 + $0xb4] sm:$0xf0] }
  0xca   : > { %v2650_v31 = vor.u32 %v2924_v22, %v2649_v21 }
  0xcc   : > { %1322 = vmatpush.bf16.msra.mxu1 %v2650_v31 }
  0xcd   : > { %1310 = vmatpush.bf16.msra.mxu0 %v2578_v26 }
  0xd1   : > { %1311 = vmatpush.bf16.msra.mxu0 %v2570_v30  ;;  %v2595_v30 = vld [vmem:[#allocation10 + $0x48] sm:$0xf0] }
  0xd5   : > { %1312 = vmatpush.bf16.msra.mxu0 %v2562_v33  ;;  %v2641_v33 = vld [vmem:[#allocation10 + $0xa0] sm:$0xf] }
  0xd8   : > { %1313 = vmatmul.bf16.vlgmr.msra.gmra.mxu0 %v3791_v35 }
 0x115   : > { %v806_v36 = vpop.f32.mrf.mxu0 }
 0x116   : > { %v819_v25 = vpop.f32.mrf.mxu1  ;;  %v807_v53 = vadd.f32 %v806_v36, %v633_v45  ;;  %v2598_v36 = vor.u32 %v2909_v28, %v2595_v30  ;;  %v2633_v45 = vld [vmem:[#allocation10 + $0x90] sm:$0xf] }
 0x118   : > { %v820_v58 = vadd.f32 %v819_v25, %v807_v53  ;;  %1334 = vmatpush.bf16.msra.mxu2 %v2598_v36  ;;  %v2670_v53 = vor.u32 %v2927_v50, %v2667_v51 }
 0x11a   : > { %v1357_v4 = vpack.c.bf16 %v820_v58, %v820_v58  ;;  %v2903_v58 = vld [vmem:[#allocation10 + $0x14] sm:$0xf] }
 0x11d   : > { %v808_v37 = vpop.f32.mrf.mxu0 }
 0x11e   : > { %v821_v38 = vpop.f32.mrf.mxu1  ;;  %v2642_v37 = vor.u32 %v2922_v34, %v2641_v33 }
 0x120   : > { %1323 = vmatpush.bf16.msra.mxu1 %v2642_v37 }
 0x122   : > { %v832_v39 = vpop.f32.mrf.mxu2 }
 0x123   : > { %v833_v60 = vadd.f32 %v832_v39, %v634_v56  ;;  %v1104_v56 = vld [vmem:[%s504_s20 + $0x8] sm:$0xff] }
 0x124   : > { %v845_v40 = vpop.f32.mrf.mxu3  ;;  %v1106_v2 = vpack.c.bf16 %v1104_v56, %v1104_v56 }
 0x125   : > { %v846_v9 = vadd.f32 %v845_v40, %v833_v60  ;;  %v2929_v40 = vld [vmem:[#allocation10 + $0xe4] sm:$0xf] }
 0x126   : > { %v2925_v60 = vld [vmem:[#allocation10 + $0xc4] sm:$0xf] }
 0x127   : > { %v3805_v20 = vpack.c.bf16 %v846_v9, %v846_v9  ;;  %v2662_v63 = vor.u32 %v2925_v60, %v2659_v61  ;;  %v2646_v9 = vor.u32 %v2921_v7, %v2643_v8 }
 0x12a   : > { %v834_v44 = vpop.f32.mrf.mxu2 }
 0x12c   : > { %v847_v48 = vpop.f32.mrf.mxu3 }
 0x135   : > { %v1060_v43 = vpop.f32.mrf.mxu0 }
 0x136   : > { %v1061_v46 = vadd.f32 %v1060_v43, %v887_v41  ;;  %v1073_v47 = vpop.f32.mrf.mxu1  ;;  %v2907_v41 = vld [vmem:[#allocation10 + $0x34] sm:$0xf]  ;;  %v2678_v43 = vor.u32 %v2929_v40, %v2675_v29 }
 0x137   : > { %v2590_v44 = vor.u32 %v2907_v41, %v2587_v42  ;;  %v1139_v41 = vld [vmem:[%s3936_s8] sm:$0x3] }
 0x138   : > { %v1074_v49 = vadd.f32 %v1073_v47, %v1061_v46  ;;  %1345 = vmatpush.bf16.msra.mxu3 %v2678_v43  ;;  %v2920_v46 = vld [vmem:[#allocation10 + $0x94] sm:$0xf0]  ;;  %v2905_v47 = vld [vmem:[#allocation10 + $0x24] sm:$0xf]  ;;  %v1141_v42 = vperm.slane %v1139_v41, 0 }
 0x139   : > { %1335 = vmatpush.bf16.msra.mxu2 %v2590_v44  ;;  %v2634_v48 = vor.u32 %v2920_v46, %v2633_v45 }
 0x13a   : > { %v1358_v54 = vpack.c.bf16 %v1074_v49, %v1074_v49  ;;  %v2579_v49 = vld [vmem:[#allocation10 + $0x28] sm:$0xf0] }
 0x13b   : > { %v2582_v52 = vor.u32 %v2905_v47, %v2579_v49  ;;  %1324 = vmatpush.bf16.msra.mxu1 %v2634_v48  ;;  %v1142_v49 = vperm.slane %v1139_v41, 1 }
 0x13c   : > { %1474 = vrot.lane.b32.xlu2 %v1358_v54, %s3502_s30  ;;  %1530 = vrot.lane.b32.xlu1 %v1358_v54, %s3503_s29  ;;  %v1365_v55 = vsel %vm1360_vm0, %v1358_v54, 0 }
 0x13d   : > { %1417 = vrot.lane.b32.xlu0 %v1358_v54, %s3504_s4  ;;  %v1062_v57 = vpop.f32.mrf.mxu0  ;;  %1374 = vmatpush.bf16.xpose.msrb.mxu0 %v1365_v55  ;;  %v2625_v54 = vld [vmem:[#allocation10 + $0x80] sm:$0xf]  ;;  %v2918_v55 = vld [vmem:[#allocation10 + $0x84] sm:$0xf0] }
 0x13e   : > { %v1075_v59 = vpop.f32.mrf.mxu1  ;;  %v2626_v57 = vor.u32 %v2918_v55, %v2625_v54  ;;  %1346 = vmatpush.bf16.msra.mxu3 %v2670_v53  ;;  %1336 = vmatpush.bf16.msra.mxu2 %v2582_v52 }
 0x13f   : > { %v2571_v59 = vld [vmem:[#allocation10 + $0x18] sm:$0xf0] }
 0x140   : > { %v2574_v62 = vor.u32 %v2903_v58, %v2571_v59  ;;  %1325 = vmatpush.bf16.msra.mxu1 %v2626_v57 }
 0x142   : > { %v1086_v23 = vpop.f32.mrf.mxu2  ;;  %1347 = vmatpush.bf16.msra.mxu3 %v2662_v63  ;;  %1337 = vmatpush.bf16.msra.mxu2 %v2574_v62 }
 0x143   : > { %v1087_v26 = vadd.f32 %v1086_v23, %v888_v15  ;;  %1326 = vmatmul.bf16.vlgmr.msra.gmra.mxu1 %v1106_v2  ;;  %v2630_v15 = vor.u32 %v2917_v13, %v2627_v14 }
 0x144   : > { %1528 = vrot.lane.b32.xlu1 %v1357_v4, %s3503_s29  ;;  %2687 = vmatmul.msk.bf16.vlgmr.msrb.gmra.mxu0 %vm1360_vm0, %v1357_v4  ;;  %v1099_v27 = vpop.f32.mrf.mxu3 }
 0x145   : > { %1414 = vrot.lane.b32.xlu0 %v1357_v4, %s3504_s4  ;;  %v1100_v32 = vadd.f32 %v1099_v27, %v1087_v26 }
 0x146   : > { %1348 = vmatpush.bf16.msra.mxu3 %v2654_v5 }
 0x147   : > { %v3810_v25 = vpack.c.bf16 %v1100_v32, %v1100_v32 }
 0x149   : > { %1641 = vrot.lane.b32.xlu2 %v3810_v25, %s3504_s4  ;;  %v1591_v18 = vsel %vm1360_vm0, %v3810_v25, 0 }
 0x14a   : > { %v1088_v38 = vpop.f32.mrf.mxu2  ;;  %1349 = vmatpush.bf16.msra.mxu3 %v2646_v9 }
 0x14c   : > { %1638 = vrot.lane.b32.xlu1 %v3805_v20, %s3504_s4  ;;  %v1101_v39 = vpop.f32.mrf.mxu3 }
 0x14d   : > { %1472 = vrot.lane.b32.xlu0 %v1357_v4, %s3502_s30  ;;  %v2563_v4 = vld [vmem:[#allocation10 + $0x8] sm:$0xf0] }
 0x14e   : > { %v2566_v6 = vor.u32 %v2901_v3, %v2563_v4  ;;  %1350 = vmatpush.bf16.msra.mxu3 %v2638_v12 }
 0x150   : > { %1338 = vmatpush.bf16.msra.mxu2 %v2566_v6 }
 0x151   : > { %1754 = vrot.lane.b32.xlu2 %v3810_v25, %s3503_s29 }
 0x152   : > { %1351 = vmatpush.bf16.msra.mxu3 %v2630_v15 }
 0x153   : > { %1339 = vmatmul.bf16.vlgmr.msra.gmra.mxu2 %v3791_v35 }
 0x154   : > { %1698 = vrot.lane.b32.xlu1 %v3810_v25, %s3502_s30 }
 0x155   : > { %1752 = vrot.lane.b32.xlu0 %v3805_v20, %s3503_s29  ;;  %v1314_v16 = vpop.f32.mrf.mxu0  ;;  %1352 = vmatmul.bf16.vlgmr.msra.gmra.mxu3 %v1106_v2 }
 0x156   : > { %v1315_v43 = vadd.f32 %v1314_v16, %v1141_v42 }
 0x159   : > { %1696 = vrot.lane.b32.xlu2 %v3805_v20, %s3502_s30 }
 0x15d   : > { %v1316_v21 = vpop.f32.mrf.mxu0 }
 0x196   : > { %v1475_v17 = vpop.permute.xlu2 %1474 }
 0x197   : > { %v1480_v19 = vsel %vm1360_vm0, %v1475_v17, 0 }
 0x198   : > { %1489 = vmatpush.bf16.xpose.msra.mxu0 %v1480_v19 }
 0x1a0   : > { %1600 = vmatpush.bf16.xpose.msrb.mxu0 %v1591_v18 }
 0x1a3   : > { %v1642_v26 = vpop.permute.xlu2 %1641 }
 0x1a4   : > { %v1647_v28 = vsel %vm1360_vm0, %v1642_v26, 0 }
 0x1ab   : > { %v1755_v36 = vpop.permute.xlu2 %1754 }
 0x1ac   : > { %v1760_v25 = vsel %vm1360_vm0, %v1755_v36, 0 }
 0x1ae   : > { %v1531_v22 = vpop.permute.xlu1 %1530 }
 0x1af   : > { %v1536_v35 = vsel %vm1360_vm0, %v1531_v22, 0  ;;  %v1418_v23 = vpop.permute.xlu0 %1417 }
 0x1b0   : > { %v1423_v24 = vsel %vm1360_vm0, %v1418_v23, 0 }
 0x1b1   : > { %1432 = vmatpush.bf16.xpose.msrb.mxu2 %v1423_v24 }
 0x1b3   : > { %v1697_v40 = vpop.permute.xlu2 %1696 }
 0x1b6   : > { %v1529_v27 = vpop.permute.xlu1 %1528 }
 0x1b7   : > { %v1415_v30 = vpop.permute.xlu0 %1414 }
 0x1b8   : > { %2689 = vmatmul.msk.bf16.vlgmr.msrb.gmra.mxu2 %vm1360_vm0, %v1415_v30 }
 0x1b9   : > { %1545 = vmatpush.bf16.xpose.msra.mxu2 %v1536_v35 }
 0x1be   : > { %v1639_v31 = vpop.permute.xlu1 %1638 }
 0x1bf   : > { %v1473_v32 = vpop.permute.xlu0 %1472 }
 0x1c0   : > { %2691 = vmatmul.msk.bf16.vlgmr.msra.gmra.mxu0 %vm1360_vm0, %v1473_v32  ;;  %v1327_v44 = vpop.f32.mrf.mxu1 }
 0x1c1   : > { %1656 = vmatpush.bf16.xpose.msrb.mxu2 %v1647_v28  ;;  %v1376_v33 = vpop.f32.mrf.mxu0  ;;  %v1328_v45 = vadd.f32 %v1327_v44, %v1315_v43 }
 0x1c2   : > { %v1381_v34 = vsel %vm1380_vm1, %v1376_v33, -inf }
 0x1c3   : > { %1382 = vmax.xlane.f32.xlu1 %v1381_v34  ;;  %v1359_v46 = vpack.c.bf16 %v1328_v45, %v1328_v45 }
 0x1c5   : > { %1449 = vrot.lane.b32.xlu2 %v1359_v46, %s3504_s4 }
 0x1c6   : > { %v1699_v37 = vpop.permute.xlu1 %1698 }
 0x1c7   : > { %v1704_v38 = vsel %vm1360_vm0, %v1699_v37, 0  ;;  %v1753_v29 = vpop.permute.xlu0 %1752 }
 0x1c8   : > { %2693 = vmatmul.msk.bf16.vlgmr.msra.gmra.mxu2 %vm1360_vm0, %v1529_v27  ;;  %1713 = vmatpush.bf16.xpose.msra.mxu0 %v1704_v38  ;;  %v1329_v47 = vpop.f32.mrf.mxu1 }
 0x1c9   : > { %v1378_v39 = vpop.f32.mrf.mxu0  ;;  %1769 = vmatpush.bf16.xpose.msra.mxu2 %v1760_v25 }
 0x1d0   : > { %2695 = vmatmul.msk.bf16.vlgmr.msrb.gmra.mxu0 %vm1360_vm0, %v3805_v20  ;;  %v1396_v20 = vsel %vm1394_vm2, %v1359_v46, 0 }
 0x1d1   : > { %1405 = vmatpush.bf16.msrb.mxu1 %v1396_v20 }
 0x1d6   : > { %v1340_v48 = vpop.f32.mrf.mxu2 }
 0x1d7   : > { %v1341_v50 = vadd.f32 %v1340_v48, %v1142_v49 }
 0x1d8   : > { %2697 = vmatmul.msk.bf16.vlgmr.msrb.gmra.mxu2 %vm1360_vm0, %v1639_v31  ;;  %v1353_v52 = vpop.f32.mrf.mxu3 }
 0x1d9   : > { %v1354_v53 = vadd.f32 %v1353_v52, %v1341_v50 }
 0x1db   : > { %v1586_v12 = vpack.c.bf16 %v1354_v53, %v1354_v53 }
 0x1dc   : > { %1561 = vrot.lane.b32.xlu1 %v1359_v46, %s3503_s29 }
 0x1dd   : > { %v1620_v42 = vsel %vm1394_vm2, %v1586_v12, 0 }
 0x1de   : > { %v1342_v51 = vpop.f32.mrf.mxu2 }
 0x1e0   : > { %2699 = vmatmul.msk.bf16.vlgmr.msra.gmra.mxu0 %vm1360_vm0, %v1697_v40  ;;  %v1355_v54 = vpop.f32.mrf.mxu3 }
 0x1e8   : > { %2701 = vmatmul.msk.bf16.vlgmr.msra.gmra.mxu2 %vm1360_vm0, %v1753_v29 }
 0x21f   : > { %v1450_v10 = vpop.permute.xlu2 %1449 }
 0x220   : > { %v1455_v11 = vsel %vm1394_vm2, %v1450_v10, 0 }
 0x221   : > { %1464 = vmatpush.bf16.msrb.mxu3 %v1455_v11 }
 0x236   : > { %v1383_v55 = vpop.xlane.xlu1 %1382 }
 0x237   : > { %v1384_v56 = vsub.f32 %v1376_v33, %v1383_v55 }
 0x239   : > { %v1385_v57 = vmul.f32 1.442695, %v1384_v56 }
 0x23b   : > { %3105 = vpow2.f32 %v1385_v57  ;;  %v1434_v58 = vpop.f32.mrf.mxu2 }
 0x23c   : > { %v1438_v1 = vsel %vm1380_vm1, %v1434_v58, -inf }
 0x23d   : > { %v1491_v59 = vpop.f32.mrf.mxu0 }
 0x23e   : > { %v1495_v60 = vsel %vm1380_vm1, %v1491_v59, -inf }
 0x23f   : > { %1496 = vmax.xlane.f32.xlu0 %v1495_v60 }
 0x241   : > { %v3849_v61 = vpop.eup %3105 }
 0x242   : > { %v1390_v62 = vpack.c.bf16 %v3849_v61, %v3849_v61  ;;  %v1387_v47 = vsel %vm1380_vm1, %v3849_v61, 0.0 }
 0x243   : > { %v1436_v63 = vpop.f32.mrf.mxu2 }
 0x244   : > { %2688 = vmatmul.msk.bf16.vlgmr.msrb.gmra.mxu1 %vm1380_vm1, %v1390_v62 }
 0x245   : > { %v1493_v0 = vpop.f32.mrf.mxu0 }
 0x247   : > { %1439 = vmax.xlane.f32.xlu0 %v1438_v1 }
 0x24b   : > { %v1547_v2 = vpop.f32.mrf.mxu2 }
 0x24c   : > { %v1551_v3 = vsel %vm1380_vm1, %v1547_v2, -inf }
 0x24d   : > { %1552 = vmax.xlane.f32.xlu2 %v1551_v3  ;;  %v1602_v4 = vpop.f32.mrf.mxu0 }
 0x24e   : > { %v1606_v5 = vsel %vm1380_vm1, %v1602_v4, -inf  ;;  %v1562_v18 = vpop.permute.xlu1 %1561 }
 0x24f   : > { %1607 = vmax.xlane.f32.xlu0 %v1606_v5  ;;  %v1567_v19 = vsel %vm1394_vm2, %v1562_v18, 0 }
 0x250   : > { %1576 = vmatpush.bf16.msra.mxu3 %v1567_v19 }
 0x253   : > { %v1549_v6 = vpop.f32.mrf.mxu2 }
 0x255   : > { %v1604_v7 = vpop.f32.mrf.mxu0 }
 0x25b   : > { %v3857_v8 = vpop.f32.mrf.mxu2 }
 0x25c   : > { %v1662_v21 = vsel %vm1380_vm1, %v3857_v8, -inf }
 0x25d   : > { %v3859_v9 = vpop.f32.mrf.mxu0 }
 0x25e   : > { %v1719_v22 = vsel %vm1380_vm1, %v3859_v9, -inf }
 0x263   : > { %v1660_v13 = vpop.f32.mrf.mxu2  ;;  %1673 = vrot.lane.b32.xlu0 %v1586_v12, %s3504_s4 }
 0x265   : > { %1505 = vrot.lane.b32.xlu2 %v1359_v46, %s3502_s30  ;;  %v1717_v14 = vpop.f32.mrf.mxu0 }
 0x26b   : > { %v3864_v15 = vpop.f32.mrf.mxu2 }
 0x26c   : > { %v1775_v16 = vsel %vm1380_vm1, %v3864_v15, -inf }
 0x26d   : > { %1776 = vmax.xlane.f32.xlu1 %v1775_v16 }
 0x273   : > { %v1773_v17 = vpop.f32.mrf.mxu2 }
 0x28d   : > { %1663 = vmax.xlane.f32.xlu0 %v1662_v21 }
 0x28e   : > { %1720 = vmax.xlane.f32.xlu2 %v1719_v22 }
 0x2a1   : > { %1785 = vrot.lane.b32.xlu0 %v1586_v12, %s3503_s29 }
 0x2a9   : > { %1729 = vrot.lane.b32.xlu0 %v1586_v12, %s3502_s30 }
 0x2b2   : > { %v1497_v35 = vpop.xlane.xlu0 %1496 }
 0x2b3   : > { %v1498_v23 = vsub.f32 %v1491_v59, %v1497_v35 }
 0x2b5   : > { %v1499_v24 = vmul.f32 1.442695, %v1498_v23 }
 0x2b7   : > { %3107 = vpow2.f32 %v1499_v24 }
 0x2ba   : > { %v1440_v26 = vpop.xlane.xlu0 %1439 }
 0x2bb   : > { %v1441_v27 = vsub.f32 %v1434_v58, %v1440_v26 }
 0x2bd   : > { %v3108_v28 = vpop.eup %3107  ;;  %v1442_v30 = vmul.f32 1.442695, %v1441_v27 }
 0x2be   : > { %v1501_v31 = vsel %vm1380_vm1, %v3108_v28, 0.0  ;;  %v1504_v44 = vpack.c.bf16 %v3108_v28, %v3108_v28 }
 0x2bf   : > { %3109 = vpow2.f32 %v1442_v30  ;;  %1502 = vadd.xlane.f32.xlu2 %v1501_v31 }
 0x2c0   : > { %v1553_v32 = vpop.xlane.xlu2 %1552 }
 0x2c1   : > { %v1554_v33 = vsub.f32 %v1547_v2, %v1553_v32  ;;  %v3876_v34 = vpop.f32.mrf.mxu1 }
 0x2c2   : > { %v1608_v38 = vpop.xlane.xlu0 %1607 }
 0x2c3   : > { %v1555_v36 = vmul.f32 1.442695, %v1554_v33  ;;  %v1609_v41 = vsub.f32 %v1602_v4, %v1608_v38 }
 0x2c5   : > { %v3110_v25 = vpop.eup %3109  ;;  %3111 = vpow2.f32 %v1555_v36  ;;  %v1610_v46 = vmul.f32 1.442695, %v1609_v41 }
 0x2c6   : > { %v1447_v37 = vpack.c.bf16 %v3110_v25, %v3110_v25  ;;  %v1444_v20 = vsel %vm1380_vm1, %v3110_v25, 0.0 }
 0x2c7   : > { %3113 = vpow2.f32 %v1610_v46 }
 0x2c8   : > { %v1506_v39 = vpop.permute.xlu2 %1505  ;;  %2690 = vmatmul.msk.bf16.vlgmr.msrb.gmra.mxu3 %vm1380_vm1, %v1447_v37 }
 0x2c9   : > { %v1511_v40 = vsel %vm1394_vm2, %v1506_v39, 0  ;;  %v1409_v29 = vpop.f32.mrf.mxu1 }
 0x2ca   : > { %1520 = vmatpush.bf16.msra.mxu1 %v1511_v40 }
 0x2cb   : > { %v3112_v43 = vpop.eup %3111 }
 0x2cc   : > { %v1557_v45 = vsel %vm1380_vm1, %v3112_v43, 0.0  ;;  %v1560_v49 = vpack.c.bf16 %v3112_v43, %v3112_v43 }
 0x2cd   : > { %2692 = vmatmul.msk.bf16.vlgmr.msra.gmra.mxu1 %vm1380_vm1, %v1504_v44  ;;  %1558 = vadd.xlane.f32.xlu2 %v1557_v45  ;;  %v3114_v51 = vpop.eup %3113 }
 0x2ce   : > { %1629 = vmatpush.bf16.msrb.mxu1 %v1620_v42  ;;  %v1615_v52 = vpack.c.bf16 %v3114_v51, %v3114_v51  ;;  %v1612_v11 = vsel %vm1380_vm1, %v3114_v51, 0.0 }
 0x2d3   : > { %1445 = vadd.xlane.f32.xlu0 %v1444_v20 }
 0x2d5   : > { %v1674_v48 = vpop.permute.xlu0 %1673  ;;  %1388 = vadd.xlane.f32.xlu2 %v1387_v47 }
 0x2d6   : > { %v1679_v50 = vsel %vm1394_vm2, %v1674_v48, 0  ;;  %v2761_v48 = vld [vmem:[#allocation15 + $0x70] sm:$0xf] }
 0x2d7   : > { %1688 = vmatpush.bf16.msrb.mxu3 %v1679_v50  ;;  %v2825_v50 = vld [vmem:[#allocation15 + $0xf0] sm:$0xf] }
 0x2d8   : > { %2694 = vmatmul.msk.bf16.vlgmr.msra.gmra.mxu3 %vm1380_vm1, %v1560_v49  ;;  %v2948_v49 = vld [vmem:[#allocation15 + $0x74] sm:$0xf0] }
 0x2d9   : > { %v2762_v51 = vor.u32 %v2948_v49, %v2761_v48  ;;  %v2954_v49 = vld [vmem:[#allocation15 + $0xa4] sm:$0xf0] }
 0x2db   : > { %2040 = vmatpush.bf16.msrb.mxu0 %v2762_v51  ;;  %v2723_v51 = vld [vmem:[#allocation15 + $0x28] sm:$0xf0] }
 0x2dd   : > { %2696 = vmatmul.msk.bf16.vlgmr.msrb.gmra.mxu1 %vm1380_vm1, %v1615_v52  ;;  %v2964_v52 = vld [vmem:[#allocation15 + $0xf4] sm:$0xf0] }
 0x2e0   : > { %v1777_v59 = vpop.xlane.xlu1 %1776 }
 0x2e1   : > { %v1778_v61 = vsub.f32 %v3864_v15, %v1777_v59  ;;  %v2753_v59 = vld [vmem:[#allocation15 + $0x60] sm:$0xf] }
 0x2e3   : > { %v1779_v1 = vmul.f32 1.442695, %v1778_v61  ;;  %v2946_v61 = vld [vmem:[#allocation15 + $0x64] sm:$0xf0] }
 0x300   : > { %v1664_v53 = vpop.xlane.xlu0 %1663 }
 0x301   : > { %v1665_v54 = vsub.f32 %v3857_v8, %v1664_v53  ;;  %v1721_v55 = vpop.xlane.xlu2 %1720  ;;  %v2947_v53 = vld [vmem:[#allocation15 + $0x74] sm:$0xf] }
 0x302   : > { %v1722_v56 = vsub.f32 %v3859_v9, %v1721_v55  ;;  %v2826_v55 = vor.u32 %v2964_v52, %v2825_v50  ;;  %v2937_v50 = vld [vmem:[#allocation15 + $0x24] sm:$0xf] }
 0x303   : > { %v1666_v57 = vmul.f32 1.442695, %v1665_v54  ;;  %v2763_v54 = vld [vmem:[#allocation15 + $0x78] sm:$0xf0]  ;;  %v2953_v52 = vld [vmem:[#allocation15 + $0xa4] sm:$0xf] }
 0x304   : > { %v1723_v58 = vmul.f32 1.442695, %v1722_v56  ;;  %v2766_v56 = vor.u32 %v2947_v53, %v2763_v54  ;;  %v2787_v53 = vld [vmem:[#allocation15 + $0xa8] sm:$0xf0] }
 0x305   : > { %3115 = vpow2.f32 %v1666_v57  ;;  %v2963_v57 = vld [vmem:[#allocation15 + $0xf4] sm:$0xf] }
 0x306   : > { %3117 = vpow2.f32 %v1723_v58  ;;  %v2827_v58 = vld [vmem:[#allocation15 + $0xf8] sm:$0xf0]  ;;  %2066 = vmatpush.bf16.msrb.mxu2 %v2766_v56  ;;  %v2726_v56 = vor.u32 %v2937_v50, %v2723_v51 }
 0x307   : > { %3119 = vpow2.f32 %v1779_v1 }
 0x30b   : > { %v3116_v60 = vpop.eup %3115 }
 0x30c   : > { %v3118_v62 = vpop.eup %3117  ;;  %v1671_v63 = vpack.c.bf16 %v3116_v60, %v3116_v60  ;;  %v1668_v4 = vsel %vm1380_vm1, %v3116_v60, 0.0  ;;  %v2830_v60 = vor.u32 %v2963_v57, %v2827_v58  ;;  %v2790_v57 = vor.u32 %v2953_v52, %v2787_v53  ;;  %v2713_v58 = vld [vmem:[#allocation15 + $0x10] sm:$0xf] }
 0x30d   : > { %v1725_v0 = vsel %vm1380_vm1, %v3118_v62, 0.0  ;;  %v3120_v5 = vpop.eup %3119  ;;  %v1728_v10 = vpack.c.bf16 %v3118_v62, %v3118_v62  ;;  %v2817_v62 = vld [vmem:[#allocation15 + $0xe0] sm:$0xf] }
 0x30e   : > { %2698 = vmatmul.msk.bf16.vlgmr.msrb.gmra.mxu3 %vm1380_vm1, %v1671_v63  ;;  %1726 = vadd.xlane.f32.xlu1 %v1725_v0  ;;  %v1784_v7 = vpack.c.bf16 %v3120_v5, %v3120_v5  ;;  %v1781_v9 = vsel %vm1380_vm1, %v3120_v5, 0.0  ;;  %v2962_v63 = vld [vmem:[#allocation15 + $0xe4] sm:$0xf0]  ;;  %v2754_v0 = vor.u32 %v2946_v61, %v2753_v59  ;;  %v2936_v59 = vld [vmem:[#allocation15 + $0x14] sm:$0xf0] }
 0x30f   : > { %v2818_v1 = vor.u32 %v2962_v63, %v2817_v62  ;;  %v2714_v61 = vor.u32 %v2936_v59, %v2713_v58  ;;  %v2952_v62 = vld [vmem:[#allocation15 + $0x94] sm:$0xf0]  ;;  %v2935_v63 = vld [vmem:[#allocation15 + $0x14] sm:$0xf] }
 0x310   : > { %2041 = vmatpush.bf16.msrb.mxu0 %v2754_v0  ;;  %v2715_v0 = vld [vmem:[#allocation15 + $0x18] sm:$0xf0] }
 0x313   : > { %v1786_v2 = vpop.permute.xlu0 %1785 }
 0x314   : > { %v1791_v3 = vsel %vm1394_vm2, %v1786_v2, 0  ;;  %v2945_v2 = vld [vmem:[#allocation15 + $0x64] sm:$0xf] }
 0x315   : > { %1800 = vmatpush.bf16.msra.mxu3 %v1791_v3  ;;  %v2755_v3 = vld [vmem:[#allocation15 + $0x68] sm:$0xf0] }
 0x316   : > { %1669 = vadd.xlane.f32.xlu1 %v1668_v4  ;;  %v2961_v4 = vld [vmem:[#allocation15 + $0xe4] sm:$0xf]  ;;  %v2758_v5 = vor.u32 %v2945_v2, %v2755_v3  ;;  %v2718_v2 = vor.u32 %v2935_v63, %v2715_v0  ;;  %v2951_v3 = vld [vmem:[#allocation15 + $0x94] sm:$0xf] }
 0x318   : > { %2067 = vmatpush.bf16.msrb.mxu2 %v2758_v5 }
 0x319   : > { %2079 = vmatpush.bf16.msrb.mxu3 %v2830_v60  ;;  %v2777_v60 = vld [vmem:[#allocation15 + $0x90] sm:$0xf] }
 0x31b   : > { %v1730_v6 = vpop.permute.xlu0 %1729 }
 0x31c   : > { %v1735_v8 = vsel %vm1394_vm2, %v1730_v6, 0  ;;  %v2819_v6 = vld [vmem:[#allocation15 + $0xe8] sm:$0xf0] }
 0x31d   : > { %1744 = vmatpush.bf16.msra.mxu1 %v1735_v8  ;;  %v2944_v8 = vld [vmem:[#allocation15 + $0x54] sm:$0xf0] }
 0x31e   : > { %2702 = vmatmul.msk.bf16.vlgmr.msra.gmra.mxu3 %vm1380_vm1, %v1784_v7  ;;  %1782 = vadd.xlane.f32.xlu1 %v1781_v9  ;;  %v2745_v7 = vld [vmem:[#allocation15 + $0x50] sm:$0xf]  ;;  %v2822_v9 = vor.u32 %v2961_v4, %v2819_v6  ;;  %v2779_v4 = vld [vmem:[#allocation15 + $0x98] sm:$0xf0]  ;;  %v2705_v6 = vld [vmem:[#allocation15] sm:$0xf] }
 0x31f   : > { %v2782_v5 = vor.u32 %v2951_v3, %v2779_v4 }
 0x320   : > { %2700 = vmatmul.msk.bf16.vlgmr.msra.gmra.mxu1 %vm1380_vm1, %v1728_v10  ;;  %v2809_v10 = vld [vmem:[#allocation15 + $0xd0] sm:$0xf]  ;;  %2080 = vmatpush.bf16.msrb.mxu3 %v2822_v9 }
 0x321   : > { %2053 = vmatpush.bf16.msrb.mxu1 %v2826_v55 }
 0x325   : > { %2054 = vmatpush.bf16.msrb.mxu1 %v2818_v1  ;;  %v2778_v1 = vor.u32 %v2952_v62, %v2777_v60 }
 0x326   : > { %1613 = vadd.xlane.f32.xlu1 %v1612_v11  ;;  %v2960_v11 = vld [vmem:[#allocation15 + $0xd4] sm:$0xf0] }
 0x332   : > { %v1503_v24 = vpop.xlane.xlu2 %1502 }
 0x340   : > { %v1559_v32 = vpop.xlane.xlu2 %1558 }
 0x346   : > { %v1446_v22 = vpop.xlane.xlu0 %1445 }
 0x347   : > { %3121 = vrcp.f32 %v1446_v22  ;;  %v2942_v22 = vld [vmem:[#allocation15 + $0x44] sm:$0xf0] }
 0x34a   : > { %v1522_v12 = vpop.f32.mrf.mxu1 }
 0x34b   : > { %v1466_v13 = vpop.f32.mrf.mxu3 }
 0x34d   : > { %v3122_v23 = vpop.eup %3121 }
 0x34e   : > { %v1471_v28 = vmul.f32 %v3122_v23, %v1466_v13  ;;  %v2746_v13 = vor.u32 %v2944_v8, %v2745_v7  ;;  %v2934_v7 = vld [vmem:[#allocation15 + $0x4] sm:$0xf0]  ;;  %v2769_v8 = vld [vmem:[#allocation15 + $0x80] sm:$0xf] }
 0x34f   : > { %v2706_v9 = vor.u32 %v2934_v7, %v2705_v6 }
 0x350   : > { %2042 = vmatpush.bf16.msrb.mxu0 %v2746_v13 }
 0x352   : > { %v1524_v14 = vpop.f32.mrf.mxu1 }
 0x353   : > { %v1468_v15 = vpop.f32.mrf.mxu3  ;;  %v2747_v14 = vld [vmem:[#allocation15 + $0x58] sm:$0xf0] }
 0x354   : > { %v2959_v15 = vld [vmem:[#allocation15 + $0xd4] sm:$0xf] }
 0x35a   : > { %v3901_v16 = vpop.f32.mrf.mxu1 }
 0x35b   : > { %v1578_v17 = vpop.f32.mrf.mxu3 }
 0x362   : > { %v1633_v18 = vpop.f32.mrf.mxu1 }
 0x363   : > { %v1580_v19 = vpop.f32.mrf.mxu3  ;;  %v2810_v18 = vor.u32 %v2960_v11, %v2809_v10  ;;  %v2950_v10 = vld [vmem:[#allocation15 + $0x84] sm:$0xf0]  ;;  %v2933_v11 = vld [vmem:[#allocation15 + $0x4] sm:$0xf] }
 0x364   : > { %v2770_v13 = vor.u32 %v2950_v10, %v2769_v8 }
 0x365   : > { %2055 = vmatpush.bf16.msrb.mxu1 %v2810_v18 }
 0x381   : > { %v1727_v21 = vpop.xlane.xlu1 %1726 }
 0x389   : > { %v1670_v35 = vpop.xlane.xlu1 %1669 }
 0x38a   : > { %3123 = vrcp.f32 %v1670_v35  ;;  %v2801_v35 = vld [vmem:[#allocation15 + $0xc0] sm:$0xf] }
 0x38b   : > { %3125 = vrcp.f32 %v1503_v24  ;;  %v2958_v24 = vld [vmem:[#allocation15 + $0xc4] sm:$0xf0] }
 0x38c   : > { %3127 = vrcp.f32 %v1727_v21  ;;  %v2737_v21 = vld [vmem:[#allocation15 + $0x40] sm:$0xf] }
 0x38d   : > { %3129 = vrcp.f32 %v1559_v32  ;;  %v2802_v32 = vor.u32 %v2958_v24, %v2801_v35 }
 0x38f   : > { %2056 = vmatpush.bf16.msrb.mxu1 %v2802_v32 }
 0x390   : > { %v3124_v26 = vpop.eup %3123 }
 0x391   : > { %v1690_v27 = vpop.f32.mrf.mxu3  ;;  %v1783_v33 = vpop.xlane.xlu1 %1782 }
 0x392   : > { %v1695_v30 = vmul.f32 %v3124_v26, %v1690_v27  ;;  %3131 = vrcp.f32 %v1783_v33  ;;  %v3126_v25 = vpop.eup %3125  ;;  %v2941_v26 = vld [vmem:[#allocation15 + $0x44] sm:$0xf]  ;;  %v2739_v27 = vld [vmem:[#allocation15 + $0x48] sm:$0xf0] }
 0x393   : > { %v3128_v37 = vpop.eup %3127  ;;  %v1527_v39 = vmul.f32 %v3126_v25, %v1522_v12  ;;  %v2943_v12 = vld [vmem:[#allocation15 + $0x54] sm:$0xf]  ;;  %v2742_v33 = vor.u32 %v2941_v26, %v2739_v27  ;;  %v2940_v25 = vld [vmem:[#allocation15 + $0x34] sm:$0xf0] }
 0x394   : > { %v3090_v31 = vpack.i.bf16 %v1695_v30, %v1471_v28  ;;  %v3130_v29 = vpop.eup %3129  ;;  %v2750_v19 = vor.u32 %v2943_v12, %v2747_v14  ;;  %v2957_v28 = vld [vmem:[#allocation15 + $0xc4] sm:$0xf]  ;;  %v2803_v30 = vld [vmem:[#allocation15 + $0xc8] sm:$0xf0] }
 0x395   : > { %v1583_v44 = vmul.f32 %v3130_v29, %v1578_v17  ;;  %v2811_v17 = vld [vmem:[#allocation15 + $0xd8] sm:$0xf0]  ;;  %v2707_v12 = vld [vmem:[#allocation15 + $0x8] sm:$0xf0] }
 0x396   : > { %3091 = vrot.lane.b32.xlu2 %v3090_v31, %s3503_s29  ;;  %v2814_v23 = vor.u32 %v2959_v15, %v2811_v17  ;;  %v2738_v31 = vor.u32 %v2942_v22, %v2737_v21  ;;  %2068 = vmatpush.bf16.msrb.mxu2 %v2750_v19  ;;  %v2731_v29 = vld [vmem:[#allocation15 + $0x38] sm:$0xf0]  ;;  %v2710_v14 = vor.u32 %v2933_v11, %v2707_v12  ;;  %v2949_v15 = vld [vmem:[#allocation15 + $0x84] sm:$0xf]  ;;  %v2771_v17 = vld [vmem:[#allocation15 + $0x88] sm:$0xf0]  ;;  %v1389_v19 = vpop.xlane.xlu2 %1388 }
 0x397   : > { %v2774_v18 = vor.u32 %v2949_v15, %v2771_v17  ;;  %3133 = vrcp.f32 %v1389_v19 }
 0x398   : > { %v3132_v42 = vpop.eup %3131  ;;  %2081 = vmatpush.bf16.msrb.mxu3 %v2814_v23  ;;  %2043 = vmatpush.bf16.msrb.mxu0 %v2738_v31 }
 0x399   : > { %v1692_v36 = vpop.f32.mrf.mxu3  ;;  %v1614_v21 = vpop.xlane.xlu1 %1613 }
 0x39a   : > { %v2729_v36 = vld [vmem:[#allocation15 + $0x30] sm:$0xf]  ;;  %2069 = vmatpush.bf16.msrb.mxu2 %v2742_v33  ;;  %3135 = vrcp.f32 %v1614_v21 }
 0x39d   : > { %v1746_v38 = vpop.f32.mrf.mxu1  ;;  %v3134_v35 = vpop.eup %3133 }
 0x39e   : > { %v1751_v40 = vmul.f32 %v3128_v37, %v1746_v38  ;;  %v2793_v37 = vld [vmem:[#allocation15 + $0xb0] sm:$0xf]  ;;  %v2806_v38 = vor.u32 %v2957_v28, %v2803_v30  ;;  %v1412_v31 = vmul.f32 %v3134_v35, %v3876_v34  ;;  %v1874_v34 = vld [vmem:[#allocation16] sm:$0x3] }
 0x3a0   : > { %v3095_v41 = vpack.i.bf16 %v1751_v40, %v1527_v39  ;;  %v2956_v39 = vld [vmem:[#allocation15 + $0xb4] sm:$0xf0]  ;;  %v2939_v40 = vld [vmem:[#allocation15 + $0x34] sm:$0xf]  ;;  %2082 = vmatpush.bf16.msrb.mxu3 %v2806_v38  ;;  %v3136_v23 = vpop.eup %3135 }
 0x3a1   : > { %v1802_v43 = vpop.f32.mrf.mxu3  ;;  %v1636_v32 = vmul.f32 %v3136_v23, %v3901_v16 }
 0x3a2   : > { %v1807_v45 = vmul.f32 %v3132_v42, %v1802_v43  ;;  %3096 = vrot.lane.b32.xlu1 %v3095_v41, %s3502_s30  ;;  %v2955_v41 = vld [vmem:[#allocation15 + $0xb4] sm:$0xf]  ;;  %v2795_v42 = vld [vmem:[#allocation15 + $0xb8] sm:$0xf0]  ;;  %v2730_v43 = vor.u32 %v2940_v25, %v2729_v36 }
 0x3a3   : > { %v2798_v48 = vor.u32 %v2955_v41, %v2795_v42 }
 0x3a4   : > { %v3100_v46 = vpack.i.bf16 %v1807_v45, %v1583_v44  ;;  %v2794_v44 = vor.u32 %v2956_v39, %v2793_v37  ;;  %v2734_v45 = vor.u32 %v2939_v40, %v2731_v29  ;;  %2044 = vmatpush.bf16.msrb.mxu0 %v2730_v43 }
 0x3a5   : > { %v1748_v20 = vpop.f32.mrf.mxu1  ;;  %2083 = vmatpush.bf16.msrb.mxu3 %v2798_v48 }
 0x3a6   : > { %3101 = vrot.lane.b32.xlu0 %v3100_v46, %s3504_s4  ;;  %v2721_v46 = vld [vmem:[#allocation15 + $0x20] sm:$0xf]  ;;  %v2938_v20 = vld [vmem:[#allocation15 + $0x24] sm:$0xf0]  ;;  %2057 = vmatpush.bf16.msrb.mxu1 %v2794_v44 }
 0x3a7   : > { %v2722_v54 = vor.u32 %v2938_v20, %v2721_v46  ;;  %2070 = vmatpush.bf16.msrb.mxu2 %v2734_v45  ;;  %v1876_v45 = vperm.slane %v1874_v34, 0  ;;  %v1877_v46 = vperm.slane %v1874_v34, 1 }
 0x3a9   : > { %v1804_v47 = vpop.f32.mrf.mxu3  ;;  %2045 = vmatpush.bf16.msrb.mxu0 %v2722_v54  ;;  %2084 = vmatpush.bf16.msrb.mxu3 %v2790_v57 }
 0x3aa   : > { %v2785_v47 = vld [vmem:[#allocation15 + $0xa0] sm:$0xf] }
 0x3ab   : > { %v2786_v55 = vor.u32 %v2954_v49, %v2785_v47  ;;  %2071 = vmatpush.bf16.msrb.mxu2 %v2726_v56 }
 0x3ad   : > { %2058 = vmatpush.bf16.msrb.mxu1 %v2786_v55  ;;  %2046 = vmatpush.bf16.msrb.mxu0 %v2714_v61 }
 0x3ae   : > { %2085 = vmatpush.bf16.msrb.mxu3 %v2782_v5 }
 0x3af   : > { %2072 = vmatpush.bf16.msrb.mxu2 %v2718_v2 }
 0x3b1   : > { %2059 = vmatpush.bf16.msrb.mxu1 %v2778_v1  ;;  %2047 = vmatpush.bf16.msrb.mxu0 %v2706_v9 }
 0x3b2   : > { %2086 = vmatpush.bf16.msrb.mxu3 %v2774_v18 }
 0x3b3   : > { %2073 = vmatpush.bf16.msrb.mxu2 %v2710_v14 }
 0x3b5   : > { %2060 = vmatpush.bf16.msrb.mxu1 %v2770_v13 }
 0x3f0   : > { %v3092_v22 = vpop.permute.xlu2 %3091 }
 0x3f1   : > { %v3094_v26 = vunpack.i.h.bf16 %v3092_v22  ;;  %v3093_v27 = vunpack.i.l.bf16 %v3092_v22 }
 0x3f3   : > { %v1837_v36 = vsel %vm1360_vm0, %v1636_v32, %v3094_v26  ;;  %v1832_v25 = vsel %vm1360_vm0, %v1412_v31, %v3093_v27 }
 0x414   : > { %v3097_v24 = vpop.permute.xlu1 %3096 }
 0x415   : > { %v3099_v28 = vunpack.i.h.bf16 %v3097_v24  ;;  %v3098_v30 = vunpack.i.l.bf16 %v3097_v24 }
 0x417   : > { %v1834_v39 = vsel %vm1833_vm3, %v1832_v25, %v3098_v30  ;;  %v1838_v40 = vsel %vm1833_vm3, %v1837_v36, %v3099_v28 }
 0x418   : > { %v3102_v33 = vpop.permute.xlu0 %3101 }
 0x419   : > { %v3104_v37 = vunpack.i.h.bf16 %v3102_v33  ;;  %v3103_v38 = vunpack.i.l.bf16 %v3102_v33 }
 0x41b   : > { %v1836_v29 = vsel %vm1835_vm4, %v1834_v39, %v3103_v38  ;;  %v1839_v41 = vsel %vm1835_vm4, %v1838_v40, %v3104_v37 }
 0x41c   : > { %v1840_v42 = vpack.c.bf16 %v1836_v29, %v1836_v29  ;;  %v1841_v43 = vpack.c.bf16 %v1839_v41, %v1839_v41 }
 0x41e   : > { %2048 = vmatmul.bf16.vlgmr.msrb.gmra.mxu0 %v1840_v42  ;;  %2061 = vmatmul.bf16.vlgmr.msrb.gmra.mxu1 %v1841_v43 }
 0x41f   : > { %2074 = vmatmul.bf16.vlgmr.msrb.gmra.mxu2 %v1840_v42  ;;  %2087 = vmatmul.bf16.vlgmr.msrb.gmra.mxu3 %v1841_v43 }
 0x49b   : > { %v2049_v16 = vpop.f32.mrf.mxu0  ;;  %v2062_v44 = vpop.f32.mrf.mxu1 }
 0x49c   : > { %v2050_v20 = vadd.f32 %v2049_v16, %v1876_v45 }
 0x49e   : > { %v2063_v52 = vadd.f32 %v2062_v44, %v2050_v20 }
 0x4a2   : > { %v2075_v47 = vpop.f32.mrf.mxu2  ;;  %v2088_v48 = vpop.f32.mrf.mxu3 }
 0x4a3   : > { %v2076_v49 = vadd.f32 %v2075_v47, %v1877_v46  ;;  %v2051_v50 = vpop.f32.mrf.mxu0  ;;  %v2064_v51 = vpop.f32.mrf.mxu1 }
 0x4a5   : > { %v2089_v53 = vadd.f32 %v2088_v48, %v2076_v49 }
 0x4a7   : > { %v2092_v54 = vpack.c.bf16 %v2089_v53, %v2063_v52 }
 0x4a9   : > { %2093 = vst [vmem:[%s593_s9] sm:$0xff] %v2092_v54 }
 0x4aa   : > { %v2077_v55 = vpop.f32.mrf.mxu2  ;;  %v2090_v56 = vpop.f32.mrf.mxu3 }
 0x4ab PF: > { %s3970_s20 = sld [smem:[#allocation24_spill]]  ;;  %s3972_s17 = smov %s3483_s18 }
 0x4ac   : > { %s3971_s5 = sld [smem:[#allocation25_spill]]  ;;  %s3973_s18 = smov %s3487_s19 }
 0x4b1   : > { %p28_p3 = scmp.ge.s32.totalorder %s3970_s20, 4  }
 0x4b2   : > { %s3974_s19 = smov %s3971_s5 }
 0x4b3   :  { %30 = sbr.rel (!%p28_p3) target bundleno = 17 (0x11), region = 156 }
 0x4b8   :  { %2115 = vsyncpa [#allocation3], 1 }
 0x4b9   :  { %2117 = vsyncpa [#allocation3 + $0x1], 1 }
 0x4ba   :  { %2118 = vsyncpa [#allocation5], 1 }
 0x4bb   :  { %2120 = vsyncpa [#allocation5 + $0x1], 1 }
 0x4bc   :  { %2121 = vsyncpa [#allocation8], 1 }
 0x4bd   :  { %2122 = vsyncpa [#allocation11], 1 }
 0x4be   :  { %2123 = vsyncpa [#allocation14], 1 }
 0x4bf   :  { %2124 = vsyncpa [#allocation17], 1 }

</bundles_post_ra>
